<compile_context>
chip_gen: v7x
topology: tpu7x:2x2x1
jax: 0.10.0
libtpu: 0.0.40
codegen_flags: <defaults>
</compile_context>

<pallas_src>
import numpy as np
import jax
import jax.numpy as jnp
from jax.experimental import pallas as pl
from jax.experimental.pallas import tpu as pltpu


NUM_CLASSES = 4
NUM_ANCHORS = 3
NO = 5 + NUM_CLASSES                       # per-anchor outputs
ANCHORS_NP = np.array([[10., 13.], [16., 30.], [33., 23.]], dtype=np.float32)
ANCHORS = jnp.asarray(ANCHORS_NP)


# ----------------------------------------------------------------------------
# Static (trace-time) geometry helpers for the fused kernel
# ----------------------------------------------------------------------------
def _conv_geometry(Hin, Win):
    """Geometry for the 3-conv backbone (strides 2,2,1; all k=3, pad=1)."""
    geo = []
    H, W = Hin, Win
    for stride in (2, 2, 1):
        Hq, Wq = H + 2, W + 2                       # pad-1 input grid
        Ho = (H + 2 - 3) // stride + 1
        Wo = (W + 2 - 3) // stride + 1
        # rows of the "anchor-position" conv result needed so every strided
        # output position is covered (full-resolution trick over the flat grid)
        M = stride * (Ho - 1) * Wq + stride * (Wo - 1) + 1
        assert M + 2 * Wq + 2 <= Hq * Wq            # tap slices stay in-bounds
        geo.append(dict(Hq=Hq, Wq=Wq, Ho=Ho, Wo=Wo, M=M, stride=stride))
        H, W = Ho, Wo
    return geo


def _select_matrix(Ho, Wo, Wq_src, stride, M_src, Hq_dst, Wq_dst, pad_dst):
    """Dense 0/1 matrix mapping full-resolution conv columns to the next
    layer's zero-padded flat grid (stride subsample + re-pad in one matmul).
    Built once on the host; padded destination positions stay all-zero."""
    S = np.zeros((M_src, Hq_dst * Wq_dst), np.float32)
    for i in range(Ho):
        for j in range(Wo):
            src = stride * i * Wq_src + stride * j
            dst = (i + pad_dst) * Wq_dst + (j + pad_dst)
            S[src, dst] = 1.0
    return S


def _decode_consts(Hf, Wf):
    """Decode helpers in (row=channel, col=position) layout:
       rowmask (A*NO, 4) = [is_x, is_y, is_wh, anchor_value]
       gxy     (2, Hf*Wf) = [grid_x; grid_y]."""
    C = NUM_ANCHORS * NO
    within = np.arange(C) % NO
    aidx = np.arange(C) // NO
    m_x = (within == 0).astype(np.float32)
    m_y = (within == 1).astype(np.float32)
    m_wh = ((within == 2) | (within == 3)).astype(np.float32)
    anc = np.where(within == 2, ANCHORS_NP[aidx, 0],
                   np.where(within == 3, ANCHORS_NP[aidx, 1], 0.0))
    rowmask = np.stack([m_x, m_y, m_wh, anc], axis=1).astype(np.float32)
    p = np.arange(Hf * Wf)
    gxy = np.stack([(p % Wf).astype(np.float32),
                    (p // Wf).astype(np.float32)], axis=0)
    return rowmask, gxy.astype(np.float32)


# ----------------------------------------------------------------------------
# Fused Pallas forward
# ----------------------------------------------------------------------------
def yolo_forward(params, x_nchw):
    """x_nchw: (B, 3, Hin, Win) float32 -> (B, A*H*W, 5+nc) predictions."""
    B, Cin, Hin, Win = x_nchw.shape
    g1, g2, g3 = _conv_geometry(Hin, Win)
    HWf = g3["Ho"] * g3["Wo"]
    stride_out = float(Hin) / float(g3["Ho"])
    CINP = ((Cin + 7) // 8) * 8                       # conv1 in-channels padded

    # ---- host-side (trace-time) constant aux tables -------------------------
    S1 = jnp.asarray(_select_matrix(g1["Ho"], g1["Wo"], g1["Wq"], g1["stride"],
                                    g1["M"], g2["Hq"], g2["Wq"], 1))
    S2 = jnp.asarray(_select_matrix(g2["Ho"], g2["Wo"], g2["Wq"], g2["stride"],
                                    g2["M"], g3["Hq"], g3["Wq"], 1))
    S3 = jnp.asarray(_select_matrix(g3["Ho"], g3["Wo"], g3["Wq"], g3["stride"],
                                    g3["M"], g3["Ho"], g3["Wo"], 0))
    rowmask_np, gxy_np = _decode_consts(g3["Ho"], g3["Wo"])
    rowmask = jnp.asarray(rowmask_np)
    gxy = jnp.asarray(gxy_np)

    # ---- inputs: NCHW -> channels-on-sublanes padded flat grid ---------------
    xp = jnp.pad(x_nchw, ((0, 0), (0, CINP - Cin), (1, 1), (1, 1)))
    x = xp.reshape(B, CINP, g1["Hq"] * g1["Wq"])

    # weights repacked to (cout, 9*cin_pad): column = tap*cin_pad + cin
    def repack(w, cin, cin_pad, cout):
        w = w.reshape(9, cin, cout)
        w = jnp.pad(w, ((0, 0), (0, cin_pad - cin), (0, 0)))
        return jnp.transpose(w, (2, 0, 1)).reshape(cout, 9 * cin_pad)

    C1 = params["w1"].shape[1]
    C2 = params["w2"].shape[1]
    C3 = params["w3"].shape[1]
    CH = params["wh"].shape[1]                       # = A*NO
    w1 = repack(params["w1"], Cin, CINP, C1)
    w2 = repack(params["w2"], C1, C1, C2)
    w3 = repack(params["w3"], C2, C2, C3)
    wh = jnp.transpose(params["wh"], (1, 0))         # (A*NO, C3)
    b1 = params["b1"].reshape(C1, 1)
    b2 = params["b2"].reshape(C2, 1)
    b3 = params["b3"].reshape(C3, 1)
    bh = params["bh"].reshape(CH, 1)

    M1, M2, M3 = g1["M"], g2["M"], g3["M"]
    Wq1, Wq2, Wq3 = g1["Wq"], g2["Wq"], g3["Wq"]

    def kernel(x_ref, w1_ref, b1_ref, w2_ref, b2_ref, w3_ref, b3_ref,
               wh_ref, bh_ref, s1_ref, s2_ref, s3_ref, rm_ref, gxy_ref, o_ref):

        def conv_silu(src, Wq, M, w, b):
            # 9 taps as static lane-offset slices of the flat padded grid,
            # fused along K into a single (cout, 9*cin) @ (9*cin, M) matmul.
            taps = jnp.concatenate(
                [src[:, kh * Wq + kw: kh * Wq + kw + M]
                 for kh in range(3) for kw in range(3)], axis=0)
            z = jnp.dot(w, taps, preferred_element_type=jnp.float32) + b
            return z * jax.nn.sigmoid(z)                    # SiLU

        w1v, b1v = w1_ref[...], b1_ref[...]
        w2v, b2v = w2_ref[...], b2_ref[...]
        w3v, b3v = w3_ref[...], b3_ref[...]
        whv, bhv = wh_ref[...], bh_ref[...]
        s1v, s2v, s3v = s1_ref[...], s2_ref[...], s3_ref[...]

        # decode constants, hoisted out of the batch loop
        m_x = rm_ref[:, 0:1]
        m_y = rm_ref[:, 1:2]
        m_wh = rm_ref[:, 2:3]
        anc = rm_ref[:, 3:4]
        gx = gxy_ref[0:1, :]
        gy = gxy_ref[1:2, :]
        grid_xy = m_x * gx + m_y * gy                       # (A*NO, HWf)
        m_xy = m_x + m_y
        m_rest = 1.0 - m_xy - m_wh

        for b in range(B):                                  # static unroll
            # conv1 (stride 2) on the padded input image
            a1 = conv_silu(x_ref[b], Wq1, M1, w1v, b1v)     # (C1, M1)
            p2 = jnp.dot(a1, s1v, preferred_element_type=jnp.float32)
            # conv2 (stride 2)
            a2 = conv_silu(p2, Wq2, M2, w2v, b2v)           # (C2, M2)
            p3 = jnp.dot(a2, s2v, preferred_element_type=jnp.float32)
            # conv3 (stride 1)
            a3 = conv_silu(p3, Wq3, M3, w3v, b3v)           # (C3, M3)
            feat = jnp.dot(a3, s3v, preferred_element_type=jnp.float32)
            # 1x1 Detect head
            raw = jnp.dot(whv, feat,
                          preferred_element_type=jnp.float32) + bhv  # (A*NO,HWf)
            # YOLOv5 decode, channels on sublanes / positions on lanes
            sig = jax.nn.sigmoid(raw)
            xy = (sig * 2.0 - 0.5 + grid_xy) * stride_out
            wh2 = (sig * 2.0) * (sig * 2.0) * anc
            dec = m_xy * xy + m_wh * wh2 + m_rest * sig
            o_ref[b, :, :] = dec                            # lane-dense slab

    vmem = pl.BlockSpec(memory_space=pltpu.MemorySpace.VMEM)
    out = pl.pallas_call(
        kernel,
        out_shape=jax.ShapeDtypeStruct((B, NUM_ANCHORS * NO, HWf), jnp.float32),
        in_specs=[vmem] * 14,
        out_specs=vmem,
    )(x, w1, b1, w2, b2, w3, b3, wh, bh, S1, S2, S3, rowmask, gxy)

    # recover YOLOv5 (anchor, y, x, out) ordering with a cheap wrapper reshape
    out = out.reshape(B, NUM_ANCHORS, NO, HWf)
    out = jnp.transpose(out, (0, 1, 3, 2))
    return out.reshape(B, NUM_ANCHORS * HWf, NO)


# ----------------------------------------------------------------------------
# Pure-JAX reference of the same math (for the self-check)
# ----------------------------------------------------------------------------
def _im2col(x_nhwc, k, stride, pad):
    B, H, W, C = x_nhwc.shape
    xp = jnp.pad(x_nhwc, ((0, 0), (pad, pad), (pad, pad), (0, 0)))
    Ho = (H + 2 * pad - k) // stride + 1
    Wo = (W + 2 * pad - k) // stride + 1
    cols = []
    for i in range(k):
        for j in range(k):
            cols.append(xp[:, i:i + stride * Ho:stride,
                           j:j + stride * Wo:stride, :])
    return jnp.concatenate(cols, axis=-1), Ho, Wo


def _conv_silu_ref(x_nhwc, w, b, k, stride, pad):
    patches, Ho, Wo = _im2col(x_nhwc, k, stride, pad)
    B = x_nhwc.shape[0]
    out = patches.reshape(B * Ho * Wo, -1) @ w + b.reshape(1, -1)
    out = out * jax.nn.sigmoid(out)
    return out.reshape(B, Ho, Wo, -1)


def yolo_forward_ref(params, x_nchw):
    x = jnp.transpose(x_nchw, (0, 2, 3, 1))
    f = _conv_silu_ref(x, params["w1"], params["b1"], 3, 2, 1)
    f = _conv_silu_ref(f, params["w2"], params["b2"], 3, 2, 1)
    f = _conv_silu_ref(f, params["w3"], params["b3"], 3, 1, 1)
    B, H, W, Cf = f.shape
    head = f.reshape(B * H * W, Cf) @ params["wh"] + params["bh"].reshape(1, -1)
    head = head.reshape(B, H, W, NUM_ANCHORS, NO)
    head = jnp.transpose(head, (0, 3, 1, 2, 4))
    M = B * NUM_ANCHORS * H * W
    raw = head.reshape(M, NO)
    stride = float(x_nchw.shape[2] // H)
    gy, gx = jnp.meshgrid(jnp.arange(H, dtype=jnp.float32),
                          jnp.arange(W, dtype=jnp.float32), indexing="ij")
    grid2 = jnp.broadcast_to(jnp.stack([gx, gy], axis=-1),
                             (B, NUM_ANCHORS, H, W, 2)).reshape(M, 2)
    anc2 = jnp.broadcast_to(ANCHORS[None, :, None, None, :],
                            (B, NUM_ANCHORS, H, W, 2)).reshape(M, 2)
    sig = jax.nn.sigmoid(raw)
    col = jnp.arange(NO)[None, :]
    grid_full = jnp.concatenate([grid2, jnp.zeros((M, NO - 2))], axis=-1)
    anc_full = jnp.concatenate(
        [jnp.zeros((M, 2)), anc2, jnp.zeros((M, NO - 4))], axis=-1)
    xy = (sig * 2.0 - 0.5 + grid_full) * stride
    wh = (sig * 2.0) ** 2 * anc_full
    dec = jnp.where(col < 2, xy, jnp.where(col < 4, wh, sig))
    return dec.reshape(B, NUM_ANCHORS * H * W, NO)


# ----------------------------------------------------------------------------
# Synthetic parameters
# ----------------------------------------------------------------------------
def init_params(key):
    ks = jax.random.split(key, 8)

    def w(k, shape, fan_in):
        return jax.random.normal(k, shape, jnp.float32) / jnp.sqrt(fan_in)

    return {
        "w1": w(ks[0], (3 * 3 * 3, 8), 27),
        "b1": 0.05 * jax.random.normal(ks[1], (8,), jnp.float32),
        "w2": w(ks[2], (3 * 3 * 8, 16), 72),
        "b2": 0.05 * jax.random.normal(ks[3], (16,), jnp.float32),
        "w3": w(ks[4], (3 * 3 * 16, 16), 144),
        "b3": 0.05 * jax.random.normal(ks[5], (16,), jnp.float32),
        "wh": w(ks[6], (16, NUM_ANCHORS * NO), 16),
        "bh": 0.1 * jax.random.normal(ks[7], (NUM_ANCHORS * NO,), jnp.float32),
    }


if __name__ == "__main__":
    key = jax.random.PRNGKey(0)
    pkey, xkey = jax.random.split(key)
    params = init_params(pkey)

    # Small image batch consistent with the module's forward (NCHW images).
    x = jax.random.uniform(xkey, (2, 3, 32, 32), jnp.float32)

    out = jax.block_until_ready(yolo_forward(params, x))
    ref = jax.block_until_ready(yolo_forward_ref(params, x))

    assert out.shape == (2, NUM_ANCHORS * 8 * 8, NO), out.shape
    # Both kernel and reference use default (fast) MXU matmul precision.
    assert jnp.allclose(out, ref, atol=2e-2, rtol=2e-2), \
        float(jnp.max(jnp.abs(out - ref)))

    print("KERNEL_OK")
</pallas_src>

<mosaic_0001>
module attributes {stable_mosaic.version = 11 : i64} {
  func.func @kernel(%arg0: memref<2x8x1156xf32, #tpu.memory_space<vmem>>, %arg1: memref<8x72xf32, #tpu.memory_space<vmem>>, %arg2: memref<8x1xf32, #tpu.memory_space<vmem>>, %arg3: memref<16x72xf32, #tpu.memory_space<vmem>>, %arg4: memref<16x1xf32, #tpu.memory_space<vmem>>, %arg5: memref<16x144xf32, #tpu.memory_space<vmem>>, %arg6: memref<16x1xf32, #tpu.memory_space<vmem>>, %arg7: memref<27x16xf32, #tpu.memory_space<vmem>>, %arg8: memref<27x1xf32, #tpu.memory_space<vmem>>, %arg9: memref<1051x324xf32, #tpu.memory_space<vmem>>, %arg10: memref<267x100xf32, #tpu.memory_space<vmem>>, %arg11: memref<78x64xf32, #tpu.memory_space<vmem>>, %arg12: memref<27x4xf32, #tpu.memory_space<vmem>>, %arg13: memref<2x64xf32, #tpu.memory_space<vmem>>, %arg14: memref<2x27x64xf32, #tpu.memory_space<vmem>>) attributes {dimension_semantics = [], scalar_prefetch = 0 : i64, scratch_operands = 0 : i64, tpu.core_type = #tpu.core_type<tc>} {
    %c0 = arith.constant 0 : index
    %c0_0 = arith.constant 0 : index
    %0 = vector.load %arg1[%c0, %c0_0] : memref<8x72xf32, #tpu.memory_space<vmem>>, vector<8x72xf32>
    %c0_1 = arith.constant 0 : index
    %c0_2 = arith.constant 0 : index
    %1 = vector.load %arg2[%c0_1, %c0_2] : memref<8x1xf32, #tpu.memory_space<vmem>>, vector<8x1xf32>
    %c0_3 = arith.constant 0 : index
    %c0_4 = arith.constant 0 : index
    %2 = vector.load %arg3[%c0_3, %c0_4] : memref<16x72xf32, #tpu.memory_space<vmem>>, vector<16x72xf32>
    %c0_5 = arith.constant 0 : index
    %c0_6 = arith.constant 0 : index
    %3 = vector.load %arg4[%c0_5, %c0_6] : memref<16x1xf32, #tpu.memory_space<vmem>>, vector<16x1xf32>
    %c0_7 = arith.constant 0 : index
    %c0_8 = arith.constant 0 : index
    %4 = vector.load %arg5[%c0_7, %c0_8] : memref<16x144xf32, #tpu.memory_space<vmem>>, vector<16x144xf32>
    %c0_9 = arith.constant 0 : index
    %c0_10 = arith.constant 0 : index
    %5 = vector.load %arg6[%c0_9, %c0_10] : memref<16x1xf32, #tpu.memory_space<vmem>>, vector<16x1xf32>
    %c0_11 = arith.constant 0 : index
    %c0_12 = arith.constant 0 : index
    %6 = vector.load %arg7[%c0_11, %c0_12] : memref<27x16xf32, #tpu.memory_space<vmem>>, vector<27x16xf32>
    %c0_13 = arith.constant 0 : index
    %c0_14 = arith.constant 0 : index
    %7 = vector.load %arg8[%c0_13, %c0_14] : memref<27x1xf32, #tpu.memory_space<vmem>>, vector<27x1xf32>
    %c0_15 = arith.constant 0 : index
    %c0_16 = arith.constant 0 : index
    %8 = vector.load %arg9[%c0_15, %c0_16] : memref<1051x324xf32, #tpu.memory_space<vmem>>, vector<1051x324xf32>
    %c0_17 = arith.constant 0 : index
    %c0_18 = arith.constant 0 : index
    %9 = vector.load %arg10[%c0_17, %c0_18] : memref<267x100xf32, #tpu.memory_space<vmem>>, vector<267x100xf32>
    %c0_19 = arith.constant 0 : index
    %c0_20 = arith.constant 0 : index
    %10 = vector.load %arg11[%c0_19, %c0_20] : memref<78x64xf32, #tpu.memory_space<vmem>>, vector<78x64xf32>
    %c0_21 = arith.constant 0 : index
    %c0_22 = arith.constant 0 : index
    %11 = vector.load %arg12[%c0_21, %c0_22] : memref<27x4xf32, #tpu.memory_space<vmem>>, vector<27x1xf32>
    %c0_23 = arith.constant 0 : index
    %c1 = arith.constant 1 : index
    %12 = vector.load %arg12[%c0_23, %c1] : memref<27x4xf32, #tpu.memory_space<vmem>>, vector<27x1xf32>
    %c0_24 = arith.constant 0 : index
    %c2 = arith.constant 2 : index
    %13 = vector.load %arg12[%c0_24, %c2] : memref<27x4xf32, #tpu.memory_space<vmem>>, vector<27x1xf32>
    %c0_25 = arith.constant 0 : index
    %c3 = arith.constant 3 : index
    %14 = vector.load %arg12[%c0_25, %c3] : memref<27x4xf32, #tpu.memory_space<vmem>>, vector<27x1xf32>
    %c0_26 = arith.constant 0 : index
    %c0_27 = arith.constant 0 : index
    %15 = vector.load %arg13[%c0_26, %c0_27] : memref<2x64xf32, #tpu.memory_space<vmem>>, vector<1x64xf32>
    %c1_28 = arith.constant 1 : index
    %c0_29 = arith.constant 0 : index
    %16 = vector.load %arg13[%c1_28, %c0_29] : memref<2x64xf32, #tpu.memory_space<vmem>>, vector<1x64xf32>
    %17 = vector.broadcast %11 : vector<27x1xf32> to vector<27x64xf32>
    %18 = vector.broadcast %15 : vector<1x64xf32> to vector<27x64xf32>
    %19 = arith.mulf %17, %18 : vector<27x64xf32>
    %20 = vector.broadcast %12 : vector<27x1xf32> to vector<27x64xf32>
    %21 = vector.broadcast %16 : vector<1x64xf32> to vector<27x64xf32>
    %22 = arith.mulf %20, %21 : vector<27x64xf32>
    %23 = arith.addf %19, %22 : vector<27x64xf32>
    %24 = arith.addf %11, %12 : vector<27x1xf32>
    %cst = arith.constant 1.000000e+00 : f32
    %25 = vector.broadcast %cst : f32 to vector<27x1xf32>
    %26 = arith.subf %25, %24 : vector<27x1xf32>
    %27 = arith.subf %26, %13 : vector<27x1xf32>
    %c0_30 = arith.constant 0 : index
    %c0_31 = arith.constant 0 : index
    %c0_32 = arith.constant 0 : index
    %28 = vector.load %arg0[%c0_30, %c0_31, %c0_32] : memref<2x8x1156xf32, #tpu.memory_space<vmem>>, vector<1x8x1156xf32>
    %29 = vector.shape_cast %28 : vector<1x8x1156xf32> to vector<8x1156xf32>
    %30 = vector.extract_strided_slice %29 {offsets = [0, 0], sizes = [8, 1051], strides = [1, 1]} : vector<8x1156xf32> to vector<8x1051xf32>
    %31 = vector.extract_strided_slice %29 {offsets = [0, 1], sizes = [8, 1051], strides = [1, 1]} : vector<8x1156xf32> to vector<8x1051xf32>
    %32 = vector.extract_strided_slice %29 {offsets = [0, 2], sizes = [8, 1051], strides = [1, 1]} : vector<8x1156xf32> to vector<8x1051xf32>
    %33 = vector.extract_strided_slice %29 {offsets = [0, 34], sizes = [8, 1051], strides = [1, 1]} : vector<8x1156xf32> to vector<8x1051xf32>
    %34 = vector.extract_strided_slice %29 {offsets = [0, 35], sizes = [8, 1051], strides = [1, 1]} : vector<8x1156xf32> to vector<8x1051xf32>
    %35 = vector.extract_strided_slice %29 {offsets = [0, 36], sizes = [8, 1051], strides = [1, 1]} : vector<8x1156xf32> to vector<8x1051xf32>
    %36 = vector.extract_strided_slice %29 {offsets = [0, 68], sizes = [8, 1051], strides = [1, 1]} : vector<8x1156xf32> to vector<8x1051xf32>
    %37 = vector.extract_strided_slice %29 {offsets = [0, 69], sizes = [8, 1051], strides = [1, 1]} : vector<8x1156xf32> to vector<8x1051xf32>
    %38 = vector.extract_strided_slice %29 {offsets = [0, 70], sizes = [8, 1051], strides = [1, 1]} : vector<8x1156xf32> to vector<8x1051xf32>
    %39 = tpu.concatenate %30, %31, %32, %33, %34, %35, %36, %37, %38 in 0 : vector<8x1051xf32>, vector<8x1051xf32>, vector<8x1051xf32>, vector<8x1051xf32>, vector<8x1051xf32>, vector<8x1051xf32>, vector<8x1051xf32>, vector<8x1051xf32>, vector<8x1051xf32> -> vector<72x1051xf32>
    %cst_33 = arith.constant dense<0.000000e+00> : vector<8x1051xf32>
    %40 = tpu.matmul %0, %39, %cst_33 {dimension_numbers = #tpu.dot_dimension_numbers<[1], [0], [0], [1], [0, 0, 1, 1], [], []>} : vector<8x72xf32>, vector<72x1051xf32>, vector<8x1051xf32> -> vector<8x1051xf32>
    %41 = vector.broadcast %1 : vector<8x1xf32> to vector<8x1051xf32>
    %42 = arith.addf %40, %41 : vector<8x1051xf32>
    %43 = arith.negf %42 : vector<8x1051xf32>
    %44 = math.exp %43 : vector<8x1051xf32>
    %cst_34 = arith.constant 1.000000e+00 : f32
    %45 = vector.broadcast %cst_34 : f32 to vector<8x1051xf32>
    %46 = arith.addf %45, %44 : vector<8x1051xf32>
    %47 = arith.divf %45, %46 : vector<8x1051xf32>
    %48 = arith.mulf %42, %47 : vector<8x1051xf32>
    %cst_35 = arith.constant dense<0.000000e+00> : vector<8x324xf32>
    %49 = tpu.matmul %48, %8, %cst_35 {dimension_numbers = #tpu.dot_dimension_numbers<[1], [0], [0], [1], [0, 0, 1, 1], [], []>} : vector<8x1051xf32>, vector<1051x324xf32>, vector<8x324xf32> -> vector<8x324xf32>
    %50 = vector.extract_strided_slice %49 {offsets = [0, 0], sizes = [8, 267], strides = [1, 1]} : vector<8x324xf32> to vector<8x267xf32>
    %51 = vector.extract_strided_slice %49 {offsets = [0, 1], sizes = [8, 267], strides = [1, 1]} : vector<8x324xf32> to vector<8x267xf32>
    %52 = vector.extract_strided_slice %49 {offsets = [0, 2], sizes = [8, 267], strides = [1, 1]} : vector<8x324xf32> to vector<8x267xf32>
    %53 = vector.extract_strided_slice %49 {offsets = [0, 18], sizes = [8, 267], strides = [1, 1]} : vector<8x324xf32> to vector<8x267xf32>
    %54 = vector.extract_strided_slice %49 {offsets = [0, 19], sizes = [8, 267], strides = [1, 1]} : vector<8x324xf32> to vector<8x267xf32>
    %55 = vector.extract_strided_slice %49 {offsets = [0, 20], sizes = [8, 267], strides = [1, 1]} : vector<8x324xf32> to vector<8x267xf32>
    %56 = vector.extract_strided_slice %49 {offsets = [0, 36], sizes = [8, 267], strides = [1, 1]} : vector<8x324xf32> to vector<8x267xf32>
    %57 = vector.extract_strided_slice %49 {offsets = [0, 37], sizes = [8, 267], strides = [1, 1]} : vector<8x324xf32> to vector<8x267xf32>
    %58 = vector.extract_strided_slice %49 {offsets = [0, 38], sizes = [8, 267], strides = [1, 1]} : vector<8x324xf32> to vector<8x267xf32>
    %59 = tpu.concatenate %50, %51, %52, %53, %54, %55, %56, %57, %58 in 0 : vector<8x267xf32>, vector<8x267xf32>, vector<8x267xf32>, vector<8x267xf32>, vector<8x267xf32>, vector<8x267xf32>, vector<8x267xf32>, vector<8x267xf32>, vector<8x267xf32> -> vector<72x267xf32>
    %cst_36 = arith.constant dense<0.000000e+00> : vector<16x267xf32>
    %60 = tpu.matmul %2, %59, %cst_36 {dimension_numbers = #tpu.dot_dimension_numbers<[1], [0], [0], [1], [0, 0, 1, 1], [], []>} : vector<16x72xf32>, vector<72x267xf32>, vector<16x267xf32> -> vector<16x267xf32>
    %61 = vector.broadcast %3 : vector<16x1xf32> to vector<16x267xf32>
    %62 = arith.addf %60, %61 : vector<16x267xf32>
    %63 = arith.negf %62 : vector<16x267xf32>
    %64 = math.exp %63 : vector<16x267xf32>
    %cst_37 = arith.constant 1.000000e+00 : f32
    %65 = vector.broadcast %cst_37 : f32 to vector<16x267xf32>
    %66 = arith.addf %65, %64 : vector<16x267xf32>
    %67 = arith.divf %65, %66 : vector<16x267xf32>
    %68 = arith.mulf %62, %67 : vector<16x267xf32>
    %cst_38 = arith.constant dense<0.000000e+00> : vector<16x100xf32>
    %69 = tpu.matmul %68, %9, %cst_38 {dimension_numbers = #tpu.dot_dimension_numbers<[1], [0], [0], [1], [0, 0, 1, 1], [], []>} : vector<16x267xf32>, vector<267x100xf32>, vector<16x100xf32> -> vector<16x100xf32>
    %70 = vector.extract_strided_slice %69 {offsets = [0, 0], sizes = [16, 78], strides = [1, 1]} : vector<16x100xf32> to vector<16x78xf32>
    %71 = vector.extract_strided_slice %69 {offsets = [0, 1], sizes = [16, 78], strides = [1, 1]} : vector<16x100xf32> to vector<16x78xf32>
    %72 = vector.extract_strided_slice %69 {offsets = [0, 2], sizes = [16, 78], strides = [1, 1]} : vector<16x100xf32> to vector<16x78xf32>
    %73 = vector.extract_strided_slice %69 {offsets = [0, 10], sizes = [16, 78], strides = [1, 1]} : vector<16x100xf32> to vector<16x78xf32>
    %74 = vector.extract_strided_slice %69 {offsets = [0, 11], sizes = [16, 78], strides = [1, 1]} : vector<16x100xf32> to vector<16x78xf32>
    %75 = vector.extract_strided_slice %69 {offsets = [0, 12], sizes = [16, 78], strides = [1, 1]} : vector<16x100xf32> to vector<16x78xf32>
    %76 = vector.extract_strided_slice %69 {offsets = [0, 20], sizes = [16, 78], strides = [1, 1]} : vector<16x100xf32> to vector<16x78xf32>
    %77 = vector.extract_strided_slice %69 {offsets = [0, 21], sizes = [16, 78], strides = [1, 1]} : vector<16x100xf32> to vector<16x78xf32>
    %78 = vector.extract_strided_slice %69 {offsets = [0, 22], sizes = [16, 78], strides = [1, 1]} : vector<16x100xf32> to vector<16x78xf32>
    %79 = tpu.concatenate %70, %71, %72, %73, %74, %75, %76, %77, %78 in 0 : vector<16x78xf32>, vector<16x78xf32>, vector<16x78xf32>, vector<16x78xf32>, vector<16x78xf32>, vector<16x78xf32>, vector<16x78xf32>, vector<16x78xf32>, vector<16x78xf32> -> vector<144x78xf32>
    %cst_39 = arith.constant dense<0.000000e+00> : vector<16x78xf32>
    %80 = tpu.matmul %4, %79, %cst_39 {dimension_numbers = #tpu.dot_dimension_numbers<[1], [0], [0], [1], [0, 0, 1, 1], [], []>} : vector<16x144xf32>, vector<144x78xf32>, vector<16x78xf32> -> vector<16x78xf32>
    %81 = vector.broadcast %5 : vector<16x1xf32> to vector<16x78xf32>
    %82 = arith.addf %80, %81 : vector<16x78xf32>
    %83 = arith.negf %82 : vector<16x78xf32>
    %84 = math.exp %83 : vector<16x78xf32>
    %cst_40 = arith.constant 1.000000e+00 : f32
    %85 = vector.broadcast %cst_40 : f32 to vector<16x78xf32>
    %86 = arith.addf %85, %84 : vector<16x78xf32>
    %87 = arith.divf %85, %86 : vector<16x78xf32>
    %88 = arith.mulf %82, %87 : vector<16x78xf32>
    %cst_41 = arith.constant dense<0.000000e+00> : vector<16x64xf32>
    %89 = tpu.matmul %88, %10, %cst_41 {dimension_numbers = #tpu.dot_dimension_numbers<[1], [0], [0], [1], [0, 0, 1, 1], [], []>} : vector<16x78xf32>, vector<78x64xf32>, vector<16x64xf32> -> vector<16x64xf32>
    %cst_42 = arith.constant dense<0.000000e+00> : vector<27x64xf32>
    %90 = tpu.matmul %6, %89, %cst_42 {dimension_numbers = #tpu.dot_dimension_numbers<[1], [0], [0], [1], [0, 0, 1, 1], [], []>} : vector<27x16xf32>, vector<16x64xf32>, vector<27x64xf32> -> vector<27x64xf32>
    %91 = vector.broadcast %7 : vector<27x1xf32> to vector<27x64xf32>
    %92 = arith.addf %90, %91 : vector<27x64xf32>
    %93 = arith.negf %92 : vector<27x64xf32>
    %94 = math.exp %93 : vector<27x64xf32>
    %cst_43 = arith.constant 1.000000e+00 : f32
    %95 = vector.broadcast %cst_43 : f32 to vector<27x64xf32>
    %96 = arith.addf %95, %94 : vector<27x64xf32>
    %97 = arith.divf %95, %96 : vector<27x64xf32>
    %cst_44 = arith.constant 2.000000e+00 : f32
    %98 = vector.broadcast %cst_44 : f32 to vector<27x64xf32>
    %99 = arith.mulf %97, %98 : vector<27x64xf32>
    %cst_45 = arith.constant 5.000000e-01 : f32
    %100 = vector.broadcast %cst_45 : f32 to vector<27x64xf32>
    %101 = arith.subf %99, %100 : vector<27x64xf32>
    %102 = arith.addf %101, %23 : vector<27x64xf32>
    %cst_46 = arith.constant 4.000000e+00 : f32
    %103 = vector.broadcast %cst_46 : f32 to vector<27x64xf32>
    %104 = arith.mulf %102, %103 : vector<27x64xf32>
    %cst_47 = arith.constant 2.000000e+00 : f32
    %105 = vector.broadcast %cst_47 : f32 to vector<27x64xf32>
    %106 = arith.mulf %97, %105 : vector<27x64xf32>
    %cst_48 = arith.constant 2.000000e+00 : f32
    %107 = vector.broadcast %cst_48 : f32 to vector<27x64xf32>
    %108 = arith.mulf %97, %107 : vector<27x64xf32>
    %109 = arith.mulf %106, %108 : vector<27x64xf32>
    %110 = vector.broadcast %14 : vector<27x1xf32> to vector<27x64xf32>
    %111 = arith.mulf %109, %110 : vector<27x64xf32>
    %112 = vector.broadcast %24 : vector<27x1xf32> to vector<27x64xf32>
    %113 = arith.mulf %112, %104 : vector<27x64xf32>
    %114 = vector.broadcast %13 : vector<27x1xf32> to vector<27x64xf32>
    %115 = arith.mulf %114, %111 : vector<27x64xf32>
    %116 = arith.addf %113, %115 : vector<27x64xf32>
    %117 = vector.broadcast %27 : vector<27x1xf32> to vector<27x64xf32>
    %118 = arith.mulf %117, %97 : vector<27x64xf32>
    %119 = arith.addf %116, %118 : vector<27x64xf32>
    %c0_49 = arith.constant 0 : index
    %c0_50 = arith.constant 0 : index
    %c0_51 = arith.constant 0 : index
    %120 = vector.load %arg14[%c0_49, %c0_50, %c0_51] : memref<2x27x64xf32, #tpu.memory_space<vmem>>, vector<1x27x64xf32>
    %121 = vector.shape_cast %120 : vector<1x27x64xf32> to vector<27x64xf32>
    %122 = vector.shape_cast %119 : vector<27x64xf32> to vector<1x27x64xf32>
    tpu.vector_store %arg14[%c0_49, %c0_50, %c0_51], %122 {strides = array<i32>} : memref<2x27x64xf32, #tpu.memory_space<vmem>>, vector<1x27x64xf32>,
    %c1_52 = arith.constant 1 : index
    %c0_53 = arith.constant 0 : index
    %c0_54 = arith.constant 0 : index
    %123 = vector.load %arg0[%c1_52, %c0_53, %c0_54] : memref<2x8x1156xf32, #tpu.memory_space<vmem>>, vector<1x8x1156xf32>
    %124 = vector.shape_cast %123 : vector<1x8x1156xf32> to vector<8x1156xf32>
    %125 = vector.extract_strided_slice %124 {offsets = [0, 0], sizes = [8, 1051], strides = [1, 1]} : vector<8x1156xf32> to vector<8x1051xf32>
    %126 = vector.extract_strided_slice %124 {offsets = [0, 1], sizes = [8, 1051], strides = [1, 1]} : vector<8x1156xf32> to vector<8x1051xf32>
    %127 = vector.extract_strided_slice %124 {offsets = [0, 2], sizes = [8, 1051], strides = [1, 1]} : vector<8x1156xf32> to vector<8x1051xf32>
    %128 = vector.extract_strided_slice %124 {offsets = [0, 34], sizes = [8, 1051], strides = [1, 1]} : vector<8x1156xf32> to vector<8x1051xf32>
    %129 = vector.extract_strided_slice %124 {offsets = [0, 35], sizes = [8, 1051], strides = [1, 1]} : vector<8x1156xf32> to vector<8x1051xf32>
    %130 = vector.extract_strided_slice %124 {offsets = [0, 36], sizes = [8, 1051], strides = [1, 1]} : vector<8x1156xf32> to vector<8x1051xf32>
    %131 = vector.extract_strided_slice %124 {offsets = [0, 68], sizes = [8, 1051], strides = [1, 1]} : vector<8x1156xf32> to vector<8x1051xf32>
    %132 = vector.extract_strided_slice %124 {offsets = [0, 69], sizes = [8, 1051], strides = [1, 1]} : vector<8x1156xf32> to vector<8x1051xf32>
    %133 = vector.extract_strided_slice %124 {offsets = [0, 70], sizes = [8, 1051], strides = [1, 1]} : vector<8x1156xf32> to vector<8x1051xf32>
    %134 = tpu.concatenate %125, %126, %127, %128, %129, %130, %131, %132, %133 in 0 : vector<8x1051xf32>, vector<8x1051xf32>, vector<8x1051xf32>, vector<8x1051xf32>, vector<8x1051xf32>, vector<8x1051xf32>, vector<8x1051xf32>, vector<8x1051xf32>, vector<8x1051xf32> -> vector<72x1051xf32>
    %cst_55 = arith.constant dense<0.000000e+00> : vector<8x1051xf32>
    %135 = tpu.matmul %0, %134, %cst_55 {dimension_numbers = #tpu.dot_dimension_numbers<[1], [0], [0], [1], [0, 0, 1, 1], [], []>} : vector<8x72xf32>, vector<72x1051xf32>, vector<8x1051xf32> -> vector<8x1051xf32>
    %136 = vector.broadcast %1 : vector<8x1xf32> to vector<8x1051xf32>
    %137 = arith.addf %135, %136 : vector<8x1051xf32>
    %138 = arith.negf %137 : vector<8x1051xf32>
    %139 = math.exp %138 : vector<8x1051xf32>
    %cst_56 = arith.constant 1.000000e+00 : f32
    %140 = vector.broadcast %cst_56 : f32 to vector<8x1051xf32>
    %141 = arith.addf %140, %139 : vector<8x1051xf32>
    %142 = arith.divf %140, %141 : vector<8x1051xf32>
    %143 = arith.mulf %137, %142 : vector<8x1051xf32>
    %cst_57 = arith.constant dense<0.000000e+00> : vector<8x324xf32>
    %144 = tpu.matmul %143, %8, %cst_57 {dimension_numbers = #tpu.dot_dimension_numbers<[1], [0], [0], [1], [0, 0, 1, 1], [], []>} : vector<8x1051xf32>, vector<1051x324xf32>, vector<8x324xf32> -> vector<8x324xf32>
    %145 = vector.extract_strided_slice %144 {offsets = [0, 0], sizes = [8, 267], strides = [1, 1]} : vector<8x324xf32> to vector<8x267xf32>
    %146 = vector.extract_strided_slice %144 {offsets = [0, 1], sizes = [8, 267], strides = [1, 1]} : vector<8x324xf32> to vector<8x267xf32>
    %147 = vector.extract_strided_slice %144 {offsets = [0, 2], sizes = [8, 267], strides = [1, 1]} : vector<8x324xf32> to vector<8x267xf32>
    %148 = vector.extract_strided_slice %144 {offsets = [0, 18], sizes = [8, 267], strides = [1, 1]} : vector<8x324xf32> to vector<8x267xf32>
    %149 = vector.extract_strided_slice %144 {offsets = [0, 19], sizes = [8, 267], strides = [1, 1]} : vector<8x324xf32> to vector<8x267xf32>
    %150 = vector.extract_strided_slice %144 {offsets = [0, 20], sizes = [8, 267], strides = [1, 1]} : vector<8x324xf32> to vector<8x267xf32>
    %151 = vector.extract_strided_slice %144 {offsets = [0, 36], sizes = [8, 267], strides = [1, 1]} : vector<8x324xf32> to vector<8x267xf32>
    %152 = vector.extract_strided_slice %144 {offsets = [0, 37], sizes = [8, 267], strides = [1, 1]} : vector<8x324xf32> to vector<8x267xf32>
    %153 = vector.extract_strided_slice %144 {offsets = [0, 38], sizes = [8, 267], strides = [1, 1]} : vector<8x324xf32> to vector<8x267xf32>
    %154 = tpu.concatenate %145, %146, %147, %148, %149, %150, %151, %152, %153 in 0 : vector<8x267xf32>, vector<8x267xf32>, vector<8x267xf32>, vector<8x267xf32>, vector<8x267xf32>, vector<8x267xf32>, vector<8x267xf32>, vector<8x267xf32>, vector<8x267xf32> -> vector<72x267xf32>
    %cst_58 = arith.constant dense<0.000000e+00> : vector<16x267xf32>
    %155 = tpu.matmul %2, %154, %cst_58 {dimension_numbers = #tpu.dot_dimension_numbers<[1], [0], [0], [1], [0, 0, 1, 1], [], []>} : vector<16x72xf32>, vector<72x267xf32>, vector<16x267xf32> -> vector<16x267xf32>
    %156 = vector.broadcast %3 : vector<16x1xf32> to vector<16x267xf32>
    %157 = arith.addf %155, %156 : vector<16x267xf32>
    %158 = arith.negf %157 : vector<16x267xf32>
    %159 = math.exp %158 : vector<16x267xf32>
    %cst_59 = arith.constant 1.000000e+00 : f32
    %160 = vector.broadcast %cst_59 : f32 to vector<16x267xf32>
    %161 = arith.addf %160, %159 : vector<16x267xf32>
    %162 = arith.divf %160, %161 : vector<16x267xf32>
    %163 = arith.mulf %157, %162 : vector<16x267xf32>
    %cst_60 = arith.constant dense<0.000000e+00> : vector<16x100xf32>
    %164 = tpu.matmul %163, %9, %cst_60 {dimension_numbers = #tpu.dot_dimension_numbers<[1], [0], [0], [1], [0, 0, 1, 1], [], []>} : vector<16x267xf32>, vector<267x100xf32>, vector<16x100xf32> -> vector<16x100xf32>
    %165 = vector.extract_strided_slice %164 {offsets = [0, 0], sizes = [16, 78], strides = [1, 1]} : vector<16x100xf32> to vector<16x78xf32>
    %166 = vector.extract_strided_slice %164 {offsets = [0, 1], sizes = [16, 78], strides = [1, 1]} : vector<16x100xf32> to vector<16x78xf32>
    %167 = vector.extract_strided_slice %164 {offsets = [0, 2], sizes = [16, 78], strides = [1, 1]} : vector<16x100xf32> to vector<16x78xf32>
    %168 = vector.extract_strided_slice %164 {offsets = [0, 10], sizes = [16, 78], strides = [1, 1]} : vector<16x100xf32> to vector<16x78xf32>
    %169 = vector.extract_strided_slice %164 {offsets = [0, 11], sizes = [16, 78], strides = [1, 1]} : vector<16x100xf32> to vector<16x78xf32>
    %170 = vector.extract_strided_slice %164 {offsets = [0, 12], sizes = [16, 78], strides = [1, 1]} : vector<16x100xf32> to vector<16x78xf32>
    %171 = vector.extract_strided_slice %164 {offsets = [0, 20], sizes = [16, 78], strides = [1, 1]} : vector<16x100xf32> to vector<16x78xf32>
    %172 = vector.extract_strided_slice %164 {offsets = [0, 21], sizes = [16, 78], strides = [1, 1]} : vector<16x100xf32> to vector<16x78xf32>
    %173 = vector.extract_strided_slice %164 {offsets = [0, 22], sizes = [16, 78], strides = [1, 1]} : vector<16x100xf32> to vector<16x78xf32>
    %174 = tpu.concatenate %165, %166, %167, %168, %169, %170, %171, %172, %173 in 0 : vector<16x78xf32>, vector<16x78xf32>, vector<16x78xf32>, vector<16x78xf32>, vector<16x78xf32>, vector<16x78xf32>, vector<16x78xf32>, vector<16x78xf32>, vector<16x78xf32> -> vector<144x78xf32>
    %cst_61 = arith.constant dense<0.000000e+00> : vector<16x78xf32>
    %175 = tpu.matmul %4, %174, %cst_61 {dimension_numbers = #tpu.dot_dimension_numbers<[1], [0], [0], [1], [0, 0, 1, 1], [], []>} : vector<16x144xf32>, vector<144x78xf32>, vector<16x78xf32> -> vector<16x78xf32>
    %176 = vector.broadcast %5 : vector<16x1xf32> to vector<16x78xf32>
    %177 = arith.addf %175, %176 : vector<16x78xf32>
    %178 = arith.negf %177 : vector<16x78xf32>
    %179 = math.exp %178 : vector<16x78xf32>
    %cst_62 = arith.constant 1.000000e+00 : f32
    %180 = vector.broadcast %cst_62 : f32 to vector<16x78xf32>
    %181 = arith.addf %180, %179 : vector<16x78xf32>
    %182 = arith.divf %180, %181 : vector<16x78xf32>
    %183 = arith.mulf %177, %182 : vector<16x78xf32>
    %cst_63 = arith.constant dense<0.000000e+00> : vector<16x64xf32>
    %184 = tpu.matmul %183, %10, %cst_63 {dimension_numbers = #tpu.dot_dimension_numbers<[1], [0], [0], [1], [0, 0, 1, 1], [], []>} : vector<16x78xf32>, vector<78x64xf32>, vector<16x64xf32> -> vector<16x64xf32>
    %cst_64 = arith.constant dense<0.000000e+00> : vector<27x64xf32>
    %185 = tpu.matmul %6, %184, %cst_64 {dimension_numbers = #tpu.dot_dimension_numbers<[1], [0], [0], [1], [0, 0, 1, 1], [], []>} : vector<27x16xf32>, vector<16x64xf32>, vector<27x64xf32> -> vector<27x64xf32>
    %186 = vector.broadcast %7 : vector<27x1xf32> to vector<27x64xf32>
    %187 = arith.addf %185, %186 : vector<27x64xf32>
    %188 = arith.negf %187 : vector<27x64xf32>
    %189 = math.exp %188 : vector<27x64xf32>
    %cst_65 = arith.constant 1.000000e+00 : f32
    %190 = vector.broadcast %cst_65 : f32 to vector<27x64xf32>
    %191 = arith.addf %190, %189 : vector<27x64xf32>
    %192 = arith.divf %190, %191 : vector<27x64xf32>
    %cst_66 = arith.constant 2.000000e+00 : f32
    %193 = vector.broadcast %cst_66 : f32 to vector<27x64xf32>
    %194 = arith.mulf %192, %193 : vector<27x64xf32>
    %cst_67 = arith.constant 5.000000e-01 : f32
    %195 = vector.broadcast %cst_67 : f32 to vector<27x64xf32>
    %196 = arith.subf %194, %195 : vector<27x64xf32>
    %197 = arith.addf %196, %23 : vector<27x64xf32>
    %cst_68 = arith.constant 4.000000e+00 : f32
    %198 = vector.broadcast %cst_68 : f32 to vector<27x64xf32>
    %199 = arith.mulf %197, %198 : vector<27x64xf32>
    %cst_69 = arith.constant 2.000000e+00 : f32
    %200 = vector.broadcast %cst_69 : f32 to vector<27x64xf32>
    %201 = arith.mulf %192, %200 : vector<27x64xf32>
    %cst_70 = arith.constant 2.000000e+00 : f32
    %202 = vector.broadcast %cst_70 : f32 to vector<27x64xf32>
    %203 = arith.mulf %192, %202 : vector<27x64xf32>
    %204 = arith.mulf %201, %203 : vector<27x64xf32>
    %205 = vector.broadcast %14 : vector<27x1xf32> to vector<27x64xf32>
    %206 = arith.mulf %204, %205 : vector<27x64xf32>
    %207 = vector.broadcast %24 : vector<27x1xf32> to vector<27x64xf32>
    %208 = arith.mulf %207, %199 : vector<27x64xf32>
    %209 = vector.broadcast %13 : vector<27x1xf32> to vector<27x64xf32>
    %210 = arith.mulf %209, %206 : vector<27x64xf32>
    %211 = arith.addf %208, %210 : vector<27x64xf32>
    %212 = vector.broadcast %27 : vector<27x1xf32> to vector<27x64xf32>
    %213 = arith.mulf %212, %192 : vector<27x64xf32>
    %214 = arith.addf %211, %213 : vector<27x64xf32>
    %c1_71 = arith.constant 1 : index
    %c0_72 = arith.constant 0 : index
    %c0_73 = arith.constant 0 : index
    %215 = vector.load %arg14[%c1_71, %c0_72, %c0_73] : memref<2x27x64xf32, #tpu.memory_space<vmem>>, vector<1x27x64xf32>
    %216 = vector.shape_cast %215 : vector<1x27x64xf32> to vector<27x64xf32>
    %217 = vector.shape_cast %214 : vector<27x64xf32> to vector<1x27x64xf32>
    tpu.vector_store %arg14[%c1_71, %c0_72, %c0_73], %217 {strides = array<i32>} : memref<2x27x64xf32, #tpu.memory_space<vmem>>, vector<1x27x64xf32>,
    return
  }
}

</mosaic_0001>

<bundles_post_ra>
// kernel: tpu_custom_call.1
= control target key start
LH: loop header
LB: loop body
LE: loop exit
PB: predicated region body
PF: predicated region fallthrough
CT: control target
= control target key end

     0   :  { %s7890_s17 = smov 126   ;;  %s7891_s18 = smov 127   ;;  %v11804_v4 = vmov 0.0   ;;  %v11802_v14 = vmov 0   ;;  %vm641_vm0 = vcmask 1039360   ;;  %vm713_vm1 = vcmask 769024   ;;  %s11781_s0 = inlined_call_operand.vmem [shape: f32[2,8,1156], index: 0, kind: input, shape index: {}]   ;;  %s11782_s2 = inlined_call_operand.vmem [shape: f32[8,1], index: 2, kind: input, shape index: {}]   ;;  %s11783_s1 = inlined_call_operand.vmem [shape: f32[8,72], index: 1, kind: input, shape index: {}]   ;;  %s11784_s9 = inlined_call_operand.vmem [shape: f32[1051,324], index: 9, kind: input, shape index: {}]   ;;  %s11785_s4 = inlined_call_operand.vmem [shape: f32[16,1], index: 4, kind: input, shape index: {}]   ;;  %s11786_s3 = inlined_call_operand.vmem [shape: f32[16,72], index: 3, kind: input, shape index: {}]   ;;  %s11787_s10 = inlined_call_operand.vmem [shape: f32[267,100], index: 10, kind: input, shape index: {}]   ;;  %s11788_s6 = inlined_call_operand.vmem [shape: f32[16,1], index: 6, kind: input, shape index: {}]   ;;  %s11789_s5 = inlined_call_operand.vmem [shape: f32[16,144], index: 5, kind: input, shape index: {}]   ;;  %s11790_s11 = inlined_call_operand.vmem [shape: f32[78,64], index: 11, kind: input, shape index: {}]   ;;  %s11791_s7 = inlined_call_operand.vmem [shape: f32[27,16], index: 7, kind: input, shape index: {}]   ;;  %s11792_s12 = inlined_call_operand.vmem [shape: f32[27,4], index: 12, kind: input, shape index: {}]   ;;  %s11793_s8 = inlined_call_operand.vmem [shape: f32[27,1], index: 8, kind: input, shape index: {}]   ;;  %s11794_s13 = inlined_call_operand.vmem [shape: f32[2,64], index: 13, kind: input, shape index: {}]   ;;  %s11795_s14 = inlined_call_operand.vmem [shape: f32[2,27,64], index: 14, kind: output, shape index: {}]  }
   0x1   :  { %v7994_v0 = vld [vmem:[%s11781_s0 + $0x8] sm:$0xff]  ;;  %v7999_v1 = vld [vmem:[%s11781_s0 + $0x10] sm:$0xff]  ;;  %v8008_v3 = vld [vmem:[%s11781_s0] sm:$0xff]  ;;  %s7892_s21 = smov 94   ;;  %s7893_s22 = smov 92   ;;  %984 = vmatprep.mubr.f32.mxu0 %v11804_v4  ;;  %1055 = vmatprep.mubr.f32.mxu1 %v11804_v4  ;;  %vm677_vm2 = vcmask 1031168  }
   0x2   :  { %v7276_v2 = vpack.i.bf16 %v7999_v1, %v7994_v0  ;;  %s7894_s23 = smov 93   ;;  %s11800_s24 = smov 59   ;;  %v8034_v5 = vld [vmem:[%s11781_s0 + $0x18] sm:$0xff]  ;;  %v8039_v6 = vld [vmem:[%s11781_s0 + $0x20] sm:$0xff]  ;;  %v8059_v8 = vld [vmem:[%s11781_s0 + $0x28] sm:$0xff]  ;;  %7411 = vset.pattern.permute.xlu0 %v11802_v14  ;;  %7447 = vset.pattern.permute.xlu1 %v11802_v14  ;;  %vm785_vm3 = vcmask 752640  }
   0x3   :  { %s11798_s25 = smov 60   ;;  %s11796_s30 = smov 58   ;;  %v7306_v7 = vpack.i.bf16 %v8039_v6, %v8034_v5  ;;  %v8064_v9 = vld [vmem:[%s11781_s0 + $0x30] sm:$0xff]  ;;  %v8081_v11 = vld [vmem:[%s11781_s0 + $0x38] sm:$0xff]  ;;  %v8086_v12 = vld [vmem:[%s11781_s0 + $0x40] sm:$0xff]  ;;  %vm749_vm4 = vcmask 760832  }
   0x4   :  { %7277 = vrot.lane.b32.xlu1 %v7276_v2, %s7890_s17  ;;  %7272 = vrot.lane.b32.xlu0 %v7276_v2, %s7891_s18  ;;  %v7346_v10 = vpack.i.bf16 %v8064_v9, %v8059_v8  ;;  %v7376_v13 = vpack.i.bf16 %v8086_v12, %v8081_v11  ;;  %v48_v15 = vld [vmem:[%s11782_s2] sm:$0xff]  ;;  %vm857_vm5 = vcmask 482304   ;;  %vm821_vm6 = vcmask 490496   ;;  %s7904_s16 = smov 110   ;;  %s7905_s2 = smov 108  }
   0x5   :  { %vm893_vm7 = vcmask 474112   ;;  %vm916_vm8 = vcmask 588800   ;;  %vm7901_vm9 = vmmov 0   ;;  %vm1341_vm10 = vcmask 1042432   ;;  %s7906_s19 = smov 90   ;;  %s7907_s20 = smov 91  }
   0x6   :  { %vm7902_vm11 = vmmov 1   ;;  %vm1337_vm13 = vcmask 220160   ;;  %vm11976_vm14 = vcmask 900096   ;;  %vm11977_vm15 = vcmask 891904   ;;  %s11995_s27 = smov 116   ;;  %s11994_s28 = smov 106  }
   0x7   :  { %vm9789_vm12 = vmpackc.low %vm1341_vm10, %vm7902_vm11  ;;  %vm12026_vm10 = vcmask 883712   ;;  %s7912_s29 = smov 107  }
   0x8   :  { %7282 = vrot.lane.b32.xlu1 %v7276_v2, %s7892_s21  ;;  %623 = vrot.lane.b32.xlu0 %v8008_v3, %s7891_s18 }
   0xc   :  { %695 = vrot.lane.b32.xlu1 %v8008_v3, %s7892_s21  ;;  %659 = vrot.lane.b32.xlu0 %v8008_v3, %s7890_s17 }
  0x10   :  { %7292 = vrot.lane.b32.xlu1 %v7276_v2, %s7893_s22  ;;  %7287 = vrot.lane.b32.xlu0 %v7276_v2, %s7894_s23 }
  0x14   :  { %767 = vrot.lane.b32.xlu1 %v8008_v3, %s7893_s22  ;;  %731 = vrot.lane.b32.xlu0 %v8008_v3, %s7894_s23 }
  0x18   :  { %7302 = vrot.lane.b32.xlu1 %v7276_v2, %s11800_s24  ;;  %7297 = vrot.lane.b32.xlu0 %v7276_v2, %s11798_s25 }
  0x1c   :  { %839 = vrot.lane.b32.xlu1 %v8008_v3, %s11800_s24  ;;  %803 = vrot.lane.b32.xlu0 %v8008_v3, %s11798_s25 }
  0x20   :  { %879 = vrot.lane.b32.xlu1 %v7999_v1, %s11796_s30  ;;  %877 = vrot.lane.b32.xlu0 %v7994_v0, %s11796_s30 }
  0x24   :  { %7307 = vrot.lane.b32.xlu1 %v7306_v7, %s7891_s18  ;;  %875 = vrot.lane.b32.xlu0 %v8008_v3, %s11796_s30 }
  0x28   :  { %7317 = vrot.lane.b32.xlu1 %v7306_v7, %s7892_s21  ;;  %7312 = vrot.lane.b32.xlu0 %v7306_v7, %s7890_s17 }
  0x2c   :  { %7327 = vrot.lane.b32.xlu1 %v7306_v7, %s7893_s22  ;;  %7322 = vrot.lane.b32.xlu0 %v7306_v7, %s7894_s23 }
  0x30   :  { %7337 = vrot.lane.b32.xlu1 %v7306_v7, %s11800_s24  ;;  %7332 = vrot.lane.b32.xlu0 %v7306_v7, %s11798_s25 }
  0x34   :  { %883 = vrot.lane.b32.xlu1 %v8039_v6, %s11796_s30  ;;  %881 = vrot.lane.b32.xlu0 %v8034_v5, %s11796_s30 }
  0x38   :  { %7347 = vrot.lane.b32.xlu1 %v7346_v10, %s7890_s17  ;;  %7342 = vrot.lane.b32.xlu0 %v7346_v10, %s7891_s18 }
  0x3c   :  { %7357 = vrot.lane.b32.xlu1 %v7346_v10, %s7894_s23  ;;  %7352 = vrot.lane.b32.xlu0 %v7346_v10, %s7892_s21 }
  0x40   :  { %7367 = vrot.lane.b32.xlu1 %v7346_v10, %s11798_s25  ;;  %7362 = vrot.lane.b32.xlu0 %v7346_v10, %s7893_s22 }
  0x44   :  { %885 = vrot.lane.b32.xlu1 %v8059_v8, %s11796_s30  ;;  %7372 = vrot.lane.b32.xlu0 %v7346_v10, %s11800_s24 }
  0x48   :  { %7377 = vrot.lane.b32.xlu1 %v7376_v13, %s7891_s18  ;;  %887 = vrot.lane.b32.xlu0 %v8064_v9, %s11796_s30 }
  0x4c   :  { %7387 = vrot.lane.b32.xlu1 %v7376_v13, %s7892_s21  ;;  %7382 = vrot.lane.b32.xlu0 %v7376_v13, %s7890_s17 }
  0x50   :  { %7397 = vrot.lane.b32.xlu1 %v7376_v13, %s7893_s22  ;;  %7392 = vrot.lane.b32.xlu0 %v7376_v13, %s7894_s23 }
  0x54   :  { %7407 = vrot.lane.b32.xlu1 %v7376_v13, %s11800_s24  ;;  %7402 = vrot.lane.b32.xlu0 %v7376_v13, %s11798_s25  ;;  %s12303_s24 = smov 58   ;;  %s12623_s25 = smov 116  }
  0x58   :  { %891 = vrot.lane.b32.xlu1 %v8086_v12, %s11796_s30  ;;  %889 = vrot.lane.b32.xlu0 %v8081_v11, %s11796_s30 }
  0x5c   :  { %913 = vperm.xlu0 %7411, %v48_v15  }
  0x76   :  { %v8111_v16 = vpop.permute.xlu1 %7277  ;;  %v8113_v17 = vpop.permute.xlu0 %7272 }
  0x77   :  { %v7275_v18 = vunpack.i.h.bf16 %v8113_v17  ;;  %v7274_v19 = vunpack.i.l.bf16 %v8113_v17  ;;  %v7280_v20 = vunpack.i.h.bf16 %v8111_v16  ;;  %v7279_v21 = vunpack.i.l.bf16 %v8111_v16 }
  0x79   :  { %v643_v22 = vsel %vm641_vm0, %v7274_v19, %v7275_v18  ;;  %v679_v30 = vsel %vm677_vm2, %v7279_v21, %v7280_v20 }
  0x7a   :  { %v8122_v23 = vpop.permute.xlu1 %7282  ;;  %v624_v24 = vpop.permute.xlu0 %623  ;;  %v6029_v25 = vpack.c.bf16 %v643_v22, %v7994_v0 }
  0x7b   :  { %v7285_v26 = vunpack.i.h.bf16 %v8122_v23  ;;  %v7284_v27 = vunpack.i.l.bf16 %v8122_v23  ;;  %v642_v28 = vsel %vm641_vm0, %v624_v24, %v7274_v19  ;;  %v8178_v19 = vld [vmem:[%s11783_s1] sm:$0xff] }
  0x7c   :  { %6030 = vmatprep.subr.bf16.mxu0 %v6029_v25  ;;  %v6031_v29 = vpack.c.bf16 %v642_v28, %v8008_v3 }
  0x7d   :  { %v715_v31 = vsel %vm713_vm1, %v7284_v27, %v7285_v26 }
  0x7e   :  { %v696_v32 = vpop.permute.xlu1 %695  ;;  %6032 = vmatpush1.bf16.msra.mxu0 %v6031_v29  ;;  %v660_v33 = vpop.permute.xlu0 %659  ;;  %v6033_v34 = vpack.c.bf16 %v715_v31, %v679_v30 }
  0x7f   :  { %v714_v35 = vsel %vm713_vm1, %v696_v32, %v7284_v27  ;;  %v678_v36 = vsel %vm677_vm2, %v660_v33, %v7279_v21 }
  0x80   :  { %v6035_v37 = vpack.c.bf16 %v714_v35, %v678_v36  ;;  %6034 = vmatprep.subr.bf16.mxu0 %v6033_v34 }
  0x82   :  { %v8137_v38 = vpop.permute.xlu1 %7292  ;;  %6036 = vmatpush1.bf16.msra.mxu0 %v6035_v37  ;;  %v8139_v39 = vpop.permute.xlu0 %7287 }
  0x83   :  { %v7295_v40 = vunpack.i.h.bf16 %v8137_v38  ;;  %v7294_v41 = vunpack.i.l.bf16 %v8137_v38  ;;  %v7290_v42 = vunpack.i.h.bf16 %v8139_v39  ;;  %v7289_v43 = vunpack.i.l.bf16 %v8139_v39 }
  0x85   :  { %v751_v44 = vsel %vm749_vm4, %v7289_v43, %v7290_v42  ;;  %v787_v45 = vsel %vm785_vm3, %v7294_v41, %v7295_v40 }
  0x86   :  { %v768_v46 = vpop.permute.xlu1 %767  ;;  %v732_v47 = vpop.permute.xlu0 %731  ;;  %v6037_v48 = vpack.c.bf16 %v787_v45, %v751_v44 }
  0x87   :  { %v786_v49 = vsel %vm785_vm3, %v768_v46, %v7294_v41  ;;  %v750_v50 = vsel %vm749_vm4, %v732_v47, %v7289_v43 }
  0x88   :  { %v6039_v51 = vpack.c.bf16 %v786_v49, %v750_v50  ;;  %6038 = vmatprep.subr.bf16.mxu0 %v6037_v48 }
  0x8a   :  { %v8153_v52 = vpop.permute.xlu1 %7302  ;;  %v8155_v53 = vpop.permute.xlu0 %7297  ;;  %6040 = vmatpush1.bf16.msra.mxu0 %v6039_v51 }
  0x8b   :  { %v7305_v54 = vunpack.i.h.bf16 %v8153_v52  ;;  %v7304_v55 = vunpack.i.l.bf16 %v8153_v52  ;;  %v7300_v56 = vunpack.i.h.bf16 %v8155_v53  ;;  %v7299_v57 = vunpack.i.l.bf16 %v8155_v53 }
  0x8d   :  { %v823_v58 = vsel %vm821_vm6, %v7299_v57, %v7300_v56  ;;  %v859_v59 = vsel %vm857_vm5, %v7304_v55, %v7305_v54 }
  0x8e   :  { %v840_v60 = vpop.permute.xlu1 %839  ;;  %v804_v61 = vpop.permute.xlu0 %803  ;;  %v6041_v62 = vpack.c.bf16 %v859_v59, %v823_v58 }
  0x8f   :  { %v858_v63 = vsel %vm857_vm5, %v840_v60, %v7304_v55  ;;  %v822_v0 = vsel %vm821_vm6, %v804_v61, %v7299_v57 }
  0x90   :  { %v6043_v2 = vpack.c.bf16 %v858_v63, %v822_v0  ;;  %6042 = vmatprep.subr.bf16.mxu0 %v6041_v62 }
  0x92   :  { %v8169_v3 = vpop.permute.xlu1 %879  ;;  %v878_v7 = vpop.permute.xlu0 %877  ;;  %6044 = vmatpush1.bf16.msra.mxu0 %v6043_v2 }
  0x93   :  { %v895_v10 = vsel %vm893_vm7, %v878_v7, %v8169_v3 }
  0x94   :  { %936 = vmatprep.subr.mxu0 %v895_v10 }
  0x96   :  { %v8173_v13 = vpop.permute.xlu1 %7307  ;;  %v876_v15 = vpop.permute.xlu0 %875 }
  0x97   :  { %v7310_v21 = vunpack.i.h.bf16 %v8173_v13  ;;  %v7309_v22 = vunpack.i.l.bf16 %v8173_v13  ;;  %v894_v24 = vsel %vm893_vm7, %v876_v15, %v878_v7 }
  0x98   :  { %937 = vmatpush1.msra.mxu0 %v894_v24 }
  0x99   :  { %5276 = vmatmul.mubr.msk.f32.vlgmr.msra.gmra.mrb[0].mxu0 %vm916_vm8, %v8178_v19  ;;  %v645_v25 = vsel %vm641_vm0, %v7309_v22, %v7310_v21  ;;  %v644_v27 = vsel %vm641_vm0, %v7275_v18, %v7309_v22 }
  0x9a   :  { %v8191_v28 = vpop.permute.xlu1 %7317  ;;  %v7313_v29 = vpop.permute.xlu0 %7312  ;;  %v6045_v30 = vpack.c.bf16 %v645_v25, %v8034_v5  ;;  %v6047_v31 = vpack.c.bf16 %v644_v27, %v7999_v1  ;;  %1126 = vmatprep.mubr.f32.mxu0 %v11804_v4 }
  0x9b   :  { %v7320_v32 = vunpack.i.h.bf16 %v8191_v28  ;;  %v7319_v33 = vunpack.i.l.bf16 %v8191_v28  ;;  %v7315_v34 = vunpack.i.h.bf16 %v7313_v29  ;;  %v7314_v35 = vunpack.i.l.bf16 %v7313_v29 }
  0x9c   :  { %6046 = vmatprep.subr.bf16.mxu1 %v6045_v30 }
  0x9d   :  { %6048 = vmatpush1.bf16.msra.mxu1 %v6047_v31  ;;  %v681_v17 = vsel %vm677_vm2, %v7314_v35, %v7315_v34  ;;  %v717_v18 = vsel %vm713_vm1, %v7319_v33, %v7320_v32  ;;  %v680_v1 = vsel %vm677_vm2, %v7280_v20, %v7314_v35  ;;  %v716_v5 = vsel %vm713_vm1, %v7285_v26, %v7319_v33 }
  0x9e   :  { %v8208_v36 = vpop.permute.xlu1 %7327  ;;  %v8210_v37 = vpop.permute.xlu0 %7322  ;;  %v6049_v41 = vpack.c.bf16 %v717_v18, %v681_v17  ;;  %v6051_v43 = vpack.c.bf16 %v716_v5, %v680_v1 }
  0x9f   :  { %v7330_v44 = vunpack.i.h.bf16 %v8208_v36  ;;  %v7329_v45 = vunpack.i.l.bf16 %v8208_v36  ;;  %v7325_v46 = vunpack.i.h.bf16 %v8210_v37  ;;  %v7324_v16 = vunpack.i.l.bf16 %v8210_v37 }
  0xa0   :  { %6050 = vmatprep.subr.bf16.mxu1 %v6049_v41 }
  0xa1   :  { %6052 = vmatpush1.bf16.msra.mxu1 %v6051_v43  ;;  %v753_v20 = vsel %vm749_vm4, %v7324_v16, %v7325_v46  ;;  %v789_v23 = vsel %vm785_vm3, %v7329_v45, %v7330_v44  ;;  %v752_v26 = vsel %vm749_vm4, %v7290_v42, %v7324_v16  ;;  %v788_v47 = vsel %vm785_vm3, %v7295_v40, %v7329_v45 }
  0xa2   :  { %v8226_v48 = vpop.permute.xlu1 %7337  ;;  %v8228_v49 = vpop.permute.xlu0 %7332  ;;  %v6053_v50 = vpack.c.bf16 %v789_v23, %v753_v20  ;;  %v6055_v51 = vpack.c.bf16 %v788_v47, %v752_v26 }
  0xa3   :  { %v7340_v55 = vunpack.i.h.bf16 %v8226_v48  ;;  %v7339_v57 = vunpack.i.l.bf16 %v8226_v48  ;;  %v7335_v58 = vunpack.i.h.bf16 %v8228_v49  ;;  %v7334_v39 = vunpack.i.l.bf16 %v8228_v49 }
  0xa4   :  { %6054 = vmatprep.subr.bf16.mxu1 %v6053_v50 }
  0xa5   :  { %6056 = vmatpush1.bf16.msra.mxu1 %v6055_v51  ;;  %v825_v38 = vsel %vm821_vm6, %v7334_v39, %v7335_v58  ;;  %v861_v40 = vsel %vm857_vm5, %v7339_v57, %v7340_v55  ;;  %v824_v42 = vsel %vm821_vm6, %v7300_v56, %v7334_v39  ;;  %v860_v59 = vsel %vm857_vm5, %v7305_v54, %v7339_v57 }
  0xa6   :  { %v8244_v60 = vpop.permute.xlu1 %883  ;;  %v882_v61 = vpop.permute.xlu0 %881  ;;  %v6057_v62 = vpack.c.bf16 %v861_v40, %v825_v38  ;;  %v6059_v63 = vpack.c.bf16 %v860_v59, %v824_v42 }
  0xa7   :  { %v897_v0 = vsel %vm893_vm7, %v882_v61, %v8244_v60  ;;  %v896_v10 = vsel %vm893_vm7, %v8169_v3, %v882_v61 }
  0xa8   :  { %6058 = vmatprep.subr.bf16.mxu1 %v6057_v62 }
  0xa9   :  { %6060 = vmatpush1.bf16.msra.mxu1 %v6059_v63 }
  0xaa   :  { %v8248_v2 = vpop.permute.xlu1 %7347  ;;  %v7343_v7 = vpop.permute.xlu0 %7342  ;;  %1007 = vmatprep.subr.mxu1 %v897_v0 }
  0xab   :  { %v7350_v53 = vunpack.i.h.bf16 %v8248_v2  ;;  %v7349_v52 = vunpack.i.l.bf16 %v8248_v2  ;;  %v7345_v56 = vunpack.i.h.bf16 %v7343_v7  ;;  %v7344_v54 = vunpack.i.l.bf16 %v7343_v7 }
  0xad   :  { %v646_v15 = vsel %vm641_vm0, %v7310_v21, %v7344_v54  ;;  %1008 = vmatpush1.msra.mxu1 %v896_v10  ;;  %v647_v22 = vsel %vm641_vm0, %v7344_v54, %v7345_v56  ;;  %v682_v24 = vsel %vm677_vm2, %v7315_v34, %v7349_v52  ;;  %v683_v13 = vsel %vm677_vm2, %v7349_v52, %v7350_v53 }
  0xae   :  { %v8259_v25 = vpop.permute.xlu1 %7357  ;;  %v8261_v27 = vpop.permute.xlu0 %7352  ;;  %5277 = vmatmul.mubr.msk.f32.vlgmr.msra.gmra.mrb[0].mxu1 %vm916_vm8, %v8178_v19  ;;  %v6061_v29 = vpack.c.bf16 %v647_v22, %v8059_v8  ;;  %v6063_v3 = vpack.c.bf16 %v646_v15, %v8039_v6 }
  0xaf   :  { %v7360_v21 = vunpack.i.h.bf16 %v8259_v25  ;;  %v7359_v30 = vunpack.i.l.bf16 %v8259_v25  ;;  %v7355_v31 = vunpack.i.h.bf16 %v8261_v27  ;;  %v7354_v33 = vunpack.i.l.bf16 %v8261_v27  ;;  %1197 = vmatprep.mubr.f32.mxu1 %v11804_v4 }
  0xb0   :  { %6062 = vmatprep.subr.bf16.mxu0 %v6061_v29 }
  0xb1   :  { %v718_v8 = vsel %vm713_vm1, %v7320_v32, %v7354_v33  ;;  %6064 = vmatpush1.bf16.msra.mxu0 %v6063_v3  ;;  %v719_v6 = vsel %vm713_vm1, %v7354_v33, %v7355_v31  ;;  %v754_v34 = vsel %vm749_vm4, %v7325_v46, %v7359_v30  ;;  %v755_v5 = vsel %vm749_vm4, %v7359_v30, %v7360_v21 }
  0xb2   :  { %v8280_v35 = vpop.permute.xlu1 %7367  ;;  %v8282_v17 = vpop.permute.xlu0 %7362  ;;  %v6065_v18 = vpack.c.bf16 %v719_v6, %v683_v13  ;;  %v6067_v1 = vpack.c.bf16 %v718_v8, %v682_v24 }
  0xb3   :  { %v7370_v37 = vunpack.i.h.bf16 %v8280_v35  ;;  %v7369_v28 = vunpack.i.l.bf16 %v8280_v35  ;;  %v7365_v32 = vunpack.i.h.bf16 %v8282_v17  ;;  %v7364_v41 = vunpack.i.l.bf16 %v8282_v17  ;;  %v68_v35 = vld [vmem:[%s11784_s9 + $0x8] sm:$0xff] }
  0xb4   :  { %6066 = vmatprep.subr.bf16.mxu0 %v6065_v18 }
  0xb5   :  { %v790_v43 = vsel %vm785_vm3, %v7330_v44, %v7364_v41  ;;  %6068 = vmatpush1.bf16.msra.mxu0 %v6067_v1  ;;  %v791_v45 = vsel %vm785_vm3, %v7364_v41, %v7365_v32  ;;  %v826_v26 = vsel %vm821_vm6, %v7335_v58, %v7369_v28  ;;  %v827_v36 = vsel %vm821_vm6, %v7369_v28, %v7370_v37 }
  0xb6   :  { %v886_v46 = vpop.permute.xlu1 %885  ;;  %v8297_v16 = vpop.permute.xlu0 %7372  ;;  %v6069_v20 = vpack.c.bf16 %v791_v45, %v755_v5  ;;  %v6071_v23 = vpack.c.bf16 %v790_v43, %v754_v34 }
  0xb7   :  { %v7375_v47 = vunpack.i.h.bf16 %v8297_v16  ;;  %v7374_v49 = vunpack.i.l.bf16 %v8297_v16  ;;  %v898_v0 = vsel %vm893_vm7, %v8244_v60, %v886_v46 }
  0xb8   :  { %6070 = vmatprep.subr.bf16.mxu0 %v6069_v20 }
  0xb9   :  { %v862_v44 = vsel %vm857_vm5, %v7340_v55, %v7374_v49  ;;  %6072 = vmatpush1.bf16.msra.mxu0 %v6071_v23  ;;  %v863_v50 = vsel %vm857_vm5, %v7374_v49, %v7375_v47 }
  0xba   :  { %v7378_v51 = vpop.permute.xlu1 %7377  ;;  %v8311_v57 = vpop.permute.xlu0 %887  ;;  %v6073_v58 = vpack.c.bf16 %v863_v50, %v827_v36  ;;  %v6075_v39 = vpack.c.bf16 %v862_v44, %v826_v26  ;;  %v70_v44 = vld [vmem:[%s11784_s9 + $0x18] sm:$0xff] }
  0xbb   :  { %v7380_v38 = vunpack.i.h.bf16 %v7378_v51  ;;  %v7379_v40 = vunpack.i.l.bf16 %v7378_v51  ;;  %v899_v42 = vsel %vm893_vm7, %v886_v46, %v8311_v57  ;;  %v74_v51 = vld [vmem:[%s11784_s9 + $0x38] sm:$0xff] }
  0xbc   :  { %6074 = vmatprep.subr.bf16.mxu0 %v6073_v58  ;;  %v77_v58 = vld [vmem:[%s11784_s9 + $0x50] sm:$0xff] }
  0xbd   :  { %v648_v48 = vsel %vm641_vm0, %v7345_v56, %v7379_v40  ;;  %6076 = vmatpush1.bf16.msra.mxu0 %v6075_v39  ;;  %v649_v55 = vsel %vm641_vm0, %v7379_v40, %v7380_v38  ;;  %v6094_v59 = vpack.c.bf16 %v7380_v38, %v8086_v12  ;;  %v8378_v40 = vpack.c.bf16 %v77_v58, %v74_v51  ;;  %v78_v51 = vld [vmem:[%s11784_s9 + $0x58] sm:$0xff] }
  0xbe   :  { %v7388_v61 = vpop.permute.xlu1 %7387  ;;  %v7383_v62 = vpop.permute.xlu0 %7382  ;;  %1078 = vmatprep.subr.mxu0 %v899_v42  ;;  %v6077_v63 = vpack.c.bf16 %v649_v55, %v8081_v11  ;;  %v6079_v7 = vpack.c.bf16 %v648_v48, %v8064_v9  ;;  %v11806_v9 = vmov 0.0|0.0   ;;  %v76_v42 = vld [vmem:[%s11784_s9 + $0x48] sm:$0xff]  ;;  %v83_v55 = vld [vmem:[%s11784_s9 + $0x80] sm:$0xff] }
  0xbf   :  { %v7390_v52 = vunpack.i.h.bf16 %v7388_v61  ;;  %v7389_v54 = vunpack.i.l.bf16 %v7388_v61  ;;  %v7385_v10 = vunpack.i.h.bf16 %v7383_v62  ;;  %v7384_v15 = vunpack.i.l.bf16 %v7383_v62  ;;  %v80_v48 = vld [vmem:[%s11784_s9 + $0x68] sm:$0xff]  ;;  %v82_v62 = vld [vmem:[%s11784_s9 + $0x78] sm:$0xff] }
  0xc0   :  { %6078 = vmatprep.subr.bf16.mxu1 %v6077_v63  ;;  %v8401_v61 = vpack.c.bf16 %v83_v55, %v80_v48  ;;  %v86_v63 = vld [vmem:[%s11784_s9 + $0x98] sm:$0xff]  ;;  %v121_v48 = vld [vmem:[%s11784_s9 + $0x1b0] sm:$0xff]  ;;  %v124_v55 = vld [vmem:[%s11784_s9 + $0x1c8] sm:$0xff] }
  0xc1   :  { %v720_v56 = vsel %vm713_vm1, %v7355_v31, %v7389_v54  ;;  %v6097_v22 = vpack.c.bf16 %v7390_v52, %v7385_v10  ;;  %v684_v12 = vsel %vm677_vm2, %v7350_v53, %v7384_v15  ;;  %1079 = vmatpush1.msra.mxu0 %v898_v0  ;;  %6080 = vmatpush1.bf16.msra.mxu1 %v6079_v7  ;;  %v89_v0 = vld [vmem:[%s11784_s9 + $0xb0] sm:$0xff] }
  0xc2   :  { %v7398_v11 = vpop.permute.xlu1 %7397  ;;  %v7393_v24 = vpop.permute.xlu0 %7392  ;;  %5278 = vmatmul.mubr.msk.f32.vlgmr.msra.gmra.mrb[2].mxu0 %vm916_vm8, %v8178_v19  ;;  %6093 = vmatprep.subr.bf16.mxu0 %v11806_v9  ;;  %v685_v60 = vsel %vm677_vm2, %v7384_v15, %v7385_v10  ;;  %v721_v27 = vsel %vm713_vm1, %v7389_v54, %v7390_v52  ;;  %v6083_v29 = vpack.c.bf16 %v720_v56, %v684_v12  ;;  %v85_v54 = vld [vmem:[%s11784_s9 + $0x90] sm:$0xff]  ;;  %v88_v10 = vld [vmem:[%s11784_s9 + $0xa8] sm:$0xff]  ;;  %v95_v56 = vld [vmem:[%s11784_s9 + $0xe0] sm:$0xff] }
  0xc3   :  { %v7400_v3 = vunpack.i.h.bf16 %v7398_v11  ;;  %v7399_v13 = vunpack.i.l.bf16 %v7398_v11  ;;  %v7395_v2 = vunpack.i.h.bf16 %v7393_v24  ;;  %v7394_v30 = vunpack.i.l.bf16 %v7393_v24  ;;  %6095 = vmatpush3.bf16.msra.mxu0 %v6094_v59  ;;  %5861 = vmatprep.mubr.msk.f32.mxu0 %vm7901_vm9, %v11804_v4  ;;  %v92_v15 = vld [vmem:[%s11784_s9 + $0xc8] sm:$0xff]  ;;  %v91_v11 = vld [vmem:[%s11784_s9 + $0xc0] sm:$0xff]  ;;  %v94_v24 = vld [vmem:[%s11784_s9 + $0xd8] sm:$0xff] }
  0xc4   :  { %v6081_v53 = vpack.c.bf16 %v721_v27, %v685_v60  ;;  %6096 = vmatprep.subr.bf16.mxu0 %v11806_v9  ;;  %v8419_v52 = vpack.c.bf16 %v89_v0, %v86_v63  ;;  %v8437_v12 = vpack.c.bf16 %v95_v56, %v92_v15  ;;  %v98_v60 = vld [vmem:[%s11784_s9 + $0xf8] sm:$0xff]  ;;  %v101_v27 = vld [vmem:[%s11784_s9 + $0x110] sm:$0xff]  ;;  %v131_v63 = vld [vmem:[%s11784_s9 + $0x200] sm:$0xff]  ;;  %v8592_v56 = vpack.c.bf16 %v124_v55, %v121_v48 }
  0xc5   :  { %v792_v31 = vsel %vm785_vm3, %v7365_v32, %v7399_v13  ;;  %v756_v33 = vsel %vm749_vm4, %v7360_v21, %v7394_v30  ;;  %v757_v8 = vsel %vm749_vm4, %v7394_v30, %v7395_v2  ;;  %v6100_v6 = vpack.c.bf16 %v7400_v3, %v7395_v2  ;;  %v100_v2 = vld [vmem:[%s11784_s9 + $0x108] sm:$0xff]  ;;  %v147_v48 = vld [vmem:[%s11784_s9 + $0x280] sm:$0xff]  ;;  %v146_v55 = vld [vmem:[%s11784_s9 + $0x278] sm:$0xff] }
  0xc6   :  { %6082 = vmatprep.subr.bf16.mxu1 %v6081_v53  ;;  %v7408_v34 = vpop.permute.xlu1 %7407  ;;  %v7403_v18 = vpop.permute.xlu0 %7402  ;;  %v793_v1 = vsel %vm785_vm3, %v7399_v13, %v7400_v3  ;;  %v6087_v5 = vpack.c.bf16 %v792_v31, %v756_v33  ;;  %v8455_v3 = vpack.c.bf16 %v101_v27, %v98_v60  ;;  %v97_v13 = vld [vmem:[%s11784_s9 + $0xf0] sm:$0xff]  ;;  %v104_v30 = vld [vmem:[%s11784_s9 + $0x128] sm:$0xff]  ;;  %v107_v53 = vld [vmem:[%s11784_s9 + $0x140] sm:$0xff]  ;;  %12096 = vst [vmem:[#allocation15_spill] sm:$0xff] %v8592_v56 }
  0xc7   :  { %6084 = vmatpush1.bf16.msra.mxu1 %v6083_v29  ;;  %v7410_v28 = vunpack.i.h.bf16 %v7408_v34  ;;  %v7409_v41 = vunpack.i.l.bf16 %v7408_v34  ;;  %v7405_v43 = vunpack.i.h.bf16 %v7403_v18  ;;  %v7404_v17 = vunpack.i.l.bf16 %v7403_v18  ;;  %6098 = vmatpush3.bf16.msra.mxu0 %v6097_v22  ;;  %v110_v34 = vld [vmem:[%s11784_s9 + $0x158] sm:$0xff]  ;;  %v113_v18 = vld [vmem:[%s11784_s9 + $0x170] sm:$0xff]  ;;  %v132_v0 = vld [vmem:[%s11784_s9 + $0x208] sm:$0xff] }
  0xc8   :  { %v6085_v32 = vpack.c.bf16 %v793_v1, %v757_v8  ;;  %6099 = vmatprep.subr.bf16.mxu0 %v11806_v9  ;;  %v8434_v22 = vpack.c.bf16 %v88_v10, %v85_v54  ;;  %v8452_v29 = vpack.c.bf16 %v94_v24, %v91_v11  ;;  %v8470_v31 = vpack.c.bf16 %v100_v2, %v97_v13  ;;  %v103_v8 = vld [vmem:[%s11784_s9 + $0x120] sm:$0xff]  ;;  %v81_v10 = vld [vmem:[%s11784_s9 + $0x70] sm:$0xff]  ;;  %v84_v15 = vld [vmem:[%s11784_s9 + $0x88] sm:$0xff] }
  0xc9   :  { %v864_v25 = vsel %vm857_vm5, %v7375_v47, %v7409_v41  ;;  %v828_v21 = vsel %vm821_vm6, %v7370_v37, %v7404_v17  ;;  %v829_v45 = vsel %vm821_vm6, %v7404_v17, %v7405_v43  ;;  %v865_v46 = vsel %vm857_vm5, %v7409_v41, %v7410_v28  ;;  %v71_v37 = vld [vmem:[%s11784_s9 + $0x20] sm:$0xff]  ;;  %v112_v41 = vld [vmem:[%s11784_s9 + $0x168] sm:$0xff]  ;;  %v130_v27 = vld [vmem:[%s11784_s9 + $0x1f8] sm:$0xff] }
  0xca   :  { %6086 = vmatprep.subr.bf16.mxu1 %v6085_v32  ;;  %v892_v20 = vpop.permute.xlu1 %891  ;;  %v890_v23 = vpop.permute.xlu0 %889  ;;  %v6103_v26 = vpack.c.bf16 %v7410_v28, %v7405_v43  ;;  %v6089_v49 = vpack.c.bf16 %v865_v46, %v829_v45  ;;  %v6091_v36 = vpack.c.bf16 %v864_v25, %v828_v21  ;;  %v67_v47 = vld [vmem:[%s11784_s9] sm:$0xff]  ;;  %v8374_v39 = vpack.c.bf16 %v71_v37, %v68_v35  ;;  %v109_v28 = vld [vmem:[%s11784_s9 + $0x150] sm:$0xff]  ;;  %v116_v17 = vld [vmem:[%s11784_s9 + $0x188] sm:$0xff] }
  0xcb   :  { %6088 = vmatpush1.bf16.msra.mxu1 %v6087_v5  ;;  %6101 = vmatpush3.bf16.msra.mxu0 %v6100_v6  ;;  %v901_v16 = vsel %vm893_vm7, %v890_v23, %v892_v20  ;;  %v900_v50 = vsel %vm893_vm7, %v8311_v57, %v890_v23  ;;  %v8376_v38 = vpack.c.bf16 %v70_v44, %v67_v47  ;;  %v73_v57 = vld [vmem:[%s11784_s9 + $0x30] sm:$0xff]  ;;  %v106_v6 = vld [vmem:[%s11784_s9 + $0x138] sm:$0xff]  ;;  %v119_v32 = vld [vmem:[%s11784_s9 + $0x1a0] sm:$0xff] }
  0xcc   :  { %6102 = vmatprep.subr.bf16.mxu0 %v11806_v9  ;;  %6090 = vmatprep.subr.bf16.mxu1 %v6089_v49  ;;  %v8398_v59 = vpack.c.bf16 %v76_v42, %v73_v57  ;;  %12083 = vst [vmem:[#allocation2_spill] sm:$0xff] %v8470_v31  ;;  %v8473_v33 = vpack.c.bf16 %v107_v53, %v104_v30  ;;  %v117_v43 = vld [vmem:[%s11784_s9 + $0x190] sm:$0xff]  ;;  %v120_v25 = vld [vmem:[%s11784_s9 + $0x1a8] sm:$0xff]  ;;  %v115_v49 = vld [vmem:[%s11784_s9 + $0x180] sm:$0xff] }
  0xcd   :  { %v8488_v1 = vpack.c.bf16 %v106_v6, %v103_v8  ;;  %v8491_v5 = vpack.c.bf16 %v113_v18, %v110_v34  ;;  %v8511_v21 = vpack.c.bf16 %v120_v25, %v117_v43  ;;  %v69_v45 = vld [vmem:[%s11784_s9 + $0x10] sm:$0xff]  ;;  %v72_v46 = vld [vmem:[%s11784_s9 + $0x28] sm:$0xff]  ;;  %v122_v35 = vld [vmem:[%s11784_s9 + $0x1b8] sm:$0xff]  ;;  %v8594_v11 = vpack.c.bf16 %v84_v15, %v81_v10 }
  0xce   :  { %12084 = vst [vmem:[#allocation3_spill] sm:$0xff] %v8473_v33  ;;  %v8522_v23 = vpack.c.bf16 %v72_v46, %v69_v45  ;;  %v125_v37 = vld [vmem:[%s11784_s9 + $0x1d0] sm:$0xff]  ;;  %v126_v47 = vld [vmem:[%s11784_s9 + $0x1d8] sm:$0xff]  ;;  %v127_v60 = vld [vmem:[%s11784_s9 + $0x1e0] sm:$0xff] }
  0xcf   :  { %6092 = vmatpush1.bf16.msra.mxu1 %v6091_v36  ;;  %6104 = vmatpush3.bf16.msra.mxu0 %v6103_v26  ;;  %12085 = vst [vmem:[#allocation4_spill] sm:$0xff] %v8488_v1  ;;  %12086 = vst [vmem:[#allocation5_spill] sm:$0xff] %v8491_v5  ;;  %v8525_v26 = vpack.c.bf16 %v119_v32, %v116_v17  ;;  %v118_v36 = vld [vmem:[%s11784_s9 + $0x198] sm:$0xff]  ;;  %v8561_v42 = vpack.c.bf16 %v125_v37, %v122_v35  ;;  %v135_v13 = vld [vmem:[%s11784_s9 + $0x220] sm:$0xff] }
  0xd0   :  { %1149 = vmatprep.subr.mxu1 %v901_v16  ;;  %5859 = vmatprep.subr.mxu0 %v11804_v4  ;;  %12087 = vst [vmem:[#allocation6_spill] sm:$0xff] %v8511_v21  ;;  %12089 = vst [vmem:[#allocation8_spill] sm:$0xff] %v8522_v23  ;;  %v123_v16 = vld [vmem:[%s11784_s9 + $0x1c0] sm:$0xff]  ;;  %v8556_v58 = vpack.c.bf16 %v118_v36, %v115_v49  ;;  %v134_v2 = vld [vmem:[%s11784_s9 + $0x218] sm:$0xff]  ;;  %v8628_v18 = vpack.c.bf16 %v130_v27, %v127_v60 }
  0xd1   :  { %12090 = vst [vmem:[#allocation9_spill] sm:$0xff] %v8525_v26  ;;  %v8547_v44 = vpack.c.bf16 %v126_v47, %v123_v16  ;;  %12094 = vst [vmem:[#allocation13_spill] sm:$0xff] %v8561_v42  ;;  %v137_v30 = vld [vmem:[%s11784_s9 + $0x230] sm:$0xff]  ;;  %v138_v53 = vld [vmem:[%s11784_s9 + $0x238] sm:$0xff] }
  0xd2   :  { %12092 = vst [vmem:[#allocation11_spill] sm:$0xff] %v8556_v58  ;;  %12097 = vst [vmem:[#allocation16_spill] sm:$0xff] %v8594_v11  ;;  %v8619_v8 = vpack.c.bf16 %v138_v53, %v135_v13  ;;  %v87_v6 = vld [vmem:[%s11784_s9 + $0xa0] sm:$0xff]  ;;  %v90_v34 = vld [vmem:[%s11784_s9 + $0xb8] sm:$0xff] }
  0xd3   :  { %1150 = vmatpush1.msra.mxu1 %v900_v50  ;;  %5860 = vmatpush3.msra.mxu0 %v892_v20  ;;  %v8520_v20 = vpack.c.bf16 %v112_v41, %v109_v28  ;;  %12091 = vst [vmem:[#allocation10_spill] sm:$0xff] %v8547_v44  ;;  %v75_v50 = vld [vmem:[%s11784_s9 + $0x40] sm:$0xff]  ;;  %12100 = vst [vmem:[#allocation19_spill] sm:$0xff] %v8628_v18  ;;  %v8630_v28 = vpack.c.bf16 %v90_v34, %v87_v6  ;;  %v133_v43 = vld [vmem:[%s11784_s9 + $0x210] sm:$0xff] }
  0xd4   :  { %5279 = vmatmul.mubr.msk.f32.vlgmr.msra.gmra.mrb[2].mxu1 %vm916_vm8, %v8178_v19  ;;  %5862 = vmatmul.mubr.msk.f32.vlgmr.msra.gmra.mrb[4].mxu0 %vm916_vm8, %v8178_v19  ;;  %v79_v19 = vld [vmem:[%s11784_s9 + $0x60] sm:$0xff]  ;;  %v8558_v57 = vpack.c.bf16 %v78_v51, %v75_v50  ;;  %12099 = vst [vmem:[#allocation18_spill] sm:$0xff] %v8619_v8  ;;  %v8633_v41 = vpack.c.bf16 %v137_v30, %v134_v2  ;;  %v136_v17 = vld [vmem:[%s11784_s9 + $0x228] sm:$0xff]  ;;  %v141_v32 = vld [vmem:[%s11784_s9 + $0x250] sm:$0xff] }
  0xd5   :  { %6106 = vmatprep.subr.bf16.mxu1 %v8374_v39  ;;  %v8416_v7 = vpack.c.bf16 %v82_v62, %v79_v19  ;;  %12088 = vst [vmem:[#allocation7_spill] sm:$0xff] %v8520_v20  ;;  %6372 = vmatprep.subr.bf16.mxu0 %v8511_v21  ;;  %v129_v19 = vld [vmem:[%s11784_s9 + $0x1f0] sm:$0xff]  ;;  %v128_v62 = vld [vmem:[%s11784_s9 + $0x1e8] sm:$0xff]  ;;  %12101 = vst [vmem:[#allocation20_spill] sm:$0xff] %v8630_v28  ;;  %v8664_v35 = vpack.c.bf16 %v136_v17, %v133_v43 }
  0xd6   :  { %6108 = vmatpush1.bf16.msra.mxu1 %v8376_v38  ;;  %6374 = vmatpush3.bf16.msra.mxu0 %v8522_v23  ;;  %12093 = vst [vmem:[#allocation12_spill] sm:$0xff] %v8558_v57  ;;  %v8583_v54 = vpack.c.bf16 %v132_v0, %v129_v19  ;;  %v8597_v24 = vpack.c.bf16 %v131_v63, %v128_v62  ;;  %12102 = vst [vmem:[#allocation21_spill] sm:$0xff] %v8633_v41  ;;  %v140_v25 = vld [vmem:[%s11784_s9 + $0x248] sm:$0xff]  ;;  %v143_v45 = vld [vmem:[%s11784_s9 + $0x260] sm:$0xff] }
  0xd7   :  { %6110 = vmatprep.subr.bf16.mxu1 %v8378_v40  ;;  %6376 = vmatprep.subr.bf16.mxu0 %v8547_v44  ;;  %v144_v46 = vld [vmem:[%s11784_s9 + $0x268] sm:$0xff]  ;;  %v93_v36 = vld [vmem:[%s11784_s9 + $0xd0] sm:$0xff]  ;;  %12104 = vst [vmem:[#allocation23_spill] sm:$0xff] %v8664_v35  ;;  %v8669_v47 = vpack.c.bf16 %v143_v45, %v140_v25  ;;  %v139_v50 = vld [vmem:[%s11784_s9 + $0x240] sm:$0xff] }
  0xd8   :  { %12095 = vst [vmem:[#allocation14_spill] sm:$0xff] %v8583_v54  ;;  %12098 = vst [vmem:[#allocation17_spill] sm:$0xff] %v8597_v24  ;;  %v8655_v49 = vpack.c.bf16 %v144_v46, %v141_v32  ;;  %v96_v16 = vld [vmem:[%s11784_s9 + $0xe8] sm:$0xff]  ;;  %v142_v51 = vld [vmem:[%s11784_s9 + $0x258] sm:$0xff] }
  0xd9   :  { %v8666_v37 = vpack.c.bf16 %v96_v16, %v93_v36  ;;  %12106 = vst [vmem:[#allocation25_spill] sm:$0xff] %v8669_v47  ;;  %v149_v19 = vld [vmem:[%s11784_s9 + $0x290] sm:$0xff]  ;;  %v150_v62 = vld [vmem:[%s11784_s9 + $0x298] sm:$0xff]  ;;  %v99_v0 = vld [vmem:[%s11784_s9 + $0x100] sm:$0xff]  ;;  %v8700_v15 = vpack.c.bf16 %v142_v51, %v139_v50 }
  0xda   :  { %6112 = vmatpush1.bf16.msra.mxu1 %v8398_v59  ;;  %6378 = vmatpush3.bf16.msra.mxu0 %v8558_v57  ;;  %12103 = vst [vmem:[#allocation22_spill] sm:$0xff] %v8655_v49  ;;  %v8691_v63 = vpack.c.bf16 %v150_v62, %v147_v48  ;;  %v102_v10 = vld [vmem:[%s11784_s9 + $0x118] sm:$0xff]  ;;  %v8705_v27 = vpack.c.bf16 %v149_v19, %v146_v55  ;;  %v145_v13 = vld [vmem:[%s11784_s9 + $0x270] sm:$0xff]  ;;  %v148_v2 = vld [vmem:[%s11784_s9 + $0x288] sm:$0xff] }
  0xdb   :  { %6114 = vmatprep.subr.bf16.mxu1 %v8401_v61  ;;  %6380 = vmatprep.subr.bf16.mxu0 %v8583_v54  ;;  %12105 = vst [vmem:[#allocation24_spill] sm:$0xff] %v8666_v37  ;;  %12108 = vst [vmem:[#allocation27_spill] sm:$0xff] %v8700_v15  ;;  %v8702_v60 = vpack.c.bf16 %v102_v10, %v99_v0  ;;  %v153_v30 = vld [vmem:[%s11784_s9 + $0x2b0] sm:$0xff]  ;;  %v152_v53 = vld [vmem:[%s11784_s9 + $0x2a8] sm:$0xff]  ;;  %v8736_v25 = vpack.c.bf16 %v148_v2, %v145_v13 }
  0xdc   :  { %12107 = vst [vmem:[#allocation26_spill] sm:$0xff] %v8691_v63  ;;  %12110 = vst [vmem:[#allocation29_spill] sm:$0xff] %v8705_v27  ;;  %v155_v6 = vld [vmem:[%s11784_s9 + $0x2c0] sm:$0xff]  ;;  %v156_v34 = vld [vmem:[%s11784_s9 + $0x2c8] sm:$0xff] }
  0xdd   :  { %12109 = vst [vmem:[#allocation28_spill] sm:$0xff] %v8702_v60  ;;  %v8727_v43 = vpack.c.bf16 %v156_v34, %v153_v30  ;;  %v105_v17 = vld [vmem:[%s11784_s9 + $0x130] sm:$0xff]  ;;  %v108_v32 = vld [vmem:[%s11784_s9 + $0x148] sm:$0xff]  ;;  %12112 = vst [vmem:[#allocation31_spill] sm:$0xff] %v8736_v25  ;;  %v8741_v46 = vpack.c.bf16 %v155_v6, %v152_v53 }
  0xde   :  { %6116 = vmatpush1.bf16.msra.mxu1 %v8416_v7  ;;  %6382 = vmatpush3.bf16.msra.mxu0 %v8594_v11  ;;  %v8738_v45 = vpack.c.bf16 %v108_v32, %v105_v17  ;;  %v151_v36 = vld [vmem:[%s11784_s9 + $0x2a0] sm:$0xff]  ;;  %v154_v16 = vld [vmem:[%s11784_s9 + $0x2b8] sm:$0xff]  ;;  %v161_v48 = vld [vmem:[%s11784_s9 + $0x2f0] sm:$0xff] }
  0xdf   :  { %6118 = vmatprep.subr.bf16.mxu1 %v8419_v52  ;;  %6384 = vmatprep.subr.bf16.mxu0 %v8619_v8  ;;  %12111 = vst [vmem:[#allocation30_spill] sm:$0xff] %v8727_v43  ;;  %12114 = vst [vmem:[#allocation33_spill] sm:$0xff] %v8741_v46  ;;  %v159_v50 = vld [vmem:[%s11784_s9 + $0x2e0] sm:$0xff]  ;;  %v158_v51 = vld [vmem:[%s11784_s9 + $0x2d8] sm:$0xff]  ;;  %v8772_v10 = vpack.c.bf16 %v154_v16, %v151_v36 }
  0xe0   :  { %12113 = vst [vmem:[#allocation32_spill] sm:$0xff] %v8738_v45  ;;  %v162_v55 = vld [vmem:[%s11784_s9 + $0x2f8] sm:$0xff]  ;;  %v111_v62 = vld [vmem:[%s11784_s9 + $0x160] sm:$0xff]  ;;  %v8777_v2 = vpack.c.bf16 %v161_v48, %v158_v51  ;;  %v157_v30 = vld [vmem:[%s11784_s9 + $0x2d0] sm:$0xff]  ;;  %v8810_v51 = vpop.permute.xlu0 %913 }
  0xe1   :  { %v8763_v19 = vpack.c.bf16 %v162_v55, %v159_v50  ;;  %v114_v0 = vld [vmem:[%s11784_s9 + $0x178] sm:$0xff]  ;;  %12116 = vst [vmem:[#allocation35_spill] sm:$0xff] %v8772_v10  ;;  %v160_v53 = vld [vmem:[%s11784_s9 + $0x2e8] sm:$0xff]  ;;  %v213_v6 = vld [vmem:[%s11784_s9 + $0x490] sm:$0xff] }
  0xe2   :  { %6120 = vmatpush1.bf16.msra.mxu1 %v8434_v22  ;;  %6386 = vmatpush3.bf16.msra.mxu0 %v8630_v28  ;;  %v8774_v13 = vpack.c.bf16 %v114_v0, %v111_v62  ;;  %12118 = vst [vmem:[#allocation37_spill] sm:$0xff] %v8777_v2  ;;  %v164_v34 = vld [vmem:[%s11784_s9 + $0x308] sm:$0xff]  ;;  %v167_v17 = vld [vmem:[%s11784_s9 + $0x320] sm:$0xff]  ;;  %v8802_v16 = vpack.c.bf16 %v160_v53, %v157_v30  ;;  %12122 = vst [vmem:[#allocation41_spill] sm:$0xff] %v8810_v51 }
  0xe3   :  { %6122 = vmatprep.subr.bf16.mxu1 %v8437_v12  ;;  %6388 = vmatprep.subr.bf16.mxu0 %v8655_v49  ;;  %12115 = vst [vmem:[#allocation34_spill] sm:$0xff] %v8763_v19  ;;  %v216_v32 = vld [vmem:[%s11784_s9 + $0x4a8] sm:$0xff]  ;;  %v8805_v50 = vpack.c.bf16 %v167_v17, %v164_v34  ;;  %v217_v11 = vld [vmem:[%s11784_s9 + $0x4b0] sm:$0xff] }
  0xe4   :  { %12117 = vst [vmem:[#allocation36_spill] sm:$0xff] %v8774_v13  ;;  %v8799_v36 = vpack.c.bf16 %v216_v32, %v213_v6  ;;  %12120 = vst [vmem:[#allocation39_spill] sm:$0xff] %v8802_v16 }
  0xe5   :  { %12121 = vst [vmem:[#allocation40_spill] sm:$0xff] %v8805_v50 }
  0xe6   :  { %6124 = vmatpush1.bf16.msra.mxu1 %v8452_v29  ;;  %6390 = vmatpush3.bf16.msra.mxu0 %v8666_v37  ;;  %12119 = vst [vmem:[#allocation38_spill] sm:$0xff] %v8799_v36 }
  0xe7   :  { %6126 = vmatprep.subr.bf16.mxu1 %v8455_v3  ;;  %6392 = vmatprep.subr.bf16.mxu0 %v8691_v63  ;;  %v172_v63 = vld [vmem:[%s11784_s9 + $0x348] sm:$0xff] }
  0xea   :  { %6128 = vmatpush1.bf16.msra.mxu1 %v8470_v31  ;;  %6394 = vmatpush3.bf16.msra.mxu0 %v8702_v60  ;;  %v169_v60 = vld [vmem:[%s11784_s9 + $0x330] sm:$0xff] }
  0xeb   :  { %6130 = vmatprep.subr.bf16.mxu1 %v8473_v33  ;;  %6396 = vmatprep.subr.bf16.mxu0 %v8727_v43 }
  0xee   :  { %6132 = vmatpush1.bf16.msra.mxu1 %v8488_v1  ;;  %6398 = vmatpush3.bf16.msra.mxu0 %v8738_v45 }
  0xef   :  { %6134 = vmatprep.subr.bf16.mxu1 %v8491_v5  ;;  %6400 = vmatprep.subr.bf16.mxu0 %v8763_v19 }
  0xf2   :  { %6136 = vmatpush1.bf16.msra.mxu1 %v8520_v20  ;;  %6402 = vmatpush3.bf16.msra.mxu0 %v8774_v13 }
  0xf3   :  { %6138 = vmatprep.subr.bf16.mxu1 %v8525_v26  ;;  %6404 = vmatprep.subr.bf16.mxu0 %v8799_v36 }
  0xf6   :  { %6140 = vmatpush1.bf16.msra.mxu1 %v8556_v58 }
  0xf7   :  { %6142 = vmatprep.subr.bf16.mxu1 %v8561_v42 }
  0xfa   :  { %6144 = vmatpush1.bf16.msra.mxu1 %v8592_v56 }
  0xfb   :  { %6146 = vmatprep.subr.bf16.mxu1 %v8597_v24 }
  0xfe   :  { %6148 = vmatpush1.bf16.msra.mxu1 %v8628_v18 }
  0xff   :  { %6150 = vmatprep.subr.bf16.mxu1 %v8633_v41 }
 0x102   :  { %6152 = vmatpush1.bf16.msra.mxu1 %v8664_v35 }
 0x103   :  { %6154 = vmatprep.subr.bf16.mxu1 %v8669_v47 }
 0x106   :  { %6156 = vmatpush1.bf16.msra.mxu1 %v8700_v15 }
 0x107   :  { %6158 = vmatprep.subr.bf16.mxu1 %v8705_v27 }
 0x10a   :  { %6160 = vmatpush1.bf16.msra.mxu1 %v8736_v25 }
 0x10b   :  { %6162 = vmatprep.subr.bf16.mxu1 %v8741_v46 }
 0x10e   :  { %6164 = vmatpush1.bf16.msra.mxu1 %v8772_v10 }
 0x10f   :  { %6166 = vmatprep.subr.bf16.mxu1 %v8777_v2 }
 0x112   :  { %6168 = vmatpush1.bf16.msra.mxu1 %v8802_v16 }
 0x113   :  { %6170 = vmatprep.subr.bf16.mxu1 %v8805_v50 }
 0x16c   :  { %v986_v48 = vpop.f32.mrb[0].mxu0 }
 0x16d   :  { %v987_v55 = vadd.f32 %v986_v48, %v8810_v51  ;;  %v988_v62 = vpop.f32.mrb[1].mxu0 }
 0x16e   :  { %v989_v0 = vadd.f32 %v988_v62, %v8810_v51 }
 0x16f   :  { %v5281_v30 = vmul.f32 -1.442695, %v987_v55 }
 0x170   :  { %v5282_v53 = vmul.f32 -1.442695, %v989_v0 }
 0x171   :  { %7712 = vpow2.f32 %v5281_v30  ;;  %v163_v30 = vld [vmem:[%s11784_s9 + $0x300] sm:$0xff] }
 0x172   :  { %7714 = vpow2.f32 %v5282_v53  ;;  %v166_v53 = vld [vmem:[%s11784_s9 + $0x318] sm:$0xff] }
 0x173   :  { %v8846_v45 = vpack.c.bf16 %v166_v53, %v163_v30  ;;  %v176_v30 = vld [vmem:[%s11784_s9 + $0x368] sm:$0xff]  ;;  %v225_v53 = vld [vmem:[%s11784_s9 + $0x4f0] sm:$0xff] }
 0x175   :  { %12123 = vst [vmem:[#allocation42_spill] sm:$0xff] %v8846_v45 }
 0x17b   :  { %v7713_v6 = vpop.eup %7712 }
 0x17c   :  { %v7715_v34 = vpop.eup %7714  ;;  %v1301_v17 = vadd.f32 1.0, %v7713_v6  ;;  %v165_v6 = vld [vmem:[%s11784_s9 + $0x310] sm:$0xff] }
 0x17d   :  { %v1302_v32 = vadd.f32 1.0, %v7715_v34 }
 0x17e   :  { %7716 = vrcp.f32 %v1301_v17  ;;  %v173_v17 = vld [vmem:[%s11784_s9 + $0x350] sm:$0xff] }
 0x17f   :  { %7718 = vrcp.f32 %v1302_v32  ;;  %v219_v32 = vld [vmem:[%s11784_s9 + $0x4c0] sm:$0xff] }
 0x181   :  { %v1057_v14 = vpop.f32.mrb[0].mxu1 }
 0x182   :  { %v1059_v4 = vpop.f32.mrb[1].mxu1  ;;  %v8818_v48 = vadd.f32 %v1057_v14, %v8810_v51  ;;  %v170_v14 = vld [vmem:[%s11784_s9 + $0x338] sm:$0xff] }
 0x183   :  { %v8815_v9 = vadd.f32 %v1059_v4, %v8810_v51  ;;  %v168_v4 = vld [vmem:[%s11784_s9 + $0x328] sm:$0xff]  ;;  %v8856_v49 = vpack.c.bf16 %v173_v17, %v170_v14  ;;  %v175_v14 = vld [vmem:[%s11784_s9 + $0x360] sm:$0xff]  ;;  %v182_v17 = vld [vmem:[%s11784_s9 + $0x398] sm:$0xff] }
 0x184   :  { %v5283_v13 = vmul.f32 -1.442695, %v8818_v48  ;;  %v8848_v43 = vpack.c.bf16 %v168_v4, %v165_v6  ;;  %v228_v6 = vld [vmem:[%s11784_s9 + $0x508] sm:$0xff] }
 0x185   :  { %v5284_v62 = vmul.f32 -1.442695, %v8815_v9  ;;  %12125 = vst [vmem:[#allocation44_spill] sm:$0xff] %v8856_v49 }
 0x186   :  { %12124 = vst [vmem:[#allocation43_spill] sm:$0xff] %v8848_v43 }
 0x187   :  { %7720 = vpow2.f32 %v5284_v62  ;;  %v222_v62 = vld [vmem:[%s11784_s9 + $0x4d8] sm:$0xff] }
 0x188   :  { %v7717_v34 = vpop.eup %7716  ;;  %v8858_v28 = vpack.c.bf16 %v222_v62, %v219_v32  ;;  %7722 = vpow2.f32 %v5283_v13  ;;  %v8894_v13 = vpack.c.bf16 %v228_v6, %v225_v53  ;;  %v185_v32 = vld [vmem:[%s11784_s9 + $0x3b0] sm:$0xff]  ;;  %v231_v62 = vld [vmem:[%s11784_s9 + $0x520] sm:$0xff] }
 0x189   :  { %v7719_v36 = vpop.eup %7718  ;;  %v1328_v37 = vmul.f32 %v7717_v34, %v987_v55  ;;  %v179_v55 = vld [vmem:[%s11784_s9 + $0x380] sm:$0xff]  ;;  %v178_v34 = vld [vmem:[%s11784_s9 + $0x378] sm:$0xff]  ;;  %v181_v6 = vld [vmem:[%s11784_s9 + $0x390] sm:$0xff] }
 0x18a   :  { %v1329_v19 = vmul.f32 %v7719_v36, %v989_v0  ;;  %12126 = vst [vmem:[#allocation45_spill] sm:$0xff] %v8858_v28  ;;  %v171_v36 = vld [vmem:[%s11784_s9 + $0x340] sm:$0xff]  ;;  %v174_v0 = vld [vmem:[%s11784_s9 + $0x358] sm:$0xff]  ;;  %12130 = vst [vmem:[#allocation49_spill] sm:$0xff] %v8894_v13 }
 0x18b   :  { %v8882_v4 = vpack.c.bf16 %v174_v0, %v171_v36  ;;  %v234_v36 = vld [vmem:[%s11784_s9 + $0x538] sm:$0xff] }
 0x18c   :  { %1415 = vmatprep.mubr.f32.mxu1 %v1329_v19  ;;  %1770 = vmatprep.mubr.f32.mxu0 %v1329_v19  ;;  %v8880_v19 = vpack.c.bf16 %v172_v63, %v169_v60  ;;  %v177_v63 = vld [vmem:[%s11784_s9 + $0x370] sm:$0xff]  ;;  %v180_v60 = vld [vmem:[%s11784_s9 + $0x388] sm:$0xff] }
 0x18d   :  { %1416 = vmatmul.mubr.f32.vlgmr.msra.gmra.mrb[4].mxu1 %v1328_v37  ;;  %1771 = vmatmul.mubr.f32.vlgmr.msra.gmra.mrb[6].mxu0 %v1328_v37  ;;  %12128 = vst [vmem:[#allocation47_spill] sm:$0xff] %v8882_v4  ;;  %v8892_v37 = vpack.c.bf16 %v179_v55, %v176_v30  ;;  %v8916_v55 = vpack.c.bf16 %v178_v34, %v175_v14  ;;  %v183_v14 = vld [vmem:[%s11784_s9 + $0x3a0] sm:$0xff]  ;;  %v186_v34 = vld [vmem:[%s11784_s9 + $0x3b8] sm:$0xff] }
 0x18e   :  { %6172 = vmatpush1.bf16.msra.mxu1 %v8846_v45  ;;  %6406 = vmatpush3.bf16.msra.mxu0 %v8848_v43  ;;  %12127 = vst [vmem:[#allocation46_spill] sm:$0xff] %v8880_v19  ;;  %v8918_v53 = vpack.c.bf16 %v180_v60, %v177_v63  ;;  %v188_v63 = vld [vmem:[%s11784_s9 + $0x3c8] sm:$0xff]  ;;  %v191_v60 = vld [vmem:[%s11784_s9 + $0x3e0] sm:$0xff] }
 0x18f   :  { %6174 = vmatprep.subr.bf16.mxu1 %v8856_v49  ;;  %6408 = vmatprep.subr.bf16.mxu0 %v8858_v28  ;;  %12129 = vst [vmem:[#allocation48_spill] sm:$0xff] %v8892_v37  ;;  %12131 = vst [vmem:[#allocation50_spill] sm:$0xff] %v8916_v55  ;;  %v184_v28 = vld [vmem:[%s11784_s9 + $0x3a8] sm:$0xff] }
 0x190   :  { %12132 = vst [vmem:[#allocation51_spill] sm:$0xff] %v8918_v53  ;;  %v196_v45 = vld [vmem:[%s11784_s9 + $0x408] sm:$0xff] }
 0x191   :  { %v7721_v0 = vpop.eup %7720 }
 0x192   :  { %v1304_v30 = vadd.f32 1.0, %v7721_v0  ;;  %6176 = vmatpush1.bf16.msra.mxu1 %v8880_v19  ;;  %6410 = vmatpush3.bf16.msra.mxu0 %v8882_v4  ;;  %v8928_v0 = vpack.c.bf16 %v185_v32, %v182_v17  ;;  %v8930_v19 = vpack.c.bf16 %v234_v36, %v231_v62  ;;  %v237_v17 = vld [vmem:[%s11784_s9 + $0x550] sm:$0xff]  ;;  %v240_v32 = vld [vmem:[%s11784_s9 + $0x568] sm:$0xff]  ;;  %v190_v4 = vld [vmem:[%s11784_s9 + $0x3d8] sm:$0xff]  ;;  %v7723_v49 = vpop.eup %7722 }
 0x193   :  { %6178 = vmatprep.subr.bf16.mxu1 %v8892_v37  ;;  %6412 = vmatprep.subr.bf16.mxu0 %v8894_v13  ;;  %v8956_v13 = vpack.c.bf16 %v186_v34, %v183_v14  ;;  %v187_v37 = vld [vmem:[%s11784_s9 + $0x3c0] sm:$0xff]  ;;  %v189_v14 = vld [vmem:[%s11784_s9 + $0x3d0] sm:$0xff]  ;;  %v192_v34 = vld [vmem:[%s11784_s9 + $0x3e8] sm:$0xff] }
 0x194   :  { %12133 = vst [vmem:[#allocation52_spill] sm:$0xff] %v8928_v0  ;;  %12134 = vst [vmem:[#allocation53_spill] sm:$0xff] %v8930_v19  ;;  %7724 = vrcp.f32 %v1304_v30  ;;  %v8954_v30 = vpack.c.bf16 %v184_v28, %v181_v6  ;;  %v8969_v28 = vpack.c.bf16 %v191_v60, %v188_v63  ;;  %v8971_v6 = vpack.c.bf16 %v240_v32, %v237_v17  ;;  %v243_v63 = vld [vmem:[%s11784_s9 + $0x580] sm:$0xff]  ;;  %v246_v60 = vld [vmem:[%s11784_s9 + $0x598] sm:$0xff] }
 0x195   :  { %v8950_v62 = vpop.f32.mrb[2].mxu0  ;;  %12136 = vst [vmem:[#allocation55_spill] sm:$0xff] %v8956_v13  ;;  %v1303_v32 = vadd.f32 1.0, %v7723_v49 }
 0x196   :  { %6180 = vmatpush1.bf16.msra.mxu1 %v8916_v55  ;;  %6414 = vmatpush3.bf16.msra.mxu0 %v8918_v53  ;;  %v1130_v36 = vpop.f32.mrb[3].mxu0  ;;  %12135 = vst [vmem:[#allocation54_spill] sm:$0xff] %v8954_v30  ;;  %12137 = vst [vmem:[#allocation56_spill] sm:$0xff] %v8969_v28  ;;  %v8996_v53 = vpack.c.bf16 %v192_v34, %v189_v14  ;;  %v193_v55 = vld [vmem:[%s11784_s9 + $0x3f0] sm:$0xff]  ;;  %v200_v14 = vld [vmem:[%s11784_s9 + $0x428] sm:$0xff] }
 0x197   :  { %v8965_v43 = vadd.f32 %v1130_v36, %v8810_v51  ;;  %6182 = vmatprep.subr.bf16.mxu1 %v8928_v0  ;;  %6416 = vmatprep.subr.bf16.mxu0 %v8930_v19  ;;  %12138 = vst [vmem:[#allocation57_spill] sm:$0xff] %v8971_v6  ;;  %v194_v36 = vld [vmem:[%s11784_s9 + $0x3f8] sm:$0xff]  ;;  %v197_v19 = vld [vmem:[%s11784_s9 + $0x410] sm:$0xff]  ;;  %v8994_v0 = vpack.c.bf16 %v190_v4, %v187_v37  ;;  %v195_v4 = vld [vmem:[%s11784_s9 + $0x400] sm:$0xff] }
 0x198   :  { %12140 = vst [vmem:[#allocation59_spill] sm:$0xff] %v8996_v53  ;;  %v9006_v49 = vpack.c.bf16 %v197_v19, %v194_v36  ;;  %v198_v37 = vld [vmem:[%s11784_s9 + $0x418] sm:$0xff]  ;;  %v203_v34 = vld [vmem:[%s11784_s9 + $0x440] sm:$0xff]  ;;  %v249_v19 = vld [vmem:[%s11784_s9 + $0x5b0] sm:$0xff] }
 0x199   :  { %v5286_v17 = vmul.f32 -1.442695, %v8965_v43  ;;  %12139 = vst [vmem:[#allocation58_spill] sm:$0xff] %v8994_v0  ;;  %v252_v36 = vld [vmem:[%s11784_s9 + $0x5c8] sm:$0xff] }
 0x19a   :  { %6184 = vmatpush1.bf16.msra.mxu1 %v8954_v30  ;;  %6418 = vmatpush3.bf16.msra.mxu0 %v8956_v13  ;;  %12141 = vst [vmem:[#allocation60_spill] sm:$0xff] %v9006_v49  ;;  %v9008_v13 = vpack.c.bf16 %v246_v60, %v243_v63  ;;  %v9030_v60 = vpack.c.bf16 %v196_v45, %v193_v55  ;;  %v201_v55 = vld [vmem:[%s11784_s9 + $0x430] sm:$0xff] }
 0x19b   :  { %7726 = vpow2.f32 %v5286_v17  ;;  %6186 = vmatprep.subr.bf16.mxu1 %v8969_v28  ;;  %6420 = vmatprep.subr.bf16.mxu0 %v8971_v6  ;;  %v9032_v17 = vpack.c.bf16 %v198_v37, %v195_v4  ;;  %v199_v6 = vld [vmem:[%s11784_s9 + $0x420] sm:$0xff]  ;;  %v202_v28 = vld [vmem:[%s11784_s9 + $0x438] sm:$0xff]  ;;  %v9045_v45 = vpack.c.bf16 %v252_v36, %v249_v19  ;;  %v204_v4 = vld [vmem:[%s11784_s9 + $0x448] sm:$0xff] }
 0x19c   :  { %12142 = vst [vmem:[#allocation61_spill] sm:$0xff] %v9008_v13  ;;  %7728 = vrcp.f32 %v1303_v32  ;;  %12143 = vst [vmem:[#allocation62_spill] sm:$0xff] %v9030_v60  ;;  %v9043_v32 = vpack.c.bf16 %v203_v34, %v200_v14  ;;  %v209_v37 = vld [vmem:[%s11784_s9 + $0x470] sm:$0xff]  ;;  %v255_v14 = vld [vmem:[%s11784_s9 + $0x5e0] sm:$0xff]  ;;  %v9067_v19 = vpack.c.bf16 %v202_v28, %v199_v6  ;;  %v9069_v36 = vpack.c.bf16 %v204_v4, %v201_v55 }
 0x19d   :  { %12144 = vst [vmem:[#allocation63_spill] sm:$0xff] %v9032_v17  ;;  %12146 = vst [vmem:[#allocation65_spill] sm:$0xff] %v9045_v45  ;;  %v258_v34 = vld [vmem:[%s11784_s9 + $0x5f8] sm:$0xff]  ;;  %v207_v28 = vld [vmem:[%s11784_s9 + $0x460] sm:$0xff] }
 0x19e   :  { %v7725_v63 = vpop.eup %7724  ;;  %6188 = vmatpush1.bf16.msra.mxu1 %v8994_v0  ;;  %6422 = vmatpush3.bf16.msra.mxu0 %v8996_v53  ;;  %12145 = vst [vmem:[#allocation64_spill] sm:$0xff] %v9043_v32  ;;  %12147 = vst [vmem:[#allocation66_spill] sm:$0xff] %v9067_v19  ;;  %v210_v6 = vld [vmem:[%s11784_s9 + $0x478] sm:$0xff]  ;;  %v212_v55 = vld [vmem:[%s11784_s9 + $0x488] sm:$0xff] }
 0x19f   :  { %v1331_v30 = vmul.f32 %v7725_v63, %v8815_v9  ;;  %6190 = vmatprep.subr.bf16.mxu1 %v9006_v49  ;;  %6424 = vmatprep.subr.bf16.mxu0 %v9008_v13  ;;  %v206_v9 = vld [vmem:[%s11784_s9 + $0x458] sm:$0xff]  ;;  %12148 = vst [vmem:[#allocation67_spill] sm:$0xff] %v9069_v36  ;;  %v205_v63 = vld [vmem:[%s11784_s9 + $0x450] sm:$0xff]  ;;  %v208_v13 = vld [vmem:[%s11784_s9 + $0x468] sm:$0xff] }
 0x1a0   :  { %v215_v4 = vld [vmem:[%s11784_s9 + $0x4a0] sm:$0xff]  ;;  %v214_v53 = vld [vmem:[%s11784_s9 + $0x498] sm:$0xff] }
 0x1a1   :  { %1486 = vmatprep.mubr.f32.mxu1 %v1331_v30  ;;  %1840 = vmatprep.mubr.f32.mxu0 %v1331_v30  ;;  %v9079_v30 = vpack.c.bf16 %v209_v37, %v206_v9  ;;  %v309_v9 = vld [vmem:[%s11784_s9 + $0x790] sm:$0xff]  ;;  %v312_v37 = vld [vmem:[%s11784_s9 + $0x7a8] sm:$0xff]  ;;  %v211_v49 = vld [vmem:[%s11784_s9 + $0x480] sm:$0xff] }
 0x1a2   :  { %6192 = vmatpush1.bf16.msra.mxu1 %v9030_v60  ;;  %6426 = vmatpush3.bf16.msra.mxu0 %v9032_v17  ;;  %v9081_v60 = vpack.c.bf16 %v258_v34, %v255_v14  ;;  %v9103_v34 = vadd.f32 %v8950_v62, %v8810_v51  ;;  %v9109_v17 = vpack.c.bf16 %v210_v6, %v207_v28  ;;  %v261_v28 = vld [vmem:[%s11784_s9 + $0x610] sm:$0xff]  ;;  %v264_v6 = vld [vmem:[%s11784_s9 + $0x628] sm:$0xff] }
 0x1a3   :  { %6194 = vmatprep.subr.bf16.mxu1 %v9043_v32  ;;  %6428 = vmatprep.subr.bf16.mxu0 %v9045_v45  ;;  %12149 = vst [vmem:[#allocation68_spill] sm:$0xff] %v9079_v30  ;;  %v9107_v32 = vpack.c.bf16 %v208_v13, %v205_v63  ;;  %v9123_v13 = vpack.c.bf16 %v215_v4, %v212_v55  ;;  %v221_v55 = vld [vmem:[%s11784_s9 + $0x4d0] sm:$0xff]  ;;  %v315_v4 = vld [vmem:[%s11784_s9 + $0x7c0] sm:$0xff] }
 0x1a4   :  { %12150 = vst [vmem:[#allocation69_spill] sm:$0xff] %v9081_v60  ;;  %12152 = vst [vmem:[#allocation71_spill] sm:$0xff] %v9109_v17  ;;  %v9125_v63 = vpack.c.bf16 %v312_v37, %v309_v9  ;;  %v318_v9 = vld [vmem:[%s11784_s9 + $0x7d8] sm:$0xff]  ;;  %v9153_v8 = vpack.c.bf16 %v264_v6, %v261_v28  ;;  %v267_v28 = vld [vmem:[%s11784_s9 + $0x640] sm:$0xff] }
 0x1a5   :  { %v7727_v14 = vpop.eup %7726  ;;  %12151 = vst [vmem:[#allocation70_spill] sm:$0xff] %v9107_v32  ;;  %12153 = vst [vmem:[#allocation72_spill] sm:$0xff] %v9123_v13  ;;  %v270_v6 = vld [vmem:[%s11784_s9 + $0x658] sm:$0xff] }
 0x1a6   :  { %v1306_v45 = vadd.f32 1.0, %v7727_v14  ;;  %6196 = vmatpush1.bf16.msra.mxu1 %v9067_v19  ;;  %6430 = vmatpush3.bf16.msra.mxu0 %v9069_v36  ;;  %12154 = vst [vmem:[#allocation73_spill] sm:$0xff] %v9125_v63  ;;  %v218_v14 = vld [vmem:[%s11784_s9 + $0x4b8] sm:$0xff]  ;;  %v7729_v36 = vpop.eup %7728  ;;  %12156 = vst [vmem:[#allocation75_spill] sm:$0xff] %v9153_v8 }
 0x1a7   :  { %v9117_v0 = vpop.f32.mrb[2].mxu1  ;;  %v9119_v62 = vpop.f32.mrb[4].mxu0  ;;  %6198 = vmatprep.subr.bf16.mxu1 %v9079_v30  ;;  %6432 = vmatprep.subr.bf16.mxu0 %v9081_v60  ;;  %v5285_v60 = vmul.f32 -1.442695, %v9103_v34  ;;  %v9162_v54 = vmul.f32 %v7729_v36, %v8818_v48  ;;  %v224_v48 = vld [vmem:[%s11784_s9 + $0x4e8] sm:$0xff]  ;;  %v227_v36 = vld [vmem:[%s11784_s9 + $0x500] sm:$0xff] }
 0x1a8   :  { %7730 = vrcp.f32 %v1306_v45  ;;  %v1201_v30 = vpop.f32.mrb[3].mxu1  ;;  %v5863_v37 = vpop.f32.mrb[5].mxu0  ;;  %v9151_v45 = vpack.c.bf16 %v214_v53, %v211_v49  ;;  %v9167_v53 = vpack.c.bf16 %v221_v55, %v218_v14  ;;  %v9169_v49 = vpack.c.bf16 %v318_v9, %v315_v4  ;;  %v321_v14 = vld [vmem:[%s11784_s9 + $0x7f0] sm:$0xff]  ;;  %v324_v55 = vld [vmem:[%s11784_s9 + $0x808] sm:$0xff] }
 0x1a9   :  { %v9147_v19 = vadd.f32 %v1201_v30, %v8810_v51  ;;  %v220_v37 = vld [vmem:[%s11784_s9 + $0x4c8] sm:$0xff]  ;;  %7732 = vpow2.f32 %v5285_v60  ;;  %v9194_v9 = vpack.c.bf16 %v270_v6, %v267_v28  ;;  %v9204_v60 = vpack.c.bf16 %v227_v36, %v224_v48  ;;  %v233_v28 = vld [vmem:[%s11784_s9 + $0x530] sm:$0xff]  ;;  %v327_v6 = vld [vmem:[%s11784_s9 + $0x820] sm:$0xff] }
 0x1aa   :  { %6200 = vmatpush1.bf16.msra.mxu1 %v9107_v32  ;;  %6434 = vmatpush3.bf16.msra.mxu0 %v9109_v17  ;;  %12155 = vst [vmem:[#allocation74_spill] sm:$0xff] %v9151_v45  ;;  %12157 = vst [vmem:[#allocation76_spill] sm:$0xff] %v9167_v53  ;;  %v9192_v4 = vpack.c.bf16 %v220_v37, %v217_v11  ;;  %v273_v11 = vld [vmem:[%s11784_s9 + $0x670] sm:$0xff]  ;;  %v276_v37 = vld [vmem:[%s11784_s9 + $0x688] sm:$0xff] }
 0x1ab   :  { %v5288_v30 = vmul.f32 -1.442695, %v9147_v19  ;;  %6202 = vmatprep.subr.bf16.mxu1 %v9123_v13  ;;  %6436 = vmatprep.subr.bf16.mxu0 %v9125_v63  ;;  %12158 = vst [vmem:[#allocation77_spill] sm:$0xff] %v9169_v49  ;;  %12160 = vst [vmem:[#allocation79_spill] sm:$0xff] %v9194_v9  ;;  %v223_v63 = vld [vmem:[%s11784_s9 + $0x4e0] sm:$0xff]  ;;  %v226_v13 = vld [vmem:[%s11784_s9 + $0x4f8] sm:$0xff] }
 0x1ac   :  { %12159 = vst [vmem:[#allocation78_spill] sm:$0xff] %v9192_v4  ;;  %12161 = vst [vmem:[#allocation80_spill] sm:$0xff] %v9204_v60  ;;  %v330_v48 = vld [vmem:[%s11784_s9 + $0x838] sm:$0xff]  ;;  %v244_v17 = vld [vmem:[%s11784_s9 + $0x588] sm:$0xff] }
 0x1ad   :  { %1841 = vmatmul.mubr.f32.vlgmr.msra.gmra.mrb[8].mxu0 %v9162_v54  ;;  %7734 = vpow2.f32 %v5288_v30  ;;  %v230_v30 = vld [vmem:[%s11784_s9 + $0x518] sm:$0xff] }
 0x1ae   :  { %6204 = vmatpush1.bf16.msra.mxu1 %v9151_v45  ;;  %6438 = vmatpush3.bf16.msra.mxu0 %v9153_v8  ;;  %v9206_v8 = vpack.c.bf16 %v324_v55, %v321_v14  ;;  %v9228_v14 = vpack.c.bf16 %v226_v13, %v223_v63  ;;  %v9230_v55 = vpack.c.bf16 %v276_v37, %v273_v11  ;;  %v279_v63 = vld [vmem:[%s11784_s9 + $0x6a0] sm:$0xff]  ;;  %v282_v11 = vld [vmem:[%s11784_s9 + $0x6b8] sm:$0xff] }
 0x1af   :  { %6206 = vmatprep.subr.bf16.mxu1 %v9167_v53  ;;  %6440 = vmatprep.subr.bf16.mxu0 %v9169_v49  ;;  %v229_v49 = vld [vmem:[%s11784_s9 + $0x510] sm:$0xff]  ;;  %v232_v53 = vld [vmem:[%s11784_s9 + $0x528] sm:$0xff]  ;;  %v9245_v13 = vpack.c.bf16 %v330_v48, %v327_v6  ;;  %v239_v37 = vld [vmem:[%s11784_s9 + $0x560] sm:$0xff]  ;;  %v9270_v48 = vpack.c.bf16 %v282_v11, %v279_v63 }
 0x1b0   :  { %12162 = vst [vmem:[#allocation81_spill] sm:$0xff] %v9206_v8  ;;  %12163 = vst [vmem:[#allocation82_spill] sm:$0xff] %v9228_v14  ;;  %v9268_v6 = vpack.c.bf16 %v232_v53, %v229_v49  ;;  %v285_v53 = vld [vmem:[%s11784_s9 + $0x6d0] sm:$0xff]  ;;  %v288_v49 = vld [vmem:[%s11784_s9 + $0x6e8] sm:$0xff] }
 0x1b1   :  { %12164 = vst [vmem:[#allocation83_spill] sm:$0xff] %v9230_v55  ;;  %12166 = vst [vmem:[#allocation85_spill] sm:$0xff] %v9245_v13  ;;  %v242_v63 = vld [vmem:[%s11784_s9 + $0x578] sm:$0xff]  ;;  %v245_v11 = vld [vmem:[%s11784_s9 + $0x590] sm:$0xff] }
 0x1b2   :  { %v7731_v36 = vpop.eup %7730  ;;  %6208 = vmatpush1.bf16.msra.mxu1 %v9192_v4  ;;  %6442 = vmatpush3.bf16.msra.mxu0 %v9194_v9  ;;  %v9243_v9 = vpack.c.bf16 %v233_v28, %v230_v30  ;;  %v333_v30 = vld [vmem:[%s11784_s9 + $0x850] sm:$0xff]  ;;  %v336_v28 = vld [vmem:[%s11784_s9 + $0x868] sm:$0xff]  ;;  %12167 = vst [vmem:[#allocation86_spill] sm:$0xff] %v9268_v6  ;;  %12168 = vst [vmem:[#allocation87_spill] sm:$0xff] %v9270_v48 }
 0x1b3   :  { %v9239_v45 = vmul.f32 %v7731_v36, %v8965_v43  ;;  %6210 = vmatprep.subr.bf16.mxu1 %v9204_v60  ;;  %6444 = vmatprep.subr.bf16.mxu0 %v9206_v8  ;;  %v236_v43 = vld [vmem:[%s11784_s9 + $0x548] sm:$0xff]  ;;  %v235_v36 = vld [vmem:[%s11784_s9 + $0x540] sm:$0xff]  ;;  %v238_v8 = vld [vmem:[%s11784_s9 + $0x558] sm:$0xff]  ;;  %v7733_v60 = vpop.eup %7732 }
 0x1b4   :  { %12165 = vst [vmem:[#allocation84_spill] sm:$0xff] %v9243_v9  ;;  %v241_v4 = vld [vmem:[%s11784_s9 + $0x570] sm:$0xff] }
 0x1b5   :  { %1910 = vmatprep.mubr.f32.mxu0 %v9239_v45 }
 0x1b6   :  { %6212 = vmatpush1.bf16.msra.mxu1 %v9228_v14  ;;  %6446 = vmatpush3.bf16.msra.mxu0 %v9230_v55  ;;  %v9280_v14 = vpack.c.bf16 %v239_v37, %v236_v43  ;;  %v9282_v55 = vpack.c.bf16 %v336_v28, %v333_v30  ;;  %v339_v43 = vld [vmem:[%s11784_s9 + $0x880] sm:$0xff]  ;;  %v342_v37 = vld [vmem:[%s11784_s9 + $0x898] sm:$0xff]  ;;  %v1305_v28 = vadd.f32 1.0, %v7733_v60  ;;  %v9316_v60 = vpack.c.bf16 %v245_v11, %v242_v63  ;;  %v345_v11 = vld [vmem:[%s11784_s9 + $0x8b0] sm:$0xff] }
 0x1b7   :  { %6214 = vmatprep.subr.bf16.mxu1 %v9243_v9  ;;  %6448 = vmatprep.subr.bf16.mxu0 %v9245_v13  ;;  %v7735_v30 = vpop.eup %7734  ;;  %v9304_v13 = vpack.c.bf16 %v238_v8, %v235_v36  ;;  %v9306_v9 = vpack.c.bf16 %v288_v49, %v285_v53  ;;  %v291_v8 = vld [vmem:[%s11784_s9 + $0x700] sm:$0xff]  ;;  %v294_v36 = vld [vmem:[%s11784_s9 + $0x718] sm:$0xff]  ;;  %v248_v53 = vld [vmem:[%s11784_s9 + $0x5a8] sm:$0xff] }
 0x1b8   :  { %12169 = vst [vmem:[#allocation88_spill] sm:$0xff] %v9280_v14  ;;  %12170 = vst [vmem:[#allocation89_spill] sm:$0xff] %v9282_v55  ;;  %v1308_v49 = vadd.f32 1.0, %v7735_v30  ;;  %v251_v63 = vld [vmem:[%s11784_s9 + $0x5c0] sm:$0xff]  ;;  %7736 = vrcp.f32 %v1305_v28  ;;  %v9342_v30 = vpack.c.bf16 %v294_v36, %v291_v8  ;;  %v254_v8 = vld [vmem:[%s11784_s9 + $0x5d8] sm:$0xff] }
 0x1b9   :  { %12171 = vst [vmem:[#allocation90_spill] sm:$0xff] %v9304_v13  ;;  %12172 = vst [vmem:[#allocation91_spill] sm:$0xff] %v9306_v9  ;;  %v9352_v28 = vpack.c.bf16 %v251_v63, %v248_v53  ;;  %v257_v36 = vld [vmem:[%s11784_s9 + $0x5f0] sm:$0xff]  ;;  %v351_v53 = vld [vmem:[%s11784_s9 + $0x8e0] sm:$0xff] }
 0x1ba   :  { %6216 = vmatpush1.bf16.msra.mxu1 %v9268_v6  ;;  %6450 = vmatpush3.bf16.msra.mxu0 %v9270_v48  ;;  %12173 = vst [vmem:[#allocation92_spill] sm:$0xff] %v9316_v60  ;;  %v9318_v6 = vpack.c.bf16 %v342_v37, %v339_v43  ;;  %v348_v43 = vld [vmem:[%s11784_s9 + $0x8c8] sm:$0xff]  ;;  %v9340_v37 = vpack.c.bf16 %v244_v17, %v241_v4  ;;  %12176 = vst [vmem:[#allocation95_spill] sm:$0xff] %v9342_v30  ;;  %v297_v17 = vld [vmem:[%s11784_s9 + $0x730] sm:$0xff]  ;;  %7738 = vrcp.f32 %v1308_v49 }
 0x1bb   :  { %6218 = vmatprep.subr.bf16.mxu1 %v9280_v14  ;;  %6452 = vmatprep.subr.bf16.mxu0 %v9282_v55  ;;  %v247_v55 = vld [vmem:[%s11784_s9 + $0x5a0] sm:$0xff]  ;;  %v250_v14 = vld [vmem:[%s11784_s9 + $0x5b8] sm:$0xff]  ;;  %12177 = vst [vmem:[#allocation96_spill] sm:$0xff] %v9352_v28  ;;  %v300_v4 = vld [vmem:[%s11784_s9 + $0x748] sm:$0xff] }
 0x1bc   :  { %12174 = vst [vmem:[#allocation93_spill] sm:$0xff] %v9318_v6  ;;  %12175 = vst [vmem:[#allocation94_spill] sm:$0xff] %v9340_v37  ;;  %v354_v63 = vld [vmem:[%s11784_s9 + $0x8f8] sm:$0xff]  ;;  %v253_v49 = vld [vmem:[%s11784_s9 + $0x5d0] sm:$0xff] }
 0x1bd   :  { %v265_v48 = vld [vmem:[%s11784_s9 + $0x630] sm:$0xff] }
 0x1be   :  { %6220 = vmatpush1.bf16.msra.mxu1 %v9304_v13  ;;  %6454 = vmatpush3.bf16.msra.mxu0 %v9306_v9  ;;  %v9354_v13 = vpack.c.bf16 %v348_v43, %v345_v11  ;;  %v9376_v11 = vpack.c.bf16 %v250_v14, %v247_v55  ;;  %v9378_v43 = vpack.c.bf16 %v300_v4, %v297_v17  ;;  %v303_v14 = vld [vmem:[%s11784_s9 + $0x760] sm:$0xff]  ;;  %v306_v55 = vld [vmem:[%s11784_s9 + $0x778] sm:$0xff]  ;;  %v260_v17 = vld [vmem:[%s11784_s9 + $0x608] sm:$0xff] }
 0x1bf   :  { %6222 = vmatprep.subr.bf16.mxu1 %v9316_v60  ;;  %6456 = vmatprep.subr.bf16.mxu0 %v9318_v6  ;;  %v256_v6 = vld [vmem:[%s11784_s9 + $0x5e8] sm:$0xff]  ;;  %v9388_v60 = vpack.c.bf16 %v257_v36, %v254_v8  ;;  %v263_v4 = vld [vmem:[%s11784_s9 + $0x620] sm:$0xff]  ;;  %v405_v8 = vld [vmem:[%s11784_s9 + $0xa90] sm:$0xff] }
 0x1c0   :  { %12178 = vst [vmem:[#allocation97_spill] sm:$0xff] %v9354_v13  ;;  %12179 = vst [vmem:[#allocation98_spill] sm:$0xff] %v9376_v11  ;;  %v408_v36 = vld [vmem:[%s11784_s9 + $0xaa8] sm:$0xff] }
 0x1c1   :  { %12180 = vst [vmem:[#allocation99_spill] sm:$0xff] %v9378_v43  ;;  %12181 = vst [vmem:[#allocation100_spill] sm:$0xff] %v9388_v60 }
 0x1c2   :  { %6224 = vmatpush1.bf16.msra.mxu1 %v9340_v37  ;;  %6458 = vmatpush3.bf16.msra.mxu0 %v9342_v30  ;;  %v9390_v37 = vpack.c.bf16 %v354_v63, %v351_v53  ;;  %v9412_v53 = vadd.f32 %v9117_v0, %v8810_v51  ;;  %v9416_v63 = vpack.c.bf16 %v256_v6, %v253_v49  ;;  %v259_v0 = vld [vmem:[%s11784_s9 + $0x600] sm:$0xff]  ;;  %v7737_v6 = vpop.eup %7736  ;;  %v357_v49 = vld [vmem:[%s11784_s9 + $0x910] sm:$0xff] }
 0x1c3   :  { %6226 = vmatprep.subr.bf16.mxu1 %v9352_v28  ;;  %6460 = vmatprep.subr.bf16.mxu0 %v9354_v13  ;;  %v9418_v13 = vpack.c.bf16 %v306_v55, %v303_v14  ;;  %v9422_v28 = vpack.c.bf16 %v263_v4, %v260_v17  ;;  %v9424_v30 = vpack.c.bf16 %v408_v36, %v405_v8  ;;  %v360_v14 = vld [vmem:[%s11784_s9 + $0x928] sm:$0xff]  ;;  %v266_v55 = vld [vmem:[%s11784_s9 + $0x638] sm:$0xff]  ;;  %v269_v17 = vld [vmem:[%s11784_s9 + $0x650] sm:$0xff] }
 0x1c4   :  { %12182 = vst [vmem:[#allocation101_spill] sm:$0xff] %v9390_v37  ;;  %12183 = vst [vmem:[#allocation102_spill] sm:$0xff] %v9416_v63  ;;  %v411_v4 = vld [vmem:[%s11784_s9 + $0xac0] sm:$0xff]  ;;  %v414_v8 = vld [vmem:[%s11784_s9 + $0xad8] sm:$0xff]  ;;  %v7739_v36 = vpop.eup %7738  ;;  %v9460_v9 = vpack.c.bf16 %v360_v14, %v357_v49 }
 0x1c5   :  { %12184 = vst [vmem:[#allocation103_spill] sm:$0xff] %v9418_v13  ;;  %12185 = vst [vmem:[#allocation104_spill] sm:$0xff] %v9422_v28  ;;  %v272_v49 = vld [vmem:[%s11784_s9 + $0x668] sm:$0xff]  ;;  %v275_v14 = vld [vmem:[%s11784_s9 + $0x680] sm:$0xff] }
 0x1c6   :  { %6228 = vmatpush1.bf16.msra.mxu1 %v9376_v11  ;;  %6462 = vmatpush3.bf16.msra.mxu0 %v9378_v43  ;;  %12186 = vst [vmem:[#allocation105_spill] sm:$0xff] %v9424_v30  ;;  %v262_v43 = vld [vmem:[%s11784_s9 + $0x618] sm:$0xff]  ;;  %v9456_v11 = vmul.f32 %v7737_v6, %v9103_v34  ;;  %12188 = vst [vmem:[#allocation107_spill] sm:$0xff] %v9460_v9  ;;  %v9471_v34 = vpack.c.bf16 %v269_v17, %v266_v55  ;;  %v417_v55 = vld [vmem:[%s11784_s9 + $0xaf0] sm:$0xff] }
 0x1c7   :  { %6230 = vmatprep.subr.bf16.mxu1 %v9388_v60  ;;  %6464 = vmatprep.subr.bf16.mxu0 %v9390_v37  ;;  %v5287_v37 = vmul.f32 -1.442695, %v9412_v53  ;;  %v9453_v60 = vpack.c.bf16 %v262_v43, %v259_v0  ;;  %v363_v43 = vld [vmem:[%s11784_s9 + $0x940] sm:$0xff]  ;;  %v9473_v0 = vpack.c.bf16 %v414_v8, %v411_v4  ;;  %v366_v6 = vld [vmem:[%s11784_s9 + $0x958] sm:$0xff]  ;;  %v420_v17 = vld [vmem:[%s11784_s9 + $0xb08] sm:$0xff]  ;;  %v9497_v4 = vadd.f32 %v9119_v62, %v8810_v51 }
 0x1c8   :  { %12189 = vst [vmem:[#allocation108_spill] sm:$0xff] %v9471_v34  ;;  %v9507_v8 = vpack.c.bf16 %v275_v14, %v272_v49  ;;  %v274_v62 = vld [vmem:[%s11784_s9 + $0x678] sm:$0xff] }
 0x1c9   :  { %12187 = vst [vmem:[#allocation106_spill] sm:$0xff] %v9453_v60  ;;  %12190 = vst [vmem:[#allocation109_spill] sm:$0xff] %v9473_v0  ;;  %7740 = vpow2.f32 %v5287_v37  ;;  %v271_v37 = vld [vmem:[%s11784_s9 + $0x660] sm:$0xff]  ;;  %v426_v49 = vld [vmem:[%s11784_s9 + $0xb38] sm:$0xff]  ;;  %v5289_v14 = vmul.f32 -1.442695, %v9497_v4 }
 0x1ca   :  { %6232 = vmatpush1.bf16.msra.mxu1 %v9416_v63  ;;  %6466 = vmatpush3.bf16.msra.mxu0 %v9418_v13  ;;  %v268_v63 = vld [vmem:[%s11784_s9 + $0x648] sm:$0xff]  ;;  %12193 = vst [vmem:[#allocation112_spill] sm:$0xff] %v9507_v8 }
 0x1cb   :  { %6234 = vmatprep.subr.bf16.mxu1 %v9422_v28  ;;  %6468 = vmatprep.subr.bf16.mxu0 %v9424_v30  ;;  %v9485_v30 = vmul.f32 %v7739_v36, %v9147_v19  ;;  %v9505_v19 = vpack.c.bf16 %v366_v6, %v363_v43  ;;  %v278_v36 = vld [vmem:[%s11784_s9 + $0x698] sm:$0xff]  ;;  %v281_v43 = vld [vmem:[%s11784_s9 + $0x6b0] sm:$0xff]  ;;  %v423_v6 = vld [vmem:[%s11784_s9 + $0xb20] sm:$0xff]  ;;  %7742 = vpow2.f32 %v5289_v14 }
 0x1cc   :  { %v286_v14 = vld [vmem:[%s11784_s9 + $0x6d8] sm:$0xff] }
 0x1cd   :  { %1487 = vmatmul.mubr.f32.vlgmr.msra.gmra.mrb[4].mxu1 %v9162_v54  ;;  %1911 = vmatmul.mubr.f32.vlgmr.msra.gmra.mrb[10].mxu0 %v9456_v11  ;;  %v9501_v54 = vpack.c.bf16 %v268_v63, %v265_v48  ;;  %12192 = vst [vmem:[#allocation111_spill] sm:$0xff] %v9505_v19  ;;  %v9520_v48 = vpack.c.bf16 %v420_v17, %v417_v55  ;;  %v372_v63 = vld [vmem:[%s11784_s9 + $0x988] sm:$0xff] }
 0x1ce   :  { %6236 = vmatpush1.bf16.msra.mxu1 %v9453_v60  ;;  %1557 = vmatprep.mubr.f32.mxu1 %v9239_v45  ;;  %v369_v45 = vld [vmem:[%s11784_s9 + $0x970] sm:$0xff]  ;;  %v9539_v55 = vpack.c.bf16 %v274_v62, %v271_v37  ;;  %v375_v37 = vld [vmem:[%s11784_s9 + $0x9a0] sm:$0xff]  ;;  %v9557_v62 = vpack.c.bf16 %v426_v49, %v423_v6  ;;  %v432_v6 = vld [vmem:[%s11784_s9 + $0xb68] sm:$0xff] }
 0x1cf   :  { %12191 = vst [vmem:[#allocation110_spill] sm:$0xff] %v9501_v54  ;;  %6470 = vmatpush3.bf16.msra.mxu0 %v9460_v9  ;;  %1980 = vmatprep.mubr.f32.mxu0 %v9485_v30  ;;  %12194 = vst [vmem:[#allocation113_spill] sm:$0xff] %v9520_v48  ;;  %v9543_v17 = vpack.c.bf16 %v372_v63, %v369_v45  ;;  %v280_v9 = vld [vmem:[%s11784_s9 + $0x6a8] sm:$0xff]  ;;  %v378_v45 = vld [vmem:[%s11784_s9 + $0x9b8] sm:$0xff] }
 0x1d0   :  { %6238 = vmatprep.subr.bf16.mxu1 %v9471_v34  ;;  %6472 = vmatprep.subr.bf16.mxu0 %v9473_v0  ;;  %12195 = vst [vmem:[#allocation114_spill] sm:$0xff] %v9539_v55  ;;  %v9545_v0 = vpack.c.bf16 %v281_v43, %v278_v36  ;;  %v277_v34 = vld [vmem:[%s11784_s9 + $0x690] sm:$0xff]  ;;  %12198 = vst [vmem:[#allocation117_spill] sm:$0xff] %v9557_v62  ;;  %v284_v63 = vld [vmem:[%s11784_s9 + $0x6c8] sm:$0xff] }
 0x1d1   :  { %12196 = vst [vmem:[#allocation115_spill] sm:$0xff] %v9543_v17  ;;  %v287_v36 = vld [vmem:[%s11784_s9 + $0x6e0] sm:$0xff]  ;;  %v429_v43 = vld [vmem:[%s11784_s9 + $0xb50] sm:$0xff]  ;;  %v9575_v49 = vpack.c.bf16 %v280_v9, %v277_v34  ;;  %v292_v60 = vld [vmem:[%s11784_s9 + $0x708] sm:$0xff] }
 0x1d2   :  { %6240 = vmatpush1.bf16.msra.mxu1 %v9501_v54  ;;  %12197 = vst [vmem:[#allocation116_spill] sm:$0xff] %v9545_v0  ;;  %v381_v9 = vld [vmem:[%s11784_s9 + $0x9d0] sm:$0xff] }
 0x1d3   :  { %6474 = vmatpush3.bf16.msra.mxu0 %v9505_v19  ;;  %6242 = vmatprep.subr.bf16.mxu1 %v9507_v8  ;;  %12199 = vst [vmem:[#allocation118_spill] sm:$0xff] %v9575_v49  ;;  %v9581_v8 = vpack.c.bf16 %v287_v36, %v284_v63  ;;  %v283_v19 = vld [vmem:[%s11784_s9 + $0x6c0] sm:$0xff]  ;;  %v7741_v34 = vpop.eup %7740  ;;  %v293_v63 = vld [vmem:[%s11784_s9 + $0x710] sm:$0xff] }
 0x1d4   :  { %6476 = vmatprep.subr.bf16.mxu0 %v9520_v48  ;;  %v9579_v48 = vpack.c.bf16 %v378_v45, %v375_v37  ;;  %v384_v37 = vld [vmem:[%s11784_s9 + $0x9e8] sm:$0xff]  ;;  %v290_v45 = vld [vmem:[%s11784_s9 + $0x6f8] sm:$0xff]  ;;  %v435_v36 = vld [vmem:[%s11784_s9 + $0xb80] sm:$0xff] }
 0x1d5   :  { %12201 = vst [vmem:[#allocation120_spill] sm:$0xff] %v9581_v8  ;;  %v289_v54 = vld [vmem:[%s11784_s9 + $0x6f0] sm:$0xff] }
 0x1d6   :  { %6244 = vmatpush1.bf16.msra.mxu1 %v9539_v55  ;;  %12200 = vst [vmem:[#allocation119_spill] sm:$0xff] %v9579_v48  ;;  %v9617_v55 = vpack.c.bf16 %v293_v63, %v290_v45  ;;  %v441_v45 = vld [vmem:[%s11784_s9 + $0xbb0] sm:$0xff]  ;;  %v444_v63 = vld [vmem:[%s11784_s9 + $0xbc8] sm:$0xff] }
 0x1d7   :  { %6478 = vmatpush3.bf16.msra.mxu0 %v9543_v17  ;;  %6246 = vmatprep.subr.bf16.mxu1 %v9545_v0  ;;  %v9593_v0 = vpack.c.bf16 %v432_v6, %v429_v43  ;;  %v438_v43 = vld [vmem:[%s11784_s9 + $0xb98] sm:$0xff]  ;;  %v9611_v6 = vpack.c.bf16 %v286_v14, %v283_v19  ;;  %v9615_v17 = vpack.c.bf16 %v384_v37, %v381_v9  ;;  %v387_v19 = vld [vmem:[%s11784_s9 + $0xa00] sm:$0xff] }
 0x1d8   :  { %6480 = vmatprep.subr.bf16.mxu0 %v9557_v62  ;;  %v1307_v62 = vadd.f32 1.0, %v7741_v34  ;;  %12205 = vst [vmem:[#allocation124_spill] sm:$0xff] %v9617_v55  ;;  %v9629_v14 = vpack.c.bf16 %v438_v43, %v435_v36  ;;  %v390_v9 = vld [vmem:[%s11784_s9 + $0xa18] sm:$0xff]  ;;  %v296_v34 = vld [vmem:[%s11784_s9 + $0x728] sm:$0xff]  ;;  %v299_v37 = vld [vmem:[%s11784_s9 + $0x740] sm:$0xff]  ;;  %v9647_v36 = vpack.c.bf16 %v292_v60, %v289_v54  ;;  %v7743_v54 = vpop.eup %7742 }
 0x1d9   :  { %12202 = vst [vmem:[#allocation121_spill] sm:$0xff] %v9593_v0  ;;  %12203 = vst [vmem:[#allocation122_spill] sm:$0xff] %v9611_v6  ;;  %v9651_v43 = vpack.c.bf16 %v390_v9, %v387_v19  ;;  %v393_v60 = vld [vmem:[%s11784_s9 + $0xa30] sm:$0xff]  ;;  %v396_v19 = vld [vmem:[%s11784_s9 + $0xa48] sm:$0xff] }
 0x1da   :  { %6248 = vmatpush1.bf16.msra.mxu1 %v9575_v49  ;;  %12204 = vst [vmem:[#allocation123_spill] sm:$0xff] %v9615_v17  ;;  %12206 = vst [vmem:[#allocation125_spill] sm:$0xff] %v9629_v14  ;;  %7744 = vrcp.f32 %v1307_v62  ;;  %v9665_v62 = vpack.c.bf16 %v444_v63, %v441_v45  ;;  %v302_v9 = vld [vmem:[%s11784_s9 + $0x758] sm:$0xff]  ;;  %v304_v49 = vld [vmem:[%s11784_s9 + $0x768] sm:$0xff] }
 0x1db   :  { %6482 = vmatpush3.bf16.msra.mxu0 %v9579_v48  ;;  %6250 = vmatprep.subr.bf16.mxu1 %v9581_v8  ;;  %12207 = vst [vmem:[#allocation126_spill] sm:$0xff] %v9647_v36  ;;  %12208 = vst [vmem:[#allocation127_spill] sm:$0xff] %v9651_v43  ;;  %v295_v8 = vld [vmem:[%s11784_s9 + $0x720] sm:$0xff]  ;;  %v298_v48 = vld [vmem:[%s11784_s9 + $0x738] sm:$0xff] }
 0x1dc   :  { %6484 = vmatprep.subr.bf16.mxu0 %v9593_v0  ;;  %v9653_v0 = vpack.c.bf16 %v299_v37, %v296_v34  ;;  %12210 = vst [vmem:[#allocation129_spill] sm:$0xff] %v9665_v62  ;;  %v305_v34 = vld [vmem:[%s11784_s9 + $0x770] sm:$0xff]  ;;  %v447_v37 = vld [vmem:[%s11784_s9 + $0xbe0] sm:$0xff]  ;;  %v450_v45 = vld [vmem:[%s11784_s9 + $0xbf8] sm:$0xff]  ;;  %v9683_v63 = vpack.c.bf16 %v298_v48, %v295_v8 }
 0x1dd   :  { %v399_v8 = vld [vmem:[%s11784_s9 + $0xa60] sm:$0xff]  ;;  %v9701_v48 = vpack.c.bf16 %v450_v45, %v447_v37 }
 0x1de   :  { %6252 = vmatpush1.bf16.msra.mxu1 %v9611_v6  ;;  %12209 = vst [vmem:[#allocation128_spill] sm:$0xff] %v9653_v0  ;;  %12211 = vst [vmem:[#allocation130_spill] sm:$0xff] %v9683_v63  ;;  %v301_v6 = vld [vmem:[%s11784_s9 + $0x750] sm:$0xff]  ;;  %v307_v45 = vld [vmem:[%s11784_s9 + $0x780] sm:$0xff] }
 0x1df   :  { %6486 = vmatpush3.bf16.msra.mxu0 %v9615_v17  ;;  %6254 = vmatprep.subr.bf16.mxu1 %v9617_v55  ;;  %v9687_v55 = vpack.c.bf16 %v396_v19, %v393_v60  ;;  %v9689_v17 = vpack.c.bf16 %v305_v34, %v302_v9  ;;  %12214 = vst [vmem:[#allocation133_spill] sm:$0xff] %v9701_v48  ;;  %v402_v60 = vld [vmem:[%s11784_s9 + $0xa78] sm:$0xff]  ;;  %v311_v19 = vld [vmem:[%s11784_s9 + $0x7a0] sm:$0xff] }
 0x1e0   :  { %6488 = vmatprep.subr.bf16.mxu0 %v9629_v14  ;;  %v1309_v14 = vadd.f32 1.0, %v7743_v54  ;;  %v308_v54 = vld [vmem:[%s11784_s9 + $0x788] sm:$0xff]  ;;  %v9713_v9 = vpack.c.bf16 %v304_v49, %v301_v6  ;;  %v9717_v34 = vpack.c.bf16 %v402_v60, %v399_v8  ;;  %v453_v49 = vld [vmem:[%s11784_s9 + $0xc10] sm:$0xff] }
 0x1e1   :  { %12212 = vst [vmem:[#allocation131_spill] sm:$0xff] %v9687_v55  ;;  %12213 = vst [vmem:[#allocation132_spill] sm:$0xff] %v9689_v17  ;;  %v9719_v37 = vpack.c.bf16 %v311_v19, %v308_v54  ;;  %v456_v6 = vld [vmem:[%s11784_s9 + $0xc28] sm:$0xff]  ;;  %v317_v8 = vld [vmem:[%s11784_s9 + $0x7d0] sm:$0xff] }
 0x1e2   :  { %6256 = vmatpush1.bf16.msra.mxu1 %v9647_v36  ;;  %12215 = vst [vmem:[#allocation134_spill] sm:$0xff] %v9713_v9  ;;  %7746 = vrcp.f32 %v1309_v14  ;;  %12216 = vst [vmem:[#allocation135_spill] sm:$0xff] %v9717_v34  ;;  %v314_v14 = vld [vmem:[%s11784_s9 + $0x7b8] sm:$0xff]  ;;  %v9745_v19 = vpack.c.bf16 %v456_v6, %v453_v49  ;;  %v320_v6 = vld [vmem:[%s11784_s9 + $0x7e8] sm:$0xff] }
 0x1e3   :  { %6490 = vmatpush3.bf16.msra.mxu0 %v9651_v43  ;;  %6258 = vmatprep.subr.bf16.mxu1 %v9653_v0  ;;  %12217 = vst [vmem:[#allocation136_spill] sm:$0xff] %v9719_v37  ;;  %v462_v49 = vld [vmem:[%s11784_s9 + $0xc58] sm:$0x7] }
 0x1e4   :  { %6492 = vmatprep.subr.bf16.mxu0 %v9665_v62  ;;  %v310_v62 = vld [vmem:[%s11784_s9 + $0x798] sm:$0xff]  ;;  %v7745_v60 = vpop.eup %7744  ;;  %12219 = vst [vmem:[#allocation138_spill] sm:$0xff] %v9745_v19 }
 0x1e5   :  { %v9741_v54 = vpack.c.bf16 %v310_v62, %v307_v45  ;;  %v459_v62 = vld [vmem:[%s11784_s9 + $0xc40] sm:$0xff]  ;;  %v9759_v45 = vmul.f32 %v7745_v60, %v9412_v53 }
 0x1e6   :  { %6260 = vmatpush1.bf16.msra.mxu1 %v9683_v63 }
 0x1e7   :  { %6494 = vmatpush3.bf16.msra.mxu0 %v9687_v55  ;;  %6262 = vmatprep.subr.bf16.mxu1 %v9689_v17  ;;  %12218 = vst [vmem:[#allocation137_spill] sm:$0xff] %v9741_v54  ;;  %v313_v17 = vld [vmem:[%s11784_s9 + $0x7b0] sm:$0xff]  ;;  %v316_v55 = vld [vmem:[%s11784_s9 + $0x7c8] sm:$0xff] }
 0x1e8   :  { %6496 = vmatprep.subr.bf16.mxu0 %v9701_v48  ;;  %v9747_v48 = vpack.c.bf16 %v317_v8, %v314_v14  ;;  %v323_v14 = vld [vmem:[%s11784_s9 + $0x800] sm:$0xff]  ;;  %v9773_v53 = vpack.c.bf16 %v316_v55, %v313_v17  ;;  %v9777_v8 = vpack.c.bf16 %v462_v49, %v459_v62  ;;  %v12225_v55 = vmov 0  ;;  %v326_v62 = vld [vmem:[%s11784_s9 + $0x818] sm:$0xff]  ;;  %v329_v49 = vld [vmem:[%s11784_s9 + $0x830] sm:$0xff] }
 0x1e9   :  { %v9779_v60 = vpack.c.bf16 %v323_v14, %v320_v6  ;;  %v12226_v55 = vsel %vm9789_vm12, 4294967295, %v12225_v55  ;;  %v12228_v17 = vmov 0.0  }
 0x1ea   :  { %6264 = vmatpush1.bf16.msra.mxu1 %v9713_v9  ;;  %12220 = vst [vmem:[#allocation139_spill] sm:$0xff] %v9747_v48  ;;  %12222 = vst [vmem:[#allocation140_spill] sm:$0xff] %v9773_v53  ;;  %v322_v9 = vld [vmem:[%s11784_s9 + $0x7f8] sm:$0xff] }
 0x1eb   :  { %6498 = vmatpush3.bf16.msra.mxu0 %v9717_v34  ;;  %6266 = vmatprep.subr.bf16.mxu1 %v9719_v37  ;;  %v12221_v37 = vmov 0.0|0.0   ;;  %12223 = vst [vmem:[#allocation141_spill] sm:$0xff] %v9777_v8  ;;  %12224 = vst [vmem:[#allocation142_spill] sm:$0xff] %v9779_v60  ;;  %v319_v34 = vld [vmem:[%s11784_s9 + $0x7e0] sm:$0xff] }
 0x1ec   :  { %6499 = vmatprep.subr.bf16.mxu0 %v12221_v37  ;;  %12227 = vst [vmem:[#allocation143_spill] sm:$0xff] %v12226_v55  ;;  %v7747_v6 = vpop.eup %7746  ;;  %v9802_v14 = vpack.c.bf16 %v322_v9, %v319_v34  ;;  %v332_v34 = vld [vmem:[%s11784_s9 + $0x848] sm:$0xff] }
 0x1ed   :  { %v9817_v9 = vmul.f32 %v7747_v6, %v9497_v4  ;;  %v331_v4 = vld [vmem:[%s11784_s9 + $0x840] sm:$0xff]  ;;  %v334_v6 = vld [vmem:[%s11784_s9 + $0x858] sm:$0xff] }
 0x1ee   :  { %1981 = vmatmul.mubr.f32.vlgmr.msra.gmra.mrb[12].mxu0 %v9759_v45  ;;  %6268 = vmatpush1.bf16.msra.mxu1 %v9741_v54  ;;  %12229 = vst [vmem:[#allocation144_spill] sm:$0xff] %v9802_v14  ;;  %v328_v54 = vld [vmem:[%s11784_s9 + $0x828] sm:$0xff] }
 0x1ef   :  { %6501 = vmatpush3.bf16.msra.mxu0 %v9745_v19  ;;  %6270 = vmatprep.subr.bf16.mxu1 %v9747_v48  ;;  %v9808_v48 = vpack.c.bf16 %v329_v49, %v326_v62  ;;  %v325_v19 = vld [vmem:[%s11784_s9 + $0x810] sm:$0xff]  ;;  %v335_v62 = vld [vmem:[%s11784_s9 + $0x860] sm:$0xff] }
 0x1f0   :  { %6502 = vmatprep.subr.bf16.mxu0 %v12221_v37  ;;  %5872 = vmatprep.mubr.msk.f32.mxu0 %vm7901_vm9, %v12228_v17  ;;  %v9828_v49 = vpack.c.bf16 %v328_v54, %v325_v19  ;;  %v341_v54 = vld [vmem:[%s11784_s9 + $0x890] sm:$0xff]  ;;  %v9847_v19 = vpack.c.bf16 %v334_v6, %v331_v4  ;;  %v347_v4 = vld [vmem:[%s11784_s9 + $0x8c0] sm:$0xff] }
 0x1f1   :  { %12230 = vst [vmem:[#allocation145_spill] sm:$0xff] %v9808_v48 }
 0x1f2   :  { %6272 = vmatpush1.bf16.msra.mxu1 %v9773_v53  ;;  %12231 = vst [vmem:[#allocation146_spill] sm:$0xff] %v9828_v49  ;;  %12233 = vst [vmem:[#allocation148_spill] sm:$0xff] %v9847_v19 }
 0x1f3   :  { %6505 = vmatpush3.bf16.msk.msra.mxu0 %vm9789_vm12, %v9777_v8  ;;  %6274 = vmatprep.subr.bf16.mxu1 %v9779_v60  ;;  %v9831_v60 = vpack.c.bf16 %v335_v62, %v332_v34  ;;  %v337_v62 = vld [vmem:[%s11784_s9 + $0x870] sm:$0xff]  ;;  %v344_v8 = vld [vmem:[%s11784_s9 + $0x8a8] sm:$0xff] }
 0x1f4   :  { %v9868_v6 = vpack.c.bf16 %v347_v4, %v344_v8  ;;  %v349_v4 = vld [vmem:[%s11784_s9 + $0x8d0] sm:$0xff] }
 0x1f5   :  { %12232 = vst [vmem:[#allocation147_spill] sm:$0xff] %v9831_v60 }
 0x1f6   :  { %5873 = vmatmul.mubr.msk.f32.vlgmr.msra.gmra.mrb[14].mxu0 %vm1337_vm13, %v9817_v9  ;;  %6276 = vmatpush1.bf16.msra.mxu1 %v9802_v14  ;;  %v338_v14 = vld [vmem:[%s11784_s9 + $0x878] sm:$0xff]  ;;  %12236 = vst [vmem:[#allocation151_spill] sm:$0xff] %v9868_v6 }
 0x1f7   :  { %6278 = vmatprep.subr.bf16.mxu1 %v9808_v48  ;;  %2232 = vmatprep.mubr.f32.mxu0 %v12228_v17  ;;  %v9850_v34 = vpack.c.bf16 %v341_v54, %v338_v14  ;;  %v340_v48 = vld [vmem:[%s11784_s9 + $0x888] sm:$0xff]  ;;  %v343_v54 = vld [vmem:[%s11784_s9 + $0x8a0] sm:$0xff] }
 0x1f8   :  { %v9865_v14 = vpack.c.bf16 %v340_v48, %v337_v62  ;;  %v353_v48 = vld [vmem:[%s11784_s9 + $0x8f0] sm:$0xff] }
 0x1f9   :  { %12234 = vst [vmem:[#allocation149_spill] sm:$0xff] %v9850_v34 }
 0x1fa   :  { %6280 = vmatpush1.bf16.msra.mxu1 %v9828_v49  ;;  %12235 = vst [vmem:[#allocation150_spill] sm:$0xff] %v9865_v14  ;;  %v350_v49 = vld [vmem:[%s11784_s9 + $0x8d8] sm:$0xff] }
 0x1fb   :  { %6282 = vmatprep.subr.bf16.mxu1 %v9831_v60  ;;  %v346_v60 = vld [vmem:[%s11784_s9 + $0x8b8] sm:$0xff]  ;;  %v9886_v62 = vpack.c.bf16 %v353_v48, %v350_v49  ;;  %v355_v48 = vld [vmem:[%s11784_s9 + $0x900] sm:$0xff] }
 0x1fc   :  { %v9883_v8 = vpack.c.bf16 %v346_v60, %v343_v54  ;;  %v359_v60 = vld [vmem:[%s11784_s9 + $0x920] sm:$0xff] }
 0x1fd   :  { %12238 = vst [vmem:[#allocation153_spill] sm:$0xff] %v9886_v62 }
 0x1fe   :  { %6284 = vmatpush1.bf16.msra.mxu1 %v9847_v19  ;;  %12237 = vst [vmem:[#allocation152_spill] sm:$0xff] %v9883_v8  ;;  %v356_v19 = vld [vmem:[%s11784_s9 + $0x908] sm:$0xff] }
 0x1ff   :  { %6286 = vmatprep.subr.bf16.mxu1 %v9850_v34  ;;  %v352_v34 = vld [vmem:[%s11784_s9 + $0x8e8] sm:$0xff]  ;;  %v9904_v54 = vpack.c.bf16 %v359_v60, %v356_v19  ;;  %v361_v60 = vld [vmem:[%s11784_s9 + $0x930] sm:$0xff] }
 0x200   :  { %v9901_v49 = vpack.c.bf16 %v352_v34, %v349_v4  ;;  %v365_v34 = vld [vmem:[%s11784_s9 + $0x950] sm:$0xff] }
 0x201   :  { %12240 = vst [vmem:[#allocation155_spill] sm:$0xff] %v9904_v54 }
 0x202   :  { %6288 = vmatpush1.bf16.msra.mxu1 %v9865_v14  ;;  %12239 = vst [vmem:[#allocation154_spill] sm:$0xff] %v9901_v49  ;;  %v362_v14 = vld [vmem:[%s11784_s9 + $0x938] sm:$0xff] }
 0x203   :  { %6290 = vmatprep.subr.bf16.mxu1 %v9868_v6  ;;  %v358_v6 = vld [vmem:[%s11784_s9 + $0x918] sm:$0xff]  ;;  %v9922_v4 = vpack.c.bf16 %v365_v34, %v362_v14  ;;  %v367_v34 = vld [vmem:[%s11784_s9 + $0x960] sm:$0xff] }
 0x204   :  { %v9919_v19 = vpack.c.bf16 %v358_v6, %v355_v48  ;;  %v371_v6 = vld [vmem:[%s11784_s9 + $0x980] sm:$0xff] }
 0x205   :  { %12242 = vst [vmem:[#allocation157_spill] sm:$0xff] %v9922_v4 }
 0x206   :  { %6292 = vmatpush1.bf16.msra.mxu1 %v9883_v8  ;;  %12241 = vst [vmem:[#allocation156_spill] sm:$0xff] %v9919_v19  ;;  %v368_v8 = vld [vmem:[%s11784_s9 + $0x968] sm:$0xff] }
 0x207   :  { %6294 = vmatprep.subr.bf16.mxu1 %v9886_v62  ;;  %v364_v62 = vld [vmem:[%s11784_s9 + $0x948] sm:$0xff]  ;;  %v9942_v48 = vpack.c.bf16 %v371_v6, %v368_v8 }
 0x208   :  { %v9939_v14 = vpack.c.bf16 %v364_v62, %v361_v60  ;;  %v373_v60 = vld [vmem:[%s11784_s9 + $0x990] sm:$0xff]  ;;  %v376_v6 = vld [vmem:[%s11784_s9 + $0x9a8] sm:$0xff] }
 0x209   :  { %12244 = vst [vmem:[#allocation159_spill] sm:$0xff] %v9942_v48 }
 0x20a   :  { %6296 = vmatpush1.bf16.msra.mxu1 %v9901_v49  ;;  %12243 = vst [vmem:[#allocation158_spill] sm:$0xff] %v9939_v14 }
 0x20b   :  { %6298 = vmatprep.subr.bf16.mxu1 %v9904_v54  ;;  %v370_v54 = vld [vmem:[%s11784_s9 + $0x978] sm:$0xff] }
 0x20c   :  { %v9957_v8 = vpack.c.bf16 %v370_v54, %v367_v34  ;;  %v383_v54 = vld [vmem:[%s11784_s9 + $0x9e0] sm:$0xff]  ;;  %v9975_v34 = vpack.c.bf16 %v376_v6, %v373_v60  ;;  %v389_v60 = vld [vmem:[%s11784_s9 + $0xa10] sm:$0xff] }
 0x20d   :  { %1558 = vmatmul.mubr.f32.vlgmr.msra.gmra.mrb[4].mxu1 %v9456_v11  ;;  %v374_v11 = vld [vmem:[%s11784_s9 + $0x998] sm:$0xff] }
 0x20e   :  { %6300 = vmatpush1.bf16.msra.mxu1 %v9919_v19  ;;  %1628 = vmatprep.mubr.f32.mxu1 %v9485_v30  ;;  %v377_v30 = vld [vmem:[%s11784_s9 + $0x9b0] sm:$0xff]  ;;  %12245 = vst [vmem:[#allocation160_spill] sm:$0xff] %v9957_v8  ;;  %12247 = vst [vmem:[#allocation162_spill] sm:$0xff] %v9975_v34 }
 0x20f   :  { %6302 = vmatprep.subr.bf16.mxu1 %v9922_v4  ;;  %v9960_v62 = vpack.c.bf16 %v377_v30, %v374_v11  ;;  %v380_v4 = vld [vmem:[%s11784_s9 + $0x9c8] sm:$0xff]  ;;  %v379_v30 = vld [vmem:[%s11784_s9 + $0x9c0] sm:$0xff] }
 0x210   :  { %v9978_v11 = vpack.c.bf16 %v383_v54, %v380_v4  ;;  %v385_v54 = vld [vmem:[%s11784_s9 + $0x9f0] sm:$0xff] }
 0x211   :  { %12246 = vst [vmem:[#allocation161_spill] sm:$0xff] %v9960_v62 }
 0x212   :  { %6304 = vmatpush1.bf16.msra.mxu1 %v9939_v14  ;;  %12248 = vst [vmem:[#allocation163_spill] sm:$0xff] %v9978_v11  ;;  %v386_v14 = vld [vmem:[%s11784_s9 + $0x9f8] sm:$0xff] }
 0x213   :  { %6306 = vmatprep.subr.bf16.mxu1 %v9942_v48  ;;  %v382_v48 = vld [vmem:[%s11784_s9 + $0x9d8] sm:$0xff]  ;;  %v9996_v6 = vpack.c.bf16 %v389_v60, %v386_v14  ;;  %v391_v60 = vld [vmem:[%s11784_s9 + $0xa20] sm:$0xff] }
 0x214   :  { %v9993_v4 = vpack.c.bf16 %v382_v48, %v379_v30  ;;  %v395_v48 = vld [vmem:[%s11784_s9 + $0xa40] sm:$0xff] }
 0x215   :  { %12250 = vst [vmem:[#allocation165_spill] sm:$0xff] %v9996_v6 }
 0x216   :  { %6308 = vmatpush1.bf16.msra.mxu1 %v9957_v8  ;;  %12249 = vst [vmem:[#allocation164_spill] sm:$0xff] %v9993_v4  ;;  %v392_v8 = vld [vmem:[%s11784_s9 + $0xa28] sm:$0xff] }
 0x217   :  { %6310 = vmatprep.subr.bf16.mxu1 %v9960_v62  ;;  %v388_v62 = vld [vmem:[%s11784_s9 + $0xa08] sm:$0xff]  ;;  %v10014_v30 = vpack.c.bf16 %v395_v48, %v392_v8  ;;  %v397_v48 = vld [vmem:[%s11784_s9 + $0xa50] sm:$0xff] }
 0x218   :  { %v10011_v14 = vpack.c.bf16 %v388_v62, %v385_v54  ;;  %v401_v62 = vld [vmem:[%s11784_s9 + $0xa70] sm:$0xff] }
 0x219   :  { %12252 = vst [vmem:[#allocation167_spill] sm:$0xff] %v10014_v30 }
 0x21a   :  { %6312 = vmatpush1.bf16.msra.mxu1 %v9975_v34  ;;  %12251 = vst [vmem:[#allocation166_spill] sm:$0xff] %v10011_v14  ;;  %v398_v34 = vld [vmem:[%s11784_s9 + $0xa58] sm:$0xff] }
 0x21b   :  { %6314 = vmatprep.subr.bf16.mxu1 %v9978_v11  ;;  %v394_v11 = vld [vmem:[%s11784_s9 + $0xa38] sm:$0xff]  ;;  %v10032_v54 = vpack.c.bf16 %v401_v62, %v398_v34  ;;  %v403_v62 = vld [vmem:[%s11784_s9 + $0xa80] sm:$0xff] }
 0x21c   :  { %v10029_v8 = vpack.c.bf16 %v394_v11, %v391_v60  ;;  %v407_v11 = vld [vmem:[%s11784_s9 + $0xaa0] sm:$0xff] }
 0x21d   :  { %12254 = vst [vmem:[#allocation169_spill] sm:$0xff] %v10032_v54 }
 0x21e   :  { %6316 = vmatpush1.bf16.msra.mxu1 %v9993_v4  ;;  %12253 = vst [vmem:[#allocation168_spill] sm:$0xff] %v10029_v8  ;;  %v404_v4 = vld [vmem:[%s11784_s9 + $0xa88] sm:$0xff] }
 0x21f   :  { %6318 = vmatprep.subr.bf16.mxu1 %v9996_v6  ;;  %v400_v6 = vld [vmem:[%s11784_s9 + $0xa68] sm:$0xff]  ;;  %v10050_v60 = vpack.c.bf16 %v407_v11, %v404_v4  ;;  %v409_v11 = vld [vmem:[%s11784_s9 + $0xab0] sm:$0xff] }
 0x220   :  { %v10047_v34 = vpack.c.bf16 %v400_v6, %v397_v48  ;;  %v413_v6 = vld [vmem:[%s11784_s9 + $0xad0] sm:$0xff] }
 0x221   :  { %12256 = vst [vmem:[#allocation171_spill] sm:$0xff] %v10050_v60 }
 0x222   :  { %6320 = vmatpush1.bf16.msra.mxu1 %v10011_v14  ;;  %12255 = vst [vmem:[#allocation170_spill] sm:$0xff] %v10047_v34  ;;  %v410_v14 = vld [vmem:[%s11784_s9 + $0xab8] sm:$0xff] }
 0x223   :  { %6322 = vmatprep.subr.bf16.mxu1 %v10014_v30  ;;  %v406_v30 = vld [vmem:[%s11784_s9 + $0xa98] sm:$0xff]  ;;  %v10068_v48 = vpack.c.bf16 %v413_v6, %v410_v14  ;;  %v415_v6 = vld [vmem:[%s11784_s9 + $0xae0] sm:$0xff] }
 0x224   :  { %v10065_v4 = vpack.c.bf16 %v406_v30, %v403_v62  ;;  %v419_v30 = vld [vmem:[%s11784_s9 + $0xb00] sm:$0xff] }
 0x225   :  { %12258 = vst [vmem:[#allocation173_spill] sm:$0xff] %v10068_v48 }
 0x226   :  { %6324 = vmatpush1.bf16.msra.mxu1 %v10029_v8  ;;  %12257 = vst [vmem:[#allocation172_spill] sm:$0xff] %v10065_v4  ;;  %v416_v8 = vld [vmem:[%s11784_s9 + $0xae8] sm:$0xff] }
 0x227   :  { %6326 = vmatprep.subr.bf16.mxu1 %v10032_v54  ;;  %v412_v54 = vld [vmem:[%s11784_s9 + $0xac8] sm:$0xff]  ;;  %v10086_v62 = vpack.c.bf16 %v419_v30, %v416_v8  ;;  %v421_v30 = vld [vmem:[%s11784_s9 + $0xb10] sm:$0xff] }
 0x228   :  { %v10083_v14 = vpack.c.bf16 %v412_v54, %v409_v11  ;;  %v425_v54 = vld [vmem:[%s11784_s9 + $0xb30] sm:$0xff] }
 0x229   :  { %12260 = vst [vmem:[#allocation175_spill] sm:$0xff] %v10086_v62 }
 0x22a   :  { %6328 = vmatpush1.bf16.msra.mxu1 %v10047_v34  ;;  %12259 = vst [vmem:[#allocation174_spill] sm:$0xff] %v10083_v14  ;;  %v422_v34 = vld [vmem:[%s11784_s9 + $0xb18] sm:$0xff] }
 0x22b   :  { %6330 = vmatprep.subr.bf16.mxu1 %v10050_v60  ;;  %v418_v60 = vld [vmem:[%s11784_s9 + $0xaf8] sm:$0xff]  ;;  %v10104_v11 = vpack.c.bf16 %v425_v54, %v422_v34  ;;  %v427_v54 = vld [vmem:[%s11784_s9 + $0xb40] sm:$0xff] }
 0x22c   :  { %v10101_v8 = vpack.c.bf16 %v418_v60, %v415_v6  ;;  %v431_v60 = vld [vmem:[%s11784_s9 + $0xb60] sm:$0xff] }
 0x22d   :  { %12262 = vst [vmem:[#allocation177_spill] sm:$0xff] %v10104_v11 }
 0x22e   :  { %6332 = vmatpush1.bf16.msra.mxu1 %v10065_v4  ;;  %12261 = vst [vmem:[#allocation176_spill] sm:$0xff] %v10101_v8  ;;  %v428_v4 = vld [vmem:[%s11784_s9 + $0xb48] sm:$0xff] }
 0x22f   :  { %6334 = vmatprep.subr.bf16.mxu1 %v10068_v48  ;;  %v424_v48 = vld [vmem:[%s11784_s9 + $0xb28] sm:$0xff]  ;;  %v10122_v6 = vpack.c.bf16 %v431_v60, %v428_v4  ;;  %v433_v60 = vld [vmem:[%s11784_s9 + $0xb70] sm:$0xff] }
 0x230   :  { %v10119_v34 = vpack.c.bf16 %v424_v48, %v421_v30  ;;  %v437_v48 = vld [vmem:[%s11784_s9 + $0xb90] sm:$0xff] }
 0x231   :  { %12264 = vst [vmem:[#allocation179_spill] sm:$0xff] %v10122_v6 }
 0x232   :  { %6336 = vmatpush1.bf16.msra.mxu1 %v10083_v14  ;;  %12263 = vst [vmem:[#allocation178_spill] sm:$0xff] %v10119_v34  ;;  %v434_v14 = vld [vmem:[%s11784_s9 + $0xb78] sm:$0xff] }
 0x233   :  { %6338 = vmatprep.subr.bf16.mxu1 %v10086_v62  ;;  %v430_v62 = vld [vmem:[%s11784_s9 + $0xb58] sm:$0xff]  ;;  %v10140_v30 = vpack.c.bf16 %v437_v48, %v434_v14  ;;  %v439_v48 = vld [vmem:[%s11784_s9 + $0xba0] sm:$0xff] }
 0x234   :  { %v10137_v4 = vpack.c.bf16 %v430_v62, %v427_v54  ;;  %v443_v62 = vld [vmem:[%s11784_s9 + $0xbc0] sm:$0xff] }
 0x235   :  { %12266 = vst [vmem:[#allocation181_spill] sm:$0xff] %v10140_v30 }
 0x236   :  { %6340 = vmatpush1.bf16.msra.mxu1 %v10101_v8  ;;  %12265 = vst [vmem:[#allocation180_spill] sm:$0xff] %v10137_v4  ;;  %v440_v8 = vld [vmem:[%s11784_s9 + $0xba8] sm:$0xff] }
 0x237   :  { %6342 = vmatprep.subr.bf16.mxu1 %v10104_v11  ;;  %v436_v11 = vld [vmem:[%s11784_s9 + $0xb88] sm:$0xff]  ;;  %v10158_v54 = vpack.c.bf16 %v443_v62, %v440_v8  ;;  %v445_v62 = vld [vmem:[%s11784_s9 + $0xbd0] sm:$0xff] }
 0x238   :  { %v10155_v14 = vpack.c.bf16 %v436_v11, %v433_v60  ;;  %v449_v11 = vld [vmem:[%s11784_s9 + $0xbf0] sm:$0xff] }
 0x239   :  { %12268 = vst [vmem:[#allocation183_spill] sm:$0xff] %v10158_v54 }
 0x23a   :  { %6344 = vmatpush1.bf16.msra.mxu1 %v10119_v34  ;;  %12267 = vst [vmem:[#allocation182_spill] sm:$0xff] %v10155_v14  ;;  %v446_v34 = vld [vmem:[%s11784_s9 + $0xbd8] sm:$0xff] }
 0x23b   :  { %6346 = vmatprep.subr.bf16.mxu1 %v10122_v6  ;;  %v442_v6 = vld [vmem:[%s11784_s9 + $0xbb8] sm:$0xff]  ;;  %v10176_v60 = vpack.c.bf16 %v449_v11, %v446_v34  ;;  %v451_v11 = vld [vmem:[%s11784_s9 + $0xc00] sm:$0xff] }
 0x23c   :  { %v10173_v8 = vpack.c.bf16 %v442_v6, %v439_v48  ;;  %v455_v6 = vld [vmem:[%s11784_s9 + $0xc20] sm:$0xff] }
 0x23d   :  { %12270 = vst [vmem:[#allocation185_spill] sm:$0xff] %v10176_v60 }
 0x23e   :  { %6348 = vmatpush1.bf16.msra.mxu1 %v10137_v4  ;;  %12269 = vst [vmem:[#allocation184_spill] sm:$0xff] %v10173_v8  ;;  %v452_v4 = vld [vmem:[%s11784_s9 + $0xc08] sm:$0xff] }
 0x23f   :  { %6350 = vmatprep.subr.bf16.mxu1 %v10140_v30  ;;  %v448_v30 = vld [vmem:[%s11784_s9 + $0xbe8] sm:$0xff]  ;;  %v10194_v48 = vpack.c.bf16 %v455_v6, %v452_v4  ;;  %v457_v6 = vld [vmem:[%s11784_s9 + $0xc30] sm:$0xff] }
 0x240   :  { %v10191_v34 = vpack.c.bf16 %v448_v30, %v445_v62  ;;  %v461_v30 = vld [vmem:[%s11784_s9 + $0xc50] sm:$0x7] }
 0x241   :  { %12272 = vst [vmem:[#allocation187_spill] sm:$0xff] %v10194_v48 }
 0x242   :  { %6352 = vmatpush1.bf16.msra.mxu1 %v10155_v14  ;;  %12271 = vst [vmem:[#allocation186_spill] sm:$0xff] %v10191_v34  ;;  %v458_v14 = vld [vmem:[%s11784_s9 + $0xc38] sm:$0xff] }
 0x243   :  { %6354 = vmatprep.subr.bf16.mxu1 %v10158_v54  ;;  %v454_v54 = vld [vmem:[%s11784_s9 + $0xc18] sm:$0xff]  ;;  %v10212_v62 = vpack.c.bf16 %v461_v30, %v458_v14 }
 0x244   :  { %v10209_v4 = vpack.c.bf16 %v454_v54, %v451_v11 }
 0x245   :  { %12274 = vst [vmem:[#allocation189_spill] sm:$0xff] %v10212_v62 }
 0x246   :  { %6356 = vmatpush1.bf16.msra.mxu1 %v10173_v8  ;;  %12273 = vst [vmem:[#allocation188_spill] sm:$0xff] %v10209_v4 }
 0x247   :  { %6358 = vmatprep.subr.bf16.mxu1 %v10176_v60  ;;  %v460_v60 = vld [vmem:[%s11784_s9 + $0xc48] sm:$0x7]  ;;  %s7903_s9 = smov 109  }
 0x248   :  { %v10222_v8 = vpack.c.bf16 %v460_v60, %v457_v6 }
 0x24a   :  { %6360 = vmatpush1.bf16.msra.mxu1 %v10191_v34  ;;  %12275 = vst [vmem:[#allocation190_spill] sm:$0xff] %v10222_v8 }
 0x24b   :  { %6362 = vmatprep.subr.bf16.mxu1 %v10194_v48 }
 0x24d   :  { %1629 = vmatmul.mubr.f32.vlgmr.msra.gmra.mrb[4].mxu1 %v9759_v45 }
 0x24e   :  { %6364 = vmatpush1.bf16.msra.mxu1 %v10209_v4  ;;  %1699 = vmatprep.mubr.f32.mxu1 %v12228_v17 }
 0x24f   :  { %6367 = vmatprep.subr.msk.bf16.mxu1 %vm9789_vm12, %v10212_v62 }
 0x252   :  { %6370 = vmatpush1.bf16.msk.msra.mxu1 %vm9789_vm12, %v10222_v8 }
 0x255   :  { %5292 = vmatmul.mubr.msk.f32.vlgmr.msra.gmra.mrb[4].mxu1 %vm1337_vm13, %v9817_v9 }
 0x260   :  { %v5433_v14 = vpop.f32.mrb[6].mxu0 }
 0x261   :  { %v5434_v54 = vpop.f32.mrb[7].mxu0 }
 0x262   :  { %v5435_v45 = vadd.f32 %v5434_v54, %v5433_v14 }
 0x280   :  { %v5468_v11 = vpop.f32.mrb[8].mxu0 }
 0x281   :  { %v5469_v30 = vpop.f32.mrb[9].mxu0 }
 0x282   :  { %v5470_v60 = vadd.f32 %v5469_v30, %v5468_v11 }
 0x284   :  { %v1843_v6 = vadd.f32 %v5470_v60, %v5435_v45 }
 0x2a0   :  { %v5503_v4 = vpop.f32.mrb[10].mxu0 }
 0x2a1   :  { %v5504_v48 = vpop.f32.mrb[11].mxu0 }
 0x2a2   :  { %v5505_v34 = vadd.f32 %v5504_v48, %v5503_v4 }
 0x2a4   :  { %v1913_v19 = vadd.f32 %v5505_v34, %v1843_v6 }
 0x2c1   :  { %v5538_v49 = vpop.f32.mrb[12].mxu0 }
 0x2c2   :  { %v5539_v62 = vpop.f32.mrb[13].mxu0 }
 0x2c3   :  { %v5540_v53 = vadd.f32 %v5539_v62, %v5538_v49 }
 0x2c5   :  { %v1983_v63 = vadd.f32 %v5540_v53, %v1913_v19 }
 0x2c9   :  { %v2052_v0 = vpop.f32.mrb[14].mxu0 }
 0x2ca   :  { %v10233_v8 = vadd.f32 %v2052_v0, %v1983_v63  ;;  %v5874_v43 = vpop.f32.mrb[15].mxu0  ;;  %v51_v63 = vld [vmem:[%s11785_s4] sm:$0xff] }
 0x2cb   :  { %v52_v43 = vld [vmem:[%s11785_s4 + $0x8] sm:$0xff]  ;;  %s11993_s4 = smov 118  }
 0x328   :  { %v1701_v9 = vpop.f32.mrb[4].mxu1 }
 0x329   :  { %2070 = vrot.lane.b32.xlu0 %v1701_v9, %s7890_s17  ;;  %2059 = vrot.lane.b32.xlu1 %v1701_v9, %s7891_s18  ;;  %v1703_v14 = vpop.f32.mrb[5].mxu1 }
 0x32a   :  { %v7417_v0 = vpack.i.bf16 %v10233_v8, %v1703_v14 }
 0x32d   :  { %2093 = vrot.lane.b32.xlu0 %v1701_v9, %s7903_s9  ;;  %2081 = vrot.lane.b32.xlu1 %v1701_v9, %s7904_s16 }
 0x331   :  { %2117 = vrot.lane.b32.xlu0 %v1701_v9, %s7893_s22  ;;  %2105 = vrot.lane.b32.xlu1 %v1701_v9, %s7905_s2 }
 0x335   :  { %7418 = vrot.lane.b32.xlu0 %v7417_v0, %s7890_s17  ;;  %7413 = vrot.lane.b32.xlu1 %v7417_v0, %s7891_s18 }
 0x339   :  { %7428 = vrot.lane.b32.xlu0 %v7417_v0, %s7903_s9  ;;  %7423 = vrot.lane.b32.xlu1 %v7417_v0, %s7904_s16 }
 0x33d   :  { %7438 = vrot.lane.b32.xlu0 %v7417_v0, %s7893_s22  ;;  %7433 = vrot.lane.b32.xlu1 %v7417_v0, %s7905_s2 }
 0x341   :  { %2142 = vrot.lane.b32.xlu0 %v1703_v14, %s7906_s19  ;;  %7443 = vrot.lane.b32.xlu1 %v7417_v0, %s7907_s20 }
 0x345   :  { %2140 = vrot.lane.b32.xlu0 %v1701_v9, %s7906_s19  ;;  %2128 = vrot.lane.b32.xlu1 %v1701_v9, %s7907_s20 }
 0x349   :  { %2159 = vperm.xlu0 %7411, %v52_v43   ;;  %2144 = vrot.lane.b32.xlu1 %v10233_v8, %s7906_s19 }
 0x34d   :  { %2154 = vperm.xlu1 %7447, %v51_v63  }
 0x39b   :  { %v2071_v53 = vpop.permute.xlu0 %2070  ;;  %v2060_v49 = vpop.permute.xlu1 %2059 }
 0x39f   :  { %v2094_v19 = vpop.permute.xlu0 %2093  ;;  %v2082_v34 = vpop.permute.xlu1 %2081 }
 0x3a3   :  { %v2118_v48 = vpop.permute.xlu0 %2117  ;;  %v2106_v4 = vpop.permute.xlu1 %2105 }
 0x3a7   :  { %v10260_v62 = vpop.permute.xlu0 %7418  ;;  %v10262_v54 = vpop.permute.xlu1 %7413 }
 0x3a8   :  { %v11972_v45 = vunpack.i.h.bf16 %v10262_v54  ;;  %v7415_v11 = vunpack.i.l.bf16 %v10262_v54  ;;  %v7420_v60 = vunpack.i.l.bf16 %v10260_v62 }
 0x3aa   :  { %v2065_v6 = vsel %vm641_vm0, %v2060_v49, %v7415_v11  ;;  %v2066_v0 = vsel %vm641_vm0, %v7415_v11, %v11972_v45  ;;  %v2076_v49 = vsel %vm677_vm2, %v2071_v53, %v7420_v60  ;;  %v12276_v11 = vunpack.i.h.bf16 %v10260_v62 }
 0x3ab   :  { %v10272_v43 = vpop.permute.xlu0 %7428  ;;  %v7424_v63 = vpop.permute.xlu1 %7423  ;;  %v6506_v36 = vpack.c.bf16 %v2066_v0, %v1703_v14  ;;  %v6508_v28 = vpack.c.bf16 %v2065_v6, %v1701_v9 }
 0x3ac   :  { %v7426_v13 = vunpack.i.h.bf16 %v7424_v63  ;;  %v7425_v32 = vunpack.i.l.bf16 %v7424_v63  ;;  %v7431_v51 = vunpack.i.h.bf16 %v10272_v43  ;;  %v7430_v30 = vunpack.i.l.bf16 %v10272_v43 }
 0x3ad   :  { %6507 = vmatprep.subr.bf16.mxu0 %v6506_v36  ;;  %v2077_v45 = vsel %vm677_vm2, %v7420_v60, %v12276_v11 }
 0x3ae   :  { %v2088_v57 = vsel %vm11976_vm14, %v2082_v34, %v7425_v32  ;;  %6509 = vmatpush1.bf16.msra.mxu0 %v6508_v28  ;;  %v2089_v14 = vsel %vm11976_vm14, %v7425_v32, %v7426_v13  ;;  %v2100_v36 = vsel %vm11977_vm15, %v2094_v19, %v7430_v30  ;;  %v2101_v53 = vsel %vm11977_vm15, %v7430_v30, %v7431_v51 }
 0x3af   :  { %v7439_v9 = vpop.permute.xlu0 %7438  ;;  %v7434_v6 = vpop.permute.xlu1 %7433  ;;  %v6510_v0 = vpack.c.bf16 %v2089_v14, %v2077_v45  ;;  %v6512_v63 = vpack.c.bf16 %v2088_v57, %v2076_v49  ;;  %vm12025_vm14 = vcmask 744448   ;;  %vm11991_vm15 = vcmask 736256  }
 0x3b0   :  { %v7436_v44 = vunpack.i.h.bf16 %v7434_v6  ;;  %v7435_v23 = vunpack.i.l.bf16 %v7434_v6  ;;  %v7441_v34 = vunpack.i.h.bf16 %v7439_v9  ;;  %v7440_v28 = vunpack.i.l.bf16 %v7439_v9 }
 0x3b1   :  { %6511 = vmatprep.subr.bf16.mxu0 %v6510_v0 }
 0x3b2   :  { %v2112_v43 = vsel %vm12026_vm10, %v2106_v4, %v7435_v23  ;;  %6513 = vmatpush1.bf16.msra.mxu0 %v6512_v63  ;;  %v2113_v60 = vsel %vm12026_vm10, %v7435_v23, %v7436_v44  ;;  %v2124_v19 = vsel %vm785_vm3, %v7440_v28, %v7441_v34  ;;  %v2123_v4 = vsel %vm785_vm3, %v2118_v48, %v7440_v28 }
 0x3b3   :  { %v7444_v32 = vpop.permute.xlu1 %7443  ;;  %v6514_v11 = vpack.c.bf16 %v2113_v60, %v2101_v53  ;;  %v6516_v21 = vpack.c.bf16 %v2112_v43, %v2100_v36  ;;  %v2143_v49 = vpop.permute.xlu0 %2142  ;;  %v12277_v48 = vunpack.i.h.bf16 %v10262_v54  ;;  %v12278_v43 = vunpack.i.h.bf16 %v10260_v62  ;;  %v463_v62 = vld [vmem:[%s11787_s10] sm:$0xff]  ;;  %v464_v54 = vld [vmem:[%s11787_s10 + $0x8] sm:$0xff] }
 0x3b4   :  { %v7446_v45 = vunpack.i.h.bf16 %v7444_v32  ;;  %v7445_v57 = vunpack.i.l.bf16 %v7444_v32  ;;  %v50_v32 = vld [vmem:[%s11786_s3 + $0x8] sm:$0xff] }
 0x3b5   :  { %6515 = vmatprep.subr.bf16.mxu0 %v6514_v11  ;;  %v6522_v28 = vpack.c.bf16 %v12277_v48, %v10233_v8  ;;  %v6526_v60 = vpack.c.bf16 %v7426_v13, %v12278_v43  ;;  %v6530_v11 = vpack.c.bf16 %v7436_v44, %v7431_v51  ;;  %v479_v13 = vld [vmem:[%s11787_s10 + $0x80] sm:$0xff]  ;;  %v480_v44 = vld [vmem:[%s11787_s10 + $0x88] sm:$0xff]  ;;  %v469_v48 = vld [vmem:[%s11787_s10 + $0x30] sm:$0xff] }
 0x3b6   :  { %6517 = vmatpush1.bf16.msra.mxu0 %v6516_v21  ;;  %v2136_v30 = vsel %vm12025_vm14, %v7445_v57, %v7446_v45  ;;  %v49_v21 = vld [vmem:[%s11786_s3] sm:$0xff]  ;;  %v6534_v8 = vpack.c.bf16 %v7446_v45, %v7441_v34  ;;  %v10314_v51 = vpack.c.bf16 %v480_v44, %v479_v13  ;;  %v10322_v34 = vpack.c.bf16 %v464_v54, %v463_v62  ;;  %v481_v45 = vld [vmem:[%s11787_s10 + $0x90] sm:$0xff]  ;;  %v472_v13 = vld [vmem:[%s11787_s10 + $0x48] sm:$0xff] }
 0x3b7   :  { %v2129_v14 = vpop.permute.xlu1 %2128  ;;  %v6518_v9 = vpack.c.bf16 %v2136_v30, %v2124_v19  ;;  %v2141_v0 = vpop.permute.xlu0 %2140  ;;  %v465_v19 = vld [vmem:[%s11787_s10 + $0x10] sm:$0xff]  ;;  %v466_v30 = vld [vmem:[%s11787_s10 + $0x18] sm:$0xff] }
 0x3b8   :  { %v2135_v6 = vsel %vm12025_vm14, %v2129_v14, %v7445_v57  ;;  %v2147_v53 = vsel %vm11991_vm15, %v2141_v0, %v2143_v49  ;;  %12279 = vst [vmem:[#allocation191_spill] sm:$0xff] %v10314_v51  ;;  %12280 = vst [vmem:[#allocation192_spill] sm:$0xff] %v10322_v34  ;;  %v482_v57 = vld [vmem:[%s11787_s10 + $0x98] sm:$0xff]  ;;  %v10340_v14 = vpack.c.bf16 %v466_v30, %v465_v19  ;;  %v468_v0 = vld [vmem:[%s11787_s10 + $0x28] sm:$0xff]  ;;  %vm2685_vm14 = vcmask 1045504  }
 0x3b9   :  { %v6520_v23 = vpack.c.bf16 %v2135_v6, %v2123_v4  ;;  %6519 = vmatprep.subr.bf16.mxu0 %v6518_v9  ;;  %v483_v9 = vld [vmem:[%s11787_s10 + $0xa0] sm:$0xff]  ;;  %v484_v4 = vld [vmem:[%s11787_s10 + $0xa8] sm:$0xff]  ;;  %v489_v62 = vld [vmem:[%s11787_s10 + $0xd0] sm:$0xff] }
 0x3ba   :  { %12282 = vst [vmem:[#allocation194_spill] sm:$0xff] %v10340_v14  ;;  %v10350_v6 = vpack.c.bf16 %v484_v4, %v483_v9  ;;  %v490_v54 = vld [vmem:[%s11787_s10 + $0xd8] sm:$0xff]  ;;  %v491_v9 = vld [vmem:[%s11787_s10 + $0xe0] sm:$0xff]  ;;  %v492_v4 = vld [vmem:[%s11787_s10 + $0xe8] sm:$0xff] }
 0x3bb   :  { %v2145_v63 = vpop.permute.xlu1 %2144  ;;  %6521 = vmatpush1.bf16.msra.mxu0 %v6520_v23  ;;  %v467_v23 = vld [vmem:[%s11787_s10 + $0x20] sm:$0xff]  ;;  %v474_v19 = vld [vmem:[%s11787_s10 + $0x58] sm:$0xff]  ;;  %vm10751_vm10 = vmpackc.low %vm2685_vm14, %vm7902_vm11  ;;  %vm2678_vm11 = vcmask 637952  }
 0x3bc   :  { %v2148_v36 = vsel %vm11991_vm15, %v2143_v49, %v2145_v63  ;;  %v10332_v49 = vpack.c.bf16 %v482_v57, %v481_v45  ;;  %12283 = vst [vmem:[#allocation195_spill] sm:$0xff] %v10350_v6  ;;  %v10404_v45 = vpack.c.bf16 %v490_v54, %v489_v62  ;;  %v473_v57 = vld [vmem:[%s11787_s10 + $0x50] sm:$0xff]  ;;  %v495_v62 = vld [vmem:[%s11787_s10 + $0x100] sm:$0xff]  ;;  %v496_v54 = vld [vmem:[%s11787_s10 + $0x108] sm:$0x7]  ;;  %vm11992_vm15 = vcmask 89088  }
 0x3bd   :  { %2184 = vmatprep.subr.mxu0 %v2148_v36  ;;  %v485_v36 = vld [vmem:[%s11787_s10 + $0xb0] sm:$0xff]  ;;  %v10412_v30 = vpack.c.bf16 %v474_v19, %v473_v57  ;;  %v10458_v57 = vpack.c.bf16 %v496_v54, %v495_v62 }
 0x3be   :  { %12281 = vst [vmem:[#allocation193_spill] sm:$0xff] %v10332_v49  ;;  %12289 = vst [vmem:[#allocation201_spill] sm:$0xff] %v10404_v45 }
 0x3bf   :  { %2185 = vmatpush1.msra.mxu0 %v2147_v53  ;;  %12290 = vst [vmem:[#allocation202_spill] sm:$0xff] %v10412_v30  ;;  %12295 = vst [vmem:[#allocation207_spill] sm:$0xff] %v10458_v57 }
 0x3c0   :  { %5295 = vmatmul.mubr.msk.f32.vlgmr.msra.gmra.mrb[16].mxu0 %vm916_vm8, %v49_v21  ;;  %6523 = vmatprep.subr.bf16.mxu0 %v6522_v28 }
 0x3c1   :  { %6525 = vmatpush3.bf16.msra.mxu0 %v6522_v28  ;;  %2238 = vmatprep.mubr.f32.mxu0 %v12228_v17  ;;  %v470_v28 = vld [vmem:[%s11787_s10 + $0x38] sm:$0xff] }
 0x3c2   :  { %6527 = vmatprep.subr.bf16.mxu0 %v6526_v60  ;;  %v10376_v43 = vpack.c.bf16 %v470_v28, %v469_v48  ;;  %v493_v48 = vld [vmem:[%s11787_s10 + $0xf0] sm:$0xff]  ;;  %v494_v28 = vld [vmem:[%s11787_s10 + $0xf8] sm:$0xff] }
 0x3c4   :  { %5296 = vmatmul.mubr.msk.f32.gmra.mrb[18].mxu0 %vm916_vm8, %v50_v32  ;;  %12286 = vst [vmem:[#allocation198_spill] sm:$0xff] %v10376_v43 }
 0x3c5   :  { %6529 = vmatpush3.bf16.msra.mxu0 %v6526_v60  ;;  %5893 = vmatprep.mubr.msk.f32.mxu0 %vm916_vm8, %v49_v21  ;;  %v486_v21 = vld [vmem:[%s11787_s10 + $0xb8] sm:$0xff]  ;;  %v487_v60 = vld [vmem:[%s11787_s10 + $0xc0] sm:$0xff] }
 0x3c6   :  { %6531 = vmatprep.subr.bf16.mxu0 %v6530_v11  ;;  %v10368_v53 = vpack.c.bf16 %v486_v21, %v485_v36  ;;  %v476_v36 = vld [vmem:[%s11787_s10 + $0x68] sm:$0xff] }
 0x3c8   :  { %12285 = vst [vmem:[#allocation197_spill] sm:$0xff] %v10368_v53 }
 0x3c9   :  { %6533 = vmatpush3.bf16.msra.mxu0 %v6530_v11 }
 0x3ca   :  { %6535 = vmatprep.subr.bf16.mxu0 %v6534_v8 }
 0x3cc   :  { %v10463_v19 = vpop.permute.xlu1 %2154 }
 0x3cd   :  { %6537 = vmatpush3.bf16.msra.mxu0 %v6534_v8  ;;  %v471_v8 = vld [vmem:[%s11787_s10 + $0x40] sm:$0xff]  ;;  %12296 = vst [vmem:[#allocation208_spill] sm:$0xff] %v10463_v19 }
 0x3ce   :  { %5891 = vmatprep.subr.mxu0 %v2145_v63  ;;  %v10394_v44 = vpack.c.bf16 %v472_v13, %v471_v8  ;;  %v478_v8 = vld [vmem:[%s11787_s10 + $0x78] sm:$0xff] }
 0x3d0   :  { %12288 = vst [vmem:[#allocation200_spill] sm:$0xff] %v10394_v44 }
 0x3d1   :  { %5892 = vmatpush3.msra.mxu0 %v2145_v63  ;;  %v10358_v63 = vpack.c.bf16 %v468_v0, %v467_v23  ;;  %v10422_v23 = vpack.c.bf16 %v492_v4, %v491_v9  ;;  %v475_v0 = vld [vmem:[%s11787_s10 + $0x60] sm:$0xff] }
 0x3d2   :  { %5894 = vmatmul.mubr.msk.f32.vlgmr.msra.gmra.mrb[20].mxu0 %vm916_vm8, %v50_v32  ;;  %6539 = vmatprep.subr.bf16.mxu0 %v10314_v51  ;;  %v488_v32 = vld [vmem:[%s11787_s10 + $0xc8] sm:$0xff]  ;;  %v10430_v21 = vpack.c.bf16 %v476_v36, %v475_v0 }
 0x3d3   :  { %6541 = vmatpush3.bf16.msra.mxu0 %v10322_v34  ;;  %12284 = vst [vmem:[#allocation196_spill] sm:$0xff] %v10358_v63  ;;  %v10386_v11 = vpack.c.bf16 %v488_v32, %v487_v60  ;;  %12291 = vst [vmem:[#allocation203_spill] sm:$0xff] %v10422_v23  ;;  %v10440_v60 = vpack.c.bf16 %v494_v28, %v493_v48  ;;  %v477_v32 = vld [vmem:[%s11787_s10 + $0x70] sm:$0xff]  ;;  %v10467_v28 = vpop.permute.xlu0 %2159  ;;  %s7908_s10 = smov 117  }
 0x3d4   :  { %6543 = vmatprep.subr.bf16.mxu0 %v10332_v49  ;;  %12292 = vst [vmem:[#allocation204_spill] sm:$0xff] %v10430_v21  ;;  %v10448_v13 = vpack.c.bf16 %v478_v8, %v477_v32  ;;  %12297 = vst [vmem:[#allocation209_spill] sm:$0xff] %v10467_v28 }
 0x3d5   :  { %12287 = vst [vmem:[#allocation199_spill] sm:$0xff] %v10386_v11  ;;  %12293 = vst [vmem:[#allocation205_spill] sm:$0xff] %v10440_v60 }
 0x3d6   :  { %12294 = vst [vmem:[#allocation206_spill] sm:$0xff] %v10448_v13 }
 0x3d7   :  { %6545 = vmatpush3.bf16.msra.mxu0 %v10340_v14 }
 0x3d8   :  { %6547 = vmatprep.subr.bf16.mxu0 %v10350_v6 }
 0x3db   :  { %6549 = vmatpush3.bf16.msra.mxu0 %v10358_v63 }
 0x3dc   :  { %6551 = vmatprep.subr.bf16.mxu0 %v10368_v53 }
 0x3df   :  { %6553 = vmatpush3.bf16.msra.mxu0 %v10376_v43 }
 0x3e0   :  { %6555 = vmatprep.subr.bf16.mxu0 %v10386_v11 }
 0x3e3   :  { %6557 = vmatpush3.bf16.msra.mxu0 %v10394_v44 }
 0x3e4   :  { %6559 = vmatprep.subr.bf16.mxu0 %v10404_v45 }
 0x3e7   :  { %6561 = vmatpush3.bf16.msra.mxu0 %v10412_v30 }
 0x3e8   :  { %6563 = vmatprep.subr.bf16.mxu0 %v10422_v23 }
 0x3eb   :  { %6565 = vmatpush3.bf16.msra.mxu0 %v10430_v21 }
 0x3ec   :  { %6567 = vmatprep.subr.bf16.mxu0 %v10440_v60 }
 0x3ef   :  { %6569 = vmatpush3.bf16.msra.mxu0 %v10448_v13 }
 0x3f0   :  { %6572 = vmatprep.subr.msk.bf16.mxu0 %vm9789_vm12, %v10458_v57 }
 0x493   :  { %v2234_v9 = vpop.f32.mrb[16].mxu0 }
 0x494   :  { %v2235_v4 = vadd.f32 %v2234_v9, %v10463_v19  ;;  %v2236_v0 = vpop.f32.mrb[17].mxu0 }
 0x495   :  { %v2237_v36 = vadd.f32 %v2236_v0, %v10463_v19 }
 0x496   :  { %v5299_v48 = vmul.f32 -1.442695, %v2235_v4 }
 0x497   :  { %v5300_v32 = vmul.f32 -1.442695, %v2237_v36  ;;  %v2240_v8 = vpop.f32.mrb[18].mxu0 }
 0x498   :  { %7748 = vpow2.f32 %v5299_v48  ;;  %v2241_v62 = vadd.f32 %v2240_v8, %v10467_v28  ;;  %v2242_v54 = vpop.f32.mrb[19].mxu0 }
 0x499   :  { %7750 = vpow2.f32 %v5300_v32  ;;  %v2243_v13 = vadd.f32 %v2242_v54, %v10467_v28 }
 0x49a   :  { %v5302_v60 = vmul.f32 -1.442695, %v2241_v62 }
 0x49b   :  { %v5303_v21 = vmul.f32 -1.442695, %v2243_v13 }
 0x49c   :  { %7752 = vpow2.f32 %v5302_v60 }
 0x49d   :  { %7754 = vpow2.f32 %v5303_v21 }
 0x4a2   :  { %v7749_v9 = vpop.eup %7748 }
 0x4a3   :  { %v7751_v23 = vpop.eup %7750  ;;  %v2338_v30 = vadd.f32 1.0, %v7749_v9 }
 0x4a4   :  { %v2339_v0 = vadd.f32 1.0, %v7751_v23 }
 0x4a5   :  { %7756 = vrcp.f32 %v2338_v30  ;;  %v5895_v45 = vpop.f32.mrb[20].mxu0 }
 0x4a6   :  { %v7753_v44 = vpop.eup %7752  ;;  %7758 = vrcp.f32 %v2339_v0  ;;  %v2317_v48 = vadd.f32 %v5895_v45, %v10467_v28  ;;  %v2311_v11 = vpop.f32.mrb[21].mxu0 }
 0x4a7   :  { %v7755_v8 = vpop.eup %7754  ;;  %v2341_v43 = vadd.f32 1.0, %v7753_v44  ;;  %v2312_v32 = vadd.f32 %v2311_v11, %v10463_v19 }
 0x4a8   :  { %v2342_v54 = vadd.f32 1.0, %v7755_v8  ;;  %v5304_v53 = vmul.f32 -1.442695, %v2317_v48 }
 0x4a9   :  { %7760 = vrcp.f32 %v2341_v43  ;;  %v5301_v60 = vmul.f32 -1.442695, %v2312_v32 }
 0x4aa   :  { %7762 = vrcp.f32 %v2342_v54 }
 0x4ab   :  { %7764 = vpow2.f32 %v5304_v53 }
 0x4ac   :  { %7766 = vpow2.f32 %v5301_v60 }
 0x4af   :  { %v7757_v21 = vpop.eup %7756 }
 0x4b0   :  { %v7759_v23 = vpop.eup %7758  ;;  %v2356_v9 = vmul.f32 %v7757_v21, %v2235_v4 }
 0x4b1   :  { %v2357_v30 = vmul.f32 %v7759_v23, %v2237_v36 }
 0x4b3   :  { %v7761_v63 = vpop.eup %7760  ;;  %2436 = vmatprep.mubr.f32.mxu0 %v2357_v30 }
 0x4b4   :  { %v7763_v0 = vpop.eup %7762  ;;  %2437 = vmatmul.mubr.f32.vlgmr.msra.gmra.mrb[22].mxu0 %v2356_v9  ;;  %v2359_v43 = vmul.f32 %v7761_v63, %v2241_v62 }
 0x4b5   :  { %v7765_v45 = vpop.eup %7764  ;;  %v2360_v28 = vmul.f32 %v7763_v0, %v2243_v13  ;;  %6575 = vmatpush3.bf16.msk.msra.mxu0 %vm9789_vm12, %v10458_v57 }
 0x4b6   :  { %v7767_v11 = vpop.eup %7766  ;;  %v2343_v44 = vadd.f32 1.0, %v7765_v45  ;;  %6576 = vmatprep.subr.bf16.mxu0 %v12221_v37 }
 0x4b7   :  { %v2340_v53 = vadd.f32 1.0, %v7767_v11  ;;  %2441 = vmatprep.mubr.f32.mxu0 %v2360_v28 }
 0x4b8   :  { %7768 = vrcp.f32 %v2343_v44  ;;  %2442 = vmatmul.mubr.f32.gmra.mrb[24].mxu0 %v2359_v43  ;;  %v54_v43 = vld [vmem:[%s11789_s5 + $0x8] sm:$0xff]  ;;  %v10501_v44 = vld [vmem:[%s11781_s0 + $0x50] sm:$0xff] }
 0x4b9   :  { %7770 = vrcp.f32 %v2340_v53  ;;  %12298 = vst [vmem:[#allocation210_spill] sm:$0xff] %v10501_v44  ;;  %v10506_v53 = vld [vmem:[%s11781_s0 + $0x58] sm:$0xff] }
 0x4ba   :  { %12299 = vst [vmem:[#allocation211_spill] sm:$0xff] %v10506_v53 }
 0x4c2   :  { %v7769_v4 = vpop.eup %7768 }
 0x4c3   :  { %v7771_v36 = vpop.eup %7770  ;;  %v2361_v54 = vmul.f32 %v7769_v4, %v2317_v48  ;;  %v58_v48 = vld [vmem:[%s11788_s6 + $0x8] sm:$0xff]  ;;  %v10511_v4 = vld [vmem:[%s11781_s0 + $0x60] sm:$0xff] }
 0x4c4   :  { %v2358_v8 = vmul.f32 %v7771_v36, %v2312_v32  ;;  %v57_v32 = vld [vmem:[%s11788_s6] sm:$0xff]  ;;  %v7488_v36 = vpack.i.bf16 %v10511_v4, %v10506_v53  ;;  %s12622_s6 = smov 118  }
 0x4c6   :  { %5900 = vmatprep.mubr.msk.f32.mxu0 %vm11992_vm15, %v2358_v8  ;;  %v10537_v8 = vld [vmem:[%s11781_s0 + $0x68] sm:$0xff] }
 0x4c7   :  { %5901 = vmatmul.mubr.msk.f32.vlgmr.msra.gmra.mrb[26].mxu0 %vm11992_vm15, %v2361_v54  ;;  %vm2582_vm15 = vcmask 130048   ;;  %v10542_v54 = vld [vmem:[%s11781_s0 + $0x70] sm:$0xff] }
 0x4c8   :  { %5308 = vmatprep.mubr.msk.f32.mxu0 %vm2582_vm15, %v54_v43  ;;  %12302 = vst [vmem:[#allocation212_spill] sm:$0xff] %v10542_v54 }
 0x587   :  { %v5589_v13 = vpop.f32.mrb[22].mxu0 }
 0x588   :  { %v5590_v60 = vpop.f32.mrb[23].mxu0 }
 0x589   :  { %v5591_v63 = vadd.f32 %v5590_v60, %v5589_v13  ;;  %v7523_v13 = vpack.i.bf16 %v10542_v54, %v10537_v8  ;;  %v10563_v60 = vld [vmem:[%s11781_s0 + $0x78] sm:$0xff] }
 0x58a   :  { %12304 = vst [vmem:[#allocation213_spill] sm:$0xff] %v10563_v60 }
 0x58b   :  { %v5592_v62 = vpop.f32.mrb[24].mxu0 }
 0x58c   :  { %v5593_v21 = vpop.f32.mrb[25].mxu0 }
 0x58d   :  { %v5594_v23 = vadd.f32 %v5593_v21, %v5592_v62  ;;  %v10585_v21 = vld [vmem:[%s11781_s0 + $0x88] sm:$0xff] }
 0x59a   :  { %v5902_v30 = vpop.f32.mrb[26].mxu0 }
 0x59b   :  { %v2519_v28 = vadd.f32 %v5902_v30, %v5594_v23  ;;  %v2513_v9 = vpop.f32.mrb[27].mxu0  ;;  %v10590_v23 = vld [vmem:[%s11781_s0 + $0x90] sm:$0xff] }
 0x59c   :  { %v2514_v0 = vadd.f32 %v5591_v63, %v2513_v9  ;;  %v10568_v63 = vld [vmem:[%s11781_s0 + $0x80] sm:$0xff]  ;;  %12305 = vst [vmem:[#allocation214_spill] sm:$0xff] %v10590_v23  ;;  %v7593_v30 = vpack.i.bf16 %v10590_v23, %v10585_v21  ;;  %s12624_s0 = smov 106  }
 0x59d   :  { %v7563_v62 = vpack.i.bf16 %v10568_v63, %v10563_v60 }
 0x59e   :  { %v7453_v45 = vpack.i.bf16 %v2519_v28, %v2514_v0  ;;  %v6577_v11 = vpack.c.bf16 %v2519_v28, %v2514_v0 }
 0x5a0   :  { %7454 = vrot.lane.b32.xlu0 %v7453_v45, %s7890_s17  ;;  %7449 = vrot.lane.b32.xlu1 %v7453_v45, %s7891_s18 }
 0x5a1   :  { %6578 = vmatpush1.bf16.msra.mxu0 %v6577_v11 }
 0x5a2   :  { %6579 = vmatprep.subr.bf16.mxu0 %v12221_v37 }
 0x5a4   :  { %7464 = vrot.lane.b32.xlu0 %v7453_v45, %s7908_s10  ;;  %7459 = vrot.lane.b32.xlu1 %v7453_v45, %s11993_s4  ;;  %s12300_s4 = smov 59  }
 0x5a8   :  { %7474 = vrot.lane.b32.xlu0 %v7453_v45, %s7905_s2  ;;  %7469 = vrot.lane.b32.xlu1 %v7453_v45, %s11995_s27  ;;  %s12301_s27 = smov 60  }
 0x5ac   :  { %7484 = vrot.lane.b32.xlu0 %v7453_v45, %s11994_s28  ;;  %7479 = vrot.lane.b32.xlu1 %v7453_v45, %s7912_s29 }
 0x5b0   :  { %2579 = vperm.xlu0 %7411, %v58_v48   ;;  %2574 = vperm.xlu1 %7447, %v57_v32  }
 0x5b4   :  { %3046 = vrot.lane.b32.xlu0 %v10501_v44, %s7891_s18  ;;  %7489 = vrot.lane.b32.xlu1 %v7488_v36, %s7891_s18 }
 0x5b8   :  { %7499 = vrot.lane.b32.xlu0 %v7488_v36, %s7892_s21  ;;  %7494 = vrot.lane.b32.xlu1 %v7488_v36, %s7890_s17 }
 0x5bc   :  { %3116 = vrot.lane.b32.xlu0 %v10501_v44, %s7892_s21  ;;  %3081 = vrot.lane.b32.xlu1 %v10501_v44, %s7890_s17 }
 0x5c0   :  { %7509 = vrot.lane.b32.xlu0 %v7488_v36, %s7893_s22  ;;  %7504 = vrot.lane.b32.xlu1 %v7488_v36, %s7894_s23 }
 0x5c4   :  { %3186 = vrot.lane.b32.xlu0 %v10501_v44, %s7893_s22  ;;  %3151 = vrot.lane.b32.xlu1 %v10501_v44, %s7894_s23 }
 0x5c8   :  { %7519 = vrot.lane.b32.xlu0 %v7488_v36, %s12300_s4  ;;  %7514 = vrot.lane.b32.xlu1 %v7488_v36, %s12301_s27 }
 0x5cc   :  { %3256 = vrot.lane.b32.xlu0 %v10501_v44, %s12300_s4  ;;  %3221 = vrot.lane.b32.xlu1 %v10501_v44, %s12301_s27 }
 0x5d0   :  { %3295 = vrot.lane.b32.xlu0 %v10511_v4, %s12303_s24  ;;  %3293 = vrot.lane.b32.xlu1 %v10506_v53, %s12303_s24  ;;  %v503_v53 = vld [vmem:[%s11790_s11 + $0x30] sm:$0xff] }
 0x5d4   :  { %7524 = vrot.lane.b32.xlu0 %v7523_v13, %s7891_s18  ;;  %3291 = vrot.lane.b32.xlu1 %v10501_v44, %s12303_s24 }
 0x5d8   :  { %7534 = vrot.lane.b32.xlu0 %v7523_v13, %s7892_s21  ;;  %7529 = vrot.lane.b32.xlu1 %v7523_v13, %s7890_s17 }
 0x5dc   :  { %7544 = vrot.lane.b32.xlu0 %v7523_v13, %s7893_s22  ;;  %7539 = vrot.lane.b32.xlu1 %v7523_v13, %s7894_s23 }
 0x5e0   :  { %7554 = vrot.lane.b32.xlu0 %v7523_v13, %s12300_s4  ;;  %7549 = vrot.lane.b32.xlu1 %v7523_v13, %s12301_s27 }
 0x5e4   :  { %3299 = vrot.lane.b32.xlu0 %v10542_v54, %s12303_s24  ;;  %3297 = vrot.lane.b32.xlu1 %v10537_v8, %s12303_s24 }
 0x5e8   :  { %7564 = vrot.lane.b32.xlu0 %v7563_v62, %s7890_s17  ;;  %7559 = vrot.lane.b32.xlu1 %v7563_v62, %s7891_s18 }
 0x5ec   :  { %7574 = vrot.lane.b32.xlu0 %v7563_v62, %s7894_s23  ;;  %7569 = vrot.lane.b32.xlu1 %v7563_v62, %s7892_s21 }
 0x5f0   :  { %7584 = vrot.lane.b32.xlu0 %v7563_v62, %s12301_s27  ;;  %7579 = vrot.lane.b32.xlu1 %v7563_v62, %s7893_s22 }
 0x5f4   :  { %3301 = vrot.lane.b32.xlu0 %v10563_v60, %s12303_s24  ;;  %7589 = vrot.lane.b32.xlu1 %v7563_v62, %s12300_s4 }
 0x5f8   :  { %7594 = vrot.lane.b32.xlu0 %v7593_v30, %s7891_s18  ;;  %3303 = vrot.lane.b32.xlu1 %v10568_v63, %s12303_s24 }
 0x5fc   :  { %7604 = vrot.lane.b32.xlu0 %v7593_v30, %s7892_s21  ;;  %7599 = vrot.lane.b32.xlu1 %v7593_v30, %s7890_s17 }
 0x600   :  { %7614 = vrot.lane.b32.xlu0 %v7593_v30, %s7893_s22  ;;  %7609 = vrot.lane.b32.xlu1 %v7593_v30, %s7894_s23 }
 0x604   :  { %7624 = vrot.lane.b32.xlu0 %v7593_v30, %s12300_s4  ;;  %7619 = vrot.lane.b32.xlu1 %v7593_v30, %s12301_s27 }
 0x608   :  { %3307 = vrot.lane.b32.xlu0 %v10590_v23, %s12303_s24  ;;  %3305 = vrot.lane.b32.xlu1 %v10585_v21, %s12303_s24  ;;  %v498_v23 = vld [vmem:[%s11790_s11 + $0x8] sm:$0xff] }
 0x612   :  { %v7455_v28 = vpop.permute.xlu0 %7454  ;;  %v7450_v9 = vpop.permute.xlu1 %7449 }
 0x613   :  { %v7452_v0 = vunpack.i.h.bf16 %v7450_v9  ;;  %v7451_v45 = vunpack.i.l.bf16 %v7450_v9  ;;  %v7457_v11 = vunpack.i.h.bf16 %v7455_v28  ;;  %v7456_v48 = vunpack.i.l.bf16 %v7455_v28 }
 0x615   :  { %v6580_v32 = vpack.c.bf16 %v7452_v0, %v7451_v45  ;;  %v6583_v36 = vpack.c.bf16 %v7457_v11, %v7456_v48 }
 0x616   :  { %v7460_v43 = vpop.permute.xlu1 %7459  ;;  %v7465_v30 = vpop.permute.xlu0 %7464 }
 0x617   :  { %6581 = vmatpush1.bf16.msra.mxu0 %v6580_v32  ;;  %v7462_v13 = vunpack.i.h.bf16 %v7460_v43  ;;  %v7461_v62 = vunpack.i.l.bf16 %v7460_v43  ;;  %v7467_v19 = vunpack.i.h.bf16 %v7465_v30  ;;  %v7466_v57 = vunpack.i.l.bf16 %v7465_v30 }
 0x618   :  { %6582 = vmatprep.subr.bf16.mxu0 %v12221_v37 }
 0x619   :  { %v6586_v6 = vpack.c.bf16 %v7462_v13, %v7461_v62  ;;  %v6589_v28 = vpack.c.bf16 %v7467_v19, %v7466_v57 }
 0x61a   :  { %v7470_v14 = vpop.permute.xlu1 %7469  ;;  %v7475_v45 = vpop.permute.xlu0 %7474 }
 0x61b   :  { %6584 = vmatpush1.bf16.msra.mxu0 %v6583_v36  ;;  %v7472_v9 = vunpack.i.h.bf16 %v7470_v14  ;;  %v7471_v0 = vunpack.i.l.bf16 %v7470_v14  ;;  %v7477_v11 = vunpack.i.h.bf16 %v7475_v45  ;;  %v7476_v48 = vunpack.i.l.bf16 %v7475_v45  ;;  %v56_v45 = vld [vmem:[%s11789_s5 + $0x18] sm:$0xff] }
 0x61c   :  { %6585 = vmatprep.subr.bf16.mxu0 %v12221_v37 }
 0x61d   :  { %v6592_v32 = vpack.c.bf16 %v7472_v9, %v7471_v0  ;;  %v6595_v36 = vpack.c.bf16 %v7477_v11, %v7476_v48  ;;  %v53_v9 = vld [vmem:[%s11789_s5] sm:$0xff]  ;;  %v55_v11 = vld [vmem:[%s11789_s5 + $0x10] sm:$0xff] }
 0x61e   :  { %v7480_v43 = vpop.permute.xlu1 %7479 }
 0x61f   :  { %6587 = vmatpush1.bf16.msra.mxu0 %v6586_v6  ;;  %v7482_v13 = vunpack.i.h.bf16 %v7480_v43  ;;  %v7481_v62 = vunpack.i.l.bf16 %v7480_v43  ;;  %v7485_v6 = vpop.permute.xlu0 %7484 }
 0x620   :  { %6588 = vmatprep.subr.bf16.mxu0 %v12221_v37  ;;  %v7487_v57 = vunpack.i.h.bf16 %v7485_v6  ;;  %v7486_v14 = vunpack.i.l.bf16 %v7485_v6 }
 0x621   :  { %v6598_v19 = vpack.c.bf16 %v7482_v13, %v7481_v62 }
 0x623   :  { %6590 = vmatpush1.bf16.msra.mxu0 %v6589_v28  ;;  %v6601_v28 = vpack.c.bf16 %v7487_v57, %v7486_v14 }
 0x624   :  { %6591 = vmatprep.subr.bf16.mxu0 %v12221_v37 }
 0x627   :  { %6593 = vmatpush1.bf16.msra.mxu0 %v6592_v32 }
 0x628   :  { %6594 = vmatprep.subr.bf16.mxu0 %v12221_v37 }
 0x62b   :  { %6596 = vmatpush1.bf16.msra.mxu0 %v6595_v36 }
 0x62c   :  { %6597 = vmatprep.subr.bf16.mxu0 %v12221_v37 }
 0x62f   :  { %v10617_v30 = vpop.permute.xlu0 %2579  ;;  %6599 = vmatpush1.bf16.msra.mxu0 %v6598_v19  ;;  %v10648_v14 = vpop.permute.xlu1 %2574 }
 0x630   :  { %12306 = vst [vmem:[#allocation215_spill] sm:$0xff] %v10617_v30  ;;  %6600 = vmatprep.subr.bf16.mxu0 %v12221_v37  ;;  %12310 = vst [vmem:[#allocation219_spill] sm:$0xff] %v10648_v14  ;;  %v497_v37 = vld [vmem:[%s11790_s11] sm:$0xff] }
 0x631   :  { %v10678_v54 = vpack.c.bf16 %v498_v23, %v497_v37 }
 0x633   :  { %6602 = vmatpush1.bf16.msra.mxu0 %v6601_v28  ;;  %v10623_v0 = vpop.permute.xlu0 %3046  ;;  %v10650_v19 = vpop.permute.xlu1 %7489  ;;  %12315 = vst [vmem:[#allocation224_spill] sm:$0xff] %v10678_v54  ;;  %6604 = vmatprep.subr.bf16.mxu1 %v10678_v54 }
 0x634   :  { %12307 = vst [vmem:[#allocation216_spill] sm:$0xff] %v10623_v0  ;;  %6606 = vmatpush3.bf16.msra.mxu1 %v10678_v54  ;;  %v501_v54 = vld [vmem:[%s11790_s11 + $0x20] sm:$0xff] }
 0x636   :  { %2654 = vmatmul.mubr.f32.vlgmr.msra.gmra.mrb[28].mxu0 %v53_v9 }
 0x637   :  { %5309 = vmatprep.mubr.msk.f32.mxu0 %vm2582_vm15, %v56_v45  ;;  %v10632_v48 = vpop.permute.xlu0 %7499  ;;  %v10652_v28 = vpop.permute.xlu1 %7494 }
 0x638   :  { %v12002_v32 = vunpack.i.l.bf16 %v10632_v48 }
 0x63a   :  { %2659 = vmatmul.mubr.f32.gmra.mrb[30].mxu0 %v55_v11 }
 0x63b   :  { %v3117_v43 = vpop.permute.xlu0 %3116  ;;  %v10654_v9 = vpop.permute.xlu1 %3081 }
 0x63c   :  { %v10638_v36 = vsel %vm713_vm1, %v3117_v43, %v12002_v32  ;;  %12311 = vst [vmem:[#allocation220_spill] sm:$0xff] %v10654_v9 }
 0x63d   :  { %12308 = vst [vmem:[#allocation217_spill] sm:$0xff] %v10638_v36  ;;  %v502_v36 = vld [vmem:[%s11790_s11 + $0x28] sm:$0xff] }
 0x63e   :  { %v10706_v9 = vpack.c.bf16 %v502_v36, %v501_v54  ;;  %v504_v54 = vld [vmem:[%s11790_s11 + $0x38] sm:$0xff] }
 0x63f   :  { %v10640_v13 = vpop.permute.xlu0 %7509  ;;  %v10656_v45 = vpop.permute.xlu1 %7504  ;;  %v10722_v36 = vpack.c.bf16 %v504_v54, %v503_v53  ;;  %v505_v53 = vld [vmem:[%s11790_s11 + $0x40] sm:$0xff]  ;;  %v506_v54 = vld [vmem:[%s11790_s11 + $0x48] sm:$0x3f] }
 0x640   :  { %v12005_v62 = vunpack.i.l.bf16 %v10640_v13  ;;  %12317 = vst [vmem:[#allocation226_spill] sm:$0xff] %v10706_v9 }
 0x641   :  { %12318 = vst [vmem:[#allocation227_spill] sm:$0xff] %v10722_v36 }
 0x643   :  { %v3187_v6 = vpop.permute.xlu0 %3186  ;;  %v10658_v11 = vpop.permute.xlu1 %3151 }
 0x644   :  { %v10646_v57 = vsel %vm785_vm3, %v3187_v6, %v12005_v62  ;;  %12312 = vst [vmem:[#allocation221_spill] sm:$0xff] %v10658_v11 }
 0x645   :  { %12309 = vst [vmem:[#allocation218_spill] sm:$0xff] %v10646_v57 }
 0x647   :  { %v10660_v43 = vpop.permute.xlu0 %7519  ;;  %v10662_v32 = vpop.permute.xlu1 %7514 }
 0x648   :  { %v12027_v44 = vunpack.i.l.bf16 %v10660_v43 }
 0x64b   :  { %v3257_v49 = vpop.permute.xlu0 %3256  ;;  %v3222_v34 = vpop.permute.xlu1 %3221 }
 0x64f   :  { %v10664_v6 = vpop.permute.xlu0 %3295  ;;  %v10666_v62 = vpop.permute.xlu1 %3293 }
 0x650   :  { %12313 = vst [vmem:[#allocation222_spill] sm:$0xff] %v10666_v62  ;;  %v500_v62 = vld [vmem:[%s11790_s11 + $0x18] sm:$0xff] }
 0x653   :  { %v10668_v51 = vpop.permute.xlu0 %7524  ;;  %v10670_v55 = vpop.permute.xlu1 %3291 }
 0x654   :  { %12314 = vst [vmem:[#allocation223_spill] sm:$0xff] %v10670_v55  ;;  %v499_v55 = vld [vmem:[%s11790_s11 + $0x10] sm:$0xff] }
 0x655   :  { %v10692_v11 = vpack.c.bf16 %v500_v62, %v499_v55 }
 0x657   :  { %v10681_v60 = vpop.permute.xlu0 %7534  ;;  %v10683_v57 = vpop.permute.xlu1 %7529  ;;  %12316 = vst [vmem:[#allocation225_spill] sm:$0xff] %v10692_v11  ;;  %6608 = vmatprep.subr.bf16.mxu1 %v10692_v11 }
 0x658   :  { %6610 = vmatpush3.bf16.msra.mxu1 %v10692_v11  ;;  %v10732_v11 = vsel %vm857_vm5, %v3257_v49, %v12027_v44  ;;  %v10748_v49 = vpack.c.bf16 %v506_v54, %v505_v53  ;;  %v7527_v53 = vunpack.i.h.bf16 %v10668_v51  ;;  %v12041_v54 = vunpack.i.l.bf16 %v10668_v51 }
 0x659   :  { %6612 = vmatprep.subr.bf16.mxu1 %v10706_v9  ;;  %12319 = vst [vmem:[#allocation228_spill] sm:$0xff] %v10732_v11 }
 0x65a   :  { %12322 = vst [vmem:[#allocation230_spill] sm:$0xff] %v10748_v49 }
 0x65b   :  { %v10695_v37 = vpop.permute.xlu0 %7544  ;;  %v10697_v23 = vpop.permute.xlu1 %7539 }
 0x65c   :  { %6614 = vmatpush3.bf16.msra.mxu1 %v10706_v9  ;;  %v12320_v9 = vunpack.i.l.bf16 %v10662_v32  ;;  %v12329_v35 = vunpack.i.h.bf16 %v10697_v23 }
 0x65d   :  { %6616 = vmatprep.subr.bf16.mxu1 %v10722_v36 }
 0x65e   :  { %v10737_v16 = vsel %vm821_vm6, %v3222_v34, %v12320_v9  ;;  %v12323_v34 = vmov 0 }
 0x65f   :  { %v10709_v55 = vpop.permute.xlu0 %7554  ;;  %v10711_v62 = vpop.permute.xlu1 %7549  ;;  %12321 = vst [vmem:[#allocation229_spill] sm:$0xff] %v10737_v16  ;;  %v12324_v34 = vsel %vm10751_vm10, 4294967295, %v12323_v34  ;;  %v12047_v16 = vunpack.i.h.bf16 %v10683_v57 }
 0x660   :  { %6618 = vmatpush3.bf16.msra.mxu1 %v10722_v36  ;;  %12325 = vst [vmem:[#allocation231_spill] sm:$0xff] %v12324_v34  ;;  %v3067_v34 = vsel %vm641_vm0, %v12041_v54, %v7527_v53  ;;  %v12050_v54 = vunpack.i.h.bf16 %v10681_v60 }
 0x661   :  { %6621 = vmatprep.subr.msk.bf16.mxu1 %vm10751_vm10, %v10748_v49  ;;  %v6645_v25 = vpack.c.bf16 %v3067_v34, %v10537_v8 }
 0x663   :  { %v10725_v0 = vpop.permute.xlu0 %3299  ;;  %v10727_v50 = vpop.permute.xlu1 %3297 }
 0x664   :  { %6624 = vmatpush3.bf16.msk.msra.mxu1 %vm10751_vm10, %v10748_v49 }
 0x665   :  { %6646 = vmatprep.subr.bf16.mxu1 %v6645_v25 }
 0x667   :  { %v10758_v9 = vpop.permute.xlu0 %7564  ;;  %v10760_v44 = vpop.permute.xlu1 %7559 }
 0x668   :  { %v12046_v11 = vunpack.i.l.bf16 %v10758_v9  ;;  %v12048_v10 = vunpack.i.l.bf16 %v10760_v44 }
 0x66a   :  { %v10788_v15 = vsel %vm677_vm2, %v12047_v16, %v12046_v11  ;;  %v10793_v46 = vsel %vm641_vm0, %v7527_v53, %v12048_v10  ;;  %v12056_v11 = vunpack.i.h.bf16 %v10695_v37  ;;  %v12053_v16 = vunpack.i.h.bf16 %v10711_v62 }
 0x66b   :  { %v10767_v2 = vpop.permute.xlu0 %7574  ;;  %v10769_v36 = vpop.permute.xlu1 %7569  ;;  %12326 = vst [vmem:[#allocation232_spill] sm:$0xff] %v10788_v15  ;;  %12327 = vst [vmem:[#allocation233_spill] sm:$0xff] %v10793_v46 }
 0x66c   :  { %v12328_v47 = vunpack.i.l.bf16 %v10767_v2  ;;  %v12049_v18 = vunpack.i.l.bf16 %v10769_v36 }
 0x66e   :  { %v10802_v41 = vsel %vm749_vm4, %v12329_v35, %v12328_v47  ;;  %v10814_v34 = vsel %vm713_vm1, %v12050_v54, %v12049_v18  ;;  %v12060_v54 = vunpack.i.h.bf16 %v10709_v55 }
 0x66f   :  { %v10779_v49 = vpop.permute.xlu0 %7584  ;;  %v10781_v27 = vpop.permute.xlu1 %7579  ;;  %12330 = vst [vmem:[#allocation234_spill] sm:$0xff] %v10802_v41  ;;  %12331 = vst [vmem:[#allocation235_spill] sm:$0xff] %v10814_v34 }
 0x670   :  { %v12052_v53 = vunpack.i.l.bf16 %v10779_v49  ;;  %v12055_v8 = vunpack.i.l.bf16 %v10781_v27 }
 0x672   :  { %v10827_v25 = vsel %vm821_vm6, %v12053_v16, %v12052_v53  ;;  %v10834_v18 = vsel %vm785_vm3, %v12056_v11, %v12055_v8 }
 0x673   :  { %v10816_v35 = vpop.permute.xlu0 %3301  ;;  %v10818_v47 = vpop.permute.xlu1 %7589  ;;  %12333 = vst [vmem:[#allocation237_spill] sm:$0xff] %v10827_v25  ;;  %12334 = vst [vmem:[#allocation238_spill] sm:$0xff] %v10834_v18 }
 0x674   :  { %12332 = vst [vmem:[#allocation236_spill] sm:$0xff] %v10816_v35  ;;  %v12059_v10 = vunpack.i.l.bf16 %v10818_v47 }
 0x676   :  { %v10845_v53 = vsel %vm857_vm5, %v12060_v54, %v12059_v10 }
 0x677   :  { %12335 = vst [vmem:[#allocation239_spill] sm:$0xff] %v10845_v53  ;;  %v10847_v16 = vpop.permute.xlu0 %7594  ;;  %v10849_v15 = vpop.permute.xlu1 %3303 }
 0x67b   :  { %v10853_v11 = vpop.permute.xlu0 %7604  ;;  %v10855_v34 = vpop.permute.xlu1 %7599 }
 0x67c   :  { %v12065_v35 = vunpack.i.h.bf16 %v10853_v11  ;;  %v12066_v41 = vunpack.i.h.bf16 %v10855_v34 }
 0x67e   :  { %v10863_v10 = vpack.c.bf16 %v12065_v35, %v12066_v41 }
 0x67f   :  { %v10865_v54 = vpop.permute.xlu0 %7614  ;;  %v10867_v18 = vpop.permute.xlu1 %7609 }
 0x680   :  { %12336 = vst [vmem:[#allocation240_spill] sm:$0xff] %v10863_v10  ;;  %v12070_v8 = vunpack.i.h.bf16 %v10865_v54  ;;  %v12071_v25 = vunpack.i.h.bf16 %v10867_v18 }
 0x682   :  { %v10875_v53 = vpack.c.bf16 %v12070_v8, %v12071_v25 }
 0x683   :  { %v10877_v46 = vpop.permute.xlu0 %7624  ;;  %v10879_v24 = vpop.permute.xlu1 %7619 }
 0x684   :  { %12337 = vst [vmem:[#allocation241_spill] sm:$0xff] %v10875_v53  ;;  %v12078_v35 = vunpack.i.h.bf16 %v10877_v46  ;;  %v12079_v41 = vunpack.i.h.bf16 %v10879_v24 }
 0x686   :  { %v10887_v10 = vpack.c.bf16 %v12078_v35, %v12079_v41  ;;  %v12082_v35 = vunpack.i.h.bf16 %v10650_v19  ;;  %v7536_v41 = vunpack.i.l.bf16 %v10681_v60 }
 0x688   :  { %12338 = vst [vmem:[#allocation242_spill] sm:$0xff] %v10887_v10 }
 0x709   :  { %v2655_v56 = vpop.f32.mrb[28].mxu0 }
 0x70a   :  { %v2656_v42 = vadd.f32 %v2655_v56, %v10648_v14  ;;  %v2657_v58 = vpop.f32.mrb[29].mxu0  ;;  %v12341_v14 = vunpack.i.h.bf16 %v10681_v60 }
 0x70b   :  { %v7531_v58 = vunpack.i.l.bf16 %v10683_v57 }
 0x70c   :  { %v5310_v8 = vmul.f32 -1.442695, %v2656_v42 }
 0x70d   :  { %v2660_v25 = vpop.f32.mrb[30].mxu0 }
 0x70e   :  { %7772 = vpow2.f32 %v5310_v8  ;;  %v2661_v53 = vadd.f32 %v2660_v25, %v10617_v30  ;;  %v2662_v26 = vpop.f32.mrb[31].mxu0  ;;  %v3137_v8 = vsel %vm713_vm1, %v7536_v41, %v12341_v14  ;;  %v7556_v14 = vunpack.i.l.bf16 %v10709_v55 }
 0x70f   :  { %v12342_v26 = vunpack.i.h.bf16 %v10632_v48 }
 0x710   :  { %v5311_v20 = vmul.f32 -1.442695, %v2661_v53 }
 0x712   :  { %7774 = vpow2.f32 %v5311_v20  ;;  %v12339_v20 = vunpack.i.l.bf16 %v10668_v51  ;;  %v12344_v51 = vunpack.i.h.bf16 %v10697_v23 }
 0x718   :  { %v7773_v5 = vpop.eup %7772 }
 0x719   :  { %v2670_v1 = vadd.f32 1.0, %v7773_v5  ;;  %v12340_v5 = vunpack.i.h.bf16 %v10683_v57  ;;  %v3136_v57 = vsel %vm713_vm1, %v12342_v26, %v7536_v41  ;;  %v7522_v41 = vunpack.i.h.bf16 %v10660_v43 }
 0x71b   :  { %7776 = vrcp.f32 %v2670_v1  ;;  %v7541_v1 = vunpack.i.l.bf16 %v10697_v23  ;;  %v3102_v30 = vsel %vm677_vm2, %v7531_v58, %v12340_v5  ;;  %v12343_v5 = vunpack.i.h.bf16 %v10652_v28 }
 0x71c   :  { %v7775_v33 = vpop.eup %7774  ;;  %v6649_v10 = vpack.c.bf16 %v3137_v8, %v3102_v30  ;;  %v7517_v30 = vunpack.i.h.bf16 %v10662_v32  ;;  %v12347_v8 = vunpack.i.h.bf16 %v10656_v45 }
 0x71d   :  { %v2671_v31 = vadd.f32 1.0, %v7775_v33  ;;  %v3066_v33 = vsel %vm641_vm0, %v12082_v35, %v12339_v20  ;;  %v3101_v60 = vsel %vm677_vm2, %v12343_v5, %v7531_v58  ;;  %v12346_v58 = vunpack.i.h.bf16 %v10640_v13 }
 0x71e   :  { %v6647_v20 = vpack.c.bf16 %v3066_v33, %v10511_v4  ;;  %v12345_v4 = vunpack.i.h.bf16 %v10695_v37  ;;  %v6651_v26 = vpack.c.bf16 %v3136_v57, %v3101_v60  ;;  %v7606_v60 = vunpack.i.l.bf16 %v10853_v11 }
 0x71f   :  { %7778 = vrcp.f32 %v2671_v31  ;;  %v7546_v31 = vunpack.i.l.bf16 %v10695_v37  ;;  %v3171_v37 = vsel %vm749_vm4, %v12347_v8, %v7541_v1  ;;  %v7611_v8 = vunpack.i.l.bf16 %v10867_v18 }
 0x721   :  { %v3206_v23 = vsel %vm785_vm3, %v12346_v58, %v7546_v31 }
 0x722   :  { %v6655_v57 = vpack.c.bf16 %v3206_v23, %v3171_v37  ;;  %v7616_v23 = vunpack.i.l.bf16 %v10865_v54  ;;  %v12350_v37 = vunpack.i.h.bf16 %v10855_v34 }
 0x725   :  { %v7777_v56 = vpop.eup %7776 }
 0x726   :  { %v2676_v25 = vmul.f32 %v7777_v56, %v2656_v42  ;;  %v3172_v56 = vsel %vm749_vm4, %v7541_v1, %v12344_v51  ;;  %v12349_v51 = vunpack.i.h.bf16 %v10709_v55  ;;  %v7562_v55 = vunpack.i.h.bf16 %v10760_v44 }
 0x728   :  { %5923 = vmatprep.mubr.msk.f32.mxu1 %vm2678_vm11, %v2676_v25  ;;  %v7551_v25 = vunpack.i.l.bf16 %v10711_v62 }
 0x729   :  { %v7779_v42 = vpop.eup %7778 }
 0x72a   :  { %v2677_v35 = vmul.f32 %v7779_v42, %v2661_v53  ;;  %v3207_v53 = vsel %vm785_vm3, %v7546_v31, %v12345_v4  ;;  %v3276_v31 = vsel %vm857_vm5, %v7522_v41, %v7556_v14  ;;  %v3241_v1 = vsel %vm821_vm6, %v7517_v30, %v7551_v25 }
 0x72b   :  { %v6653_v33 = vpack.c.bf16 %v3207_v53, %v3172_v56  ;;  %v7596_v56 = vunpack.i.l.bf16 %v10847_v16  ;;  %v6659_v5 = vpack.c.bf16 %v3276_v31, %v3241_v1  ;;  %v7601_v4 = vunpack.i.l.bf16 %v10855_v34 }
 0x72c   :  { %5924 = vmatmul.mubr.msk.f32.vlgmr.msra.gmra.mrb[6].mxu1 %vm2678_vm11, %v2677_v35  ;;  %v12348_v35 = vunpack.i.h.bf16 %v10711_v62  ;;  %v7597_v62 = vunpack.i.h.bf16 %v10847_v16  ;;  %v7567_v53 = vunpack.i.h.bf16 %v10758_v9  ;;  %v7582_v1 = vunpack.i.h.bf16 %v10781_v27  ;;  %v12423_v16 = vld [vmem:[#allocation242_spill] sm:$0xff] }
 0x72d   :  { %6648 = vmatpush1.bf16.msra.mxu1 %v6647_v20  ;;  %3461 = vmatprep.mubr.f32.mxu1 %v12228_v17  ;;  %v3277_v20 = vsel %vm857_vm5, %v7556_v14, %v12349_v51  ;;  %v3312_v14 = vsel %vm893_vm7, %v10727_v50, %v10725_v0  ;;  %v3070_v58 = vsel %vm641_vm0, %v7562_v55, %v7596_v56 }
 0x72e   :  { %6650 = vmatprep.subr.bf16.mxu1 %v6649_v10  ;;  %v3242_v42 = vsel %vm821_vm6, %v7551_v25, %v12348_v35  ;;  %v3071_v25 = vsel %vm641_vm0, %v7596_v56, %v7597_v62  ;;  %v12351_v35 = vunpack.i.h.bf16 %v10853_v11  ;;  %v3311_v51 = vsel %vm893_vm7, %v10664_v6, %v10727_v50 }
 0x72f   :  { %v6657_v10 = vpack.c.bf16 %v3277_v20, %v3242_v42  ;;  %v6677_v20 = vpack.c.bf16 %v3071_v25, %v10585_v21  ;;  %v6679_v31 = vpack.c.bf16 %v3070_v58, %v10568_v63  ;;  %v3105_v11 = vsel %vm677_vm2, %v7567_v53, %v7601_v4 }
 0x730   :  { %v3141_v42 = vsel %vm713_vm1, %v7606_v60, %v12351_v35  ;;  %v7626_v50 = vunpack.i.l.bf16 %v10877_v46  ;;  %v7621_v21 = vunpack.i.l.bf16 %v10879_v24  ;;  %v12352_v56 = vunpack.i.h.bf16 %v10867_v18 }
 0x731   :  { %6652 = vmatpush1.bf16.msra.mxu1 %v6651_v26  ;;  %v7572_v26 = vunpack.i.h.bf16 %v10769_v36  ;;  %v7592_v18 = vunpack.i.h.bf16 %v10818_v47 }
 0x732   :  { %6654 = vmatprep.subr.bf16.mxu1 %v6653_v33  ;;  %v3106_v33 = vsel %vm677_vm2, %v7601_v4, %v12350_v37  ;;  %v3176_v63 = vsel %vm749_vm4, %v7611_v8, %v12352_v56  ;;  %v7587_v4 = vunpack.i.h.bf16 %v10779_v49  ;;  %v12369_v56 = vld [vmem:[#allocation25_spill] sm:$0xff] }
 0x733   :  { %v3140_v34 = vsel %vm713_vm1, %v7572_v26, %v7606_v60  ;;  %v10997_v60 = vld [vmem:[%s11783_s1] sm:$0xff] }
 0x734   :  { %v6683_v25 = vpack.c.bf16 %v3140_v34, %v3105_v11  ;;  %v11022_v34 = vpop.permute.xlu0 %3307 }
 0x735   :  { %6656 = vmatpush1.bf16.msra.mxu1 %v6655_v57  ;;  %v7577_v57 = vunpack.i.h.bf16 %v10767_v2 }
 0x736   :  { %6658 = vmatprep.subr.bf16.mxu1 %v6657_v10  ;;  %v6681_v10 = vpack.c.bf16 %v3141_v42, %v3106_v33  ;;  %v12354_v33 = vunpack.i.h.bf16 %v10879_v24  ;;  %v12355_v42 = vunpack.i.h.bf16 %v10877_v46  ;;  %v3306_v24 = vpop.permute.xlu1 %3305 }
 0x737   :  { %v3175_v58 = vsel %vm749_vm4, %v7577_v57, %v7611_v8  ;;  %v3245_v8 = vsel %vm821_vm6, %v7587_v4, %v7621_v21  ;;  %v3316_v46 = vsel %vm893_vm7, %v3306_v24, %v11022_v34 }
 0x738   :  { %v3246_v35 = vsel %vm821_vm6, %v7621_v21, %v12354_v33  ;;  %v12368_v21 = vld [vmem:[#allocation23_spill] sm:$0xff] }
 0x739   :  { %6660 = vmatpush1.bf16.msra.mxu1 %v6659_v5  ;;  %v12353_v5 = vunpack.i.h.bf16 %v10865_v54  ;;  %v3210_v54 = vsel %vm785_vm3, %v7582_v1, %v7616_v23  ;;  %v12376_v33 = vld [vmem:[#allocation39_spill] sm:$0xff] }
 0x73a   :  { %3413 = vmatprep.subr.mxu1 %v3312_v14 }
 0x73b   :  { %v3211_v14 = vsel %vm785_vm3, %v7616_v23, %v12353_v5  ;;  %v3280_v23 = vsel %vm857_vm5, %v7592_v18, %v7626_v50  ;;  %v12371_v5 = vld [vmem:[#allocation29_spill] sm:$0xff] }
 0x73c   :  { %v6685_v37 = vpack.c.bf16 %v3211_v14, %v3176_v63  ;;  %v6691_v11 = vpack.c.bf16 %v3280_v23, %v3245_v8  ;;  %v12370_v63 = vld [vmem:[#allocation27_spill] sm:$0xff] }
 0x73d   :  { %3414 = vmatpush1.msra.mxu1 %v3311_v51  ;;  %v3281_v51 = vsel %vm857_vm5, %v7626_v50, %v12355_v42  ;;  %v12367_v50 = vld [vmem:[#allocation21_spill] sm:$0xff]  ;;  %v12372_v14 = vld [vmem:[#allocation31_spill] sm:$0xff]  ;;  %v12378_v42 = vunpack.i.l.bf16 %v10758_v9 }
 0x73e   :  { %5337 = vmatmul.mubr.msk.f32.vlgmr.msra.gmra.mrb[8].mxu1 %vm916_vm8, %v10997_v60  ;;  %6678 = vmatprep.subr.bf16.mxu1 %v6677_v20  ;;  %v6687_v20 = vpack.c.bf16 %v3210_v54, %v3175_v58  ;;  %v12373_v54 = vld [vmem:[#allocation33_spill] sm:$0xff]  ;;  %v12374_v58 = vld [vmem:[#allocation35_spill] sm:$0xff] }
 0x73f   :  { %6680 = vmatpush1.bf16.msra.mxu1 %v6679_v31  ;;  %3603 = vmatprep.mubr.f32.mxu1 %v12228_v17  ;;  %v6689_v31 = vpack.c.bf16 %v3281_v51, %v3246_v35  ;;  %v12377_v35 = vld [vmem:[#allocation40_spill] sm:$0xff]  ;;  %v3104_v51 = vsel %vm677_vm2, %v12378_v42, %v7567_v53 }
 0x740   :  { %6682 = vmatprep.subr.bf16.mxu1 %v6681_v10  ;;  %v3315_v10 = vsel %vm893_vm7, %v10849_v15, %v3306_v24 }
 0x743   :  { %6684 = vmatpush1.bf16.msra.mxu1 %v6683_v25  ;;  %v11061_v25 = vld [vmem:[%s11791_s7] sm:$0xff] }
 0x744   :  { %6686 = vmatprep.subr.bf16.mxu1 %v6685_v37  ;;  %5930 = vmatprep.mubr.msk.f32.mxu0 %vm2582_vm15, %v11061_v25  ;;  %v12375_v37 = vld [vmem:[#allocation37_spill] sm:$0xff] }
 0x747   :  { %6688 = vmatpush1.bf16.msra.mxu1 %v6687_v20  ;;  %v12379_v20 = vunpack.i.l.bf16 %v10769_v36  ;;  %v12382_v36 = vunpack.i.l.bf16 %v10779_v49 }
 0x748   :  { %6690 = vmatprep.subr.bf16.mxu1 %v6689_v31  ;;  %v12380_v31 = vunpack.i.l.bf16 %v10767_v2 }
 0x749   :  { %v3139_v23 = vsel %vm713_vm1, %v12379_v20, %v7572_v26  ;;  %v3244_v26 = vsel %vm821_vm6, %v12382_v36, %v7587_v4  ;;  %v12398_v20 = vld [vmem:[#allocation221_spill] sm:$0xff]  ;;  %v12401_v36 = vunpack.i.l.bf16 %v10760_v44  ;;  %v12409_v44 = vld [vmem:[#allocation235_spill] sm:$0xff] }
 0x74a   :  { %v6665_v8 = vpack.c.bf16 %v3139_v23, %v3104_v51  ;;  %v3174_v24 = vsel %vm749_vm4, %v12380_v31, %v7577_v57 }
 0x74b   :  { %6692 = vmatpush1.bf16.msra.mxu1 %v6691_v11  ;;  %v12381_v11 = vunpack.i.l.bf16 %v10781_v27  ;;  %v7496_v27 = vunpack.i.l.bf16 %v10652_v28 }
 0x74c   :  { %3555 = vmatprep.subr.mxu1 %v3316_v46  ;;  %v12383_v46 = vunpack.i.l.bf16 %v10818_v47 }
 0x74d   :  { %v3209_v9 = vsel %vm785_vm3, %v12381_v11, %v7582_v1 }
 0x74e   :  { %v6669_v53 = vpack.c.bf16 %v3209_v9, %v3174_v24  ;;  %v3279_v2 = vsel %vm857_vm5, %v12383_v46, %v7592_v18  ;;  %v7506_v18 = vunpack.i.l.bf16 %v10656_v45  ;;  %v12402_v46 = vld [vmem:[#allocation228_spill] sm:$0xff] }
 0x74f   :  { %3556 = vmatpush1.msra.mxu1 %v3315_v10  ;;  %v6673_v57 = vpack.c.bf16 %v3279_v2, %v3244_v26  ;;  %v7491_v10 = vunpack.i.l.bf16 %v10650_v19  ;;  %v3069_v26 = vsel %vm641_vm0, %v12401_v36, %v7562_v55  ;;  %v12403_v2 = vld [vmem:[#allocation229_spill] sm:$0xff]  ;;  %v12410_v55 = vld [vmem:[#allocation232_spill] sm:$0xff] }
 0x750   :  { %5339 = vmatmul.mubr.msk.f32.vlgmr.msra.gmra.mrb[10].mxu1 %vm916_vm8, %v10997_v60  ;;  %6706 = vmatprep.subr.bf16.mxu1 %v8374_v39  ;;  %v12356_v39 = vld [vmem:[#allocation2_spill] sm:$0xff]  ;;  %v3169_v23 = vsel %vm749_vm4, %v12398_v20, %v7506_v18 }
 0x751   :  { %6708 = vmatpush1.bf16.msra.mxu1 %v8376_v38  ;;  %v12357_v38 = vld [vmem:[#allocation3_spill] sm:$0xff] }
 0x752   :  { %6710 = vmatprep.subr.bf16.mxu1 %v8378_v40  ;;  %v12358_v40 = vld [vmem:[#allocation4_spill] sm:$0xff] }
 0x755   :  { %6712 = vmatpush1.bf16.msra.mxu1 %v8398_v59  ;;  %v12359_v59 = vld [vmem:[#allocation5_spill] sm:$0xff] }
 0x756   :  { %6714 = vmatprep.subr.bf16.mxu1 %v8401_v61  ;;  %v12360_v61 = vld [vmem:[#allocation7_spill] sm:$0xff] }
 0x759   :  { %6716 = vmatpush1.bf16.msra.mxu1 %v8416_v7  ;;  %v12361_v7 = vld [vmem:[#allocation9_spill] sm:$0xff] }
 0x75a   :  { %6718 = vmatprep.subr.bf16.mxu1 %v8419_v52  ;;  %v12362_v52 = vld [vmem:[#allocation11_spill] sm:$0xff] }
 0x75d   :  { %6720 = vmatpush1.bf16.msra.mxu1 %v8434_v22  ;;  %v12363_v22 = vld [vmem:[#allocation13_spill] sm:$0xff] }
 0x75e   :  { %6722 = vmatprep.subr.bf16.mxu1 %v8437_v12  ;;  %v12364_v12 = vld [vmem:[#allocation15_spill] sm:$0xff] }
 0x761   :  { %6724 = vmatpush1.bf16.msra.mxu1 %v8452_v29  ;;  %v12365_v29 = vld [vmem:[#allocation17_spill] sm:$0xff] }
 0x762   :  { %6726 = vmatprep.subr.bf16.mxu1 %v8455_v3  ;;  %v12366_v3 = vld [vmem:[#allocation19_spill] sm:$0xff] }
 0x765   :  { %6728 = vmatpush1.bf16.msra.mxu1 %v12356_v39 }
 0x766   :  { %6730 = vmatprep.subr.bf16.mxu1 %v12357_v38  ;;  %v12384_v38 = vunpack.i.h.bf16 %v10650_v19 }
 0x769   :  { %6732 = vmatpush1.bf16.msra.mxu1 %v12358_v40  ;;  %v3065_v40 = vsel %vm641_vm0, %v7491_v10, %v12384_v38  ;;  %v12407_v38 = vld [vmem:[#allocation233_spill] sm:$0xff] }
 0x76a   :  { %6734 = vmatprep.subr.bf16.mxu1 %v12359_v59  ;;  %v12385_v59 = vld [vmem:[#allocation216_spill] sm:$0xff] }
 0x76b   :  { %v3064_v4 = vsel %vm641_vm0, %v12385_v59, %v7491_v10  ;;  %v12404_v10 = vpack.c.bf16 %v12402_v46, %v12403_v2  ;;  %v12411_v59 = vpack.c.bf16 %v12409_v44, %v12410_v55 }
 0x76d   :  { %6736 = vmatpush1.bf16.msra.mxu1 %v12360_v61  ;;  %v12386_v61 = vld [vmem:[#allocation211_spill] sm:$0xff] }
 0x76e   :  { %6738 = vmatprep.subr.bf16.mxu1 %v12361_v7  ;;  %v6629_v47 = vpack.c.bf16 %v3065_v40, %v12386_v61  ;;  %v60_v7 = vld [vmem:[%s11791_s7 + $0x8] sm:$0xff]  ;;  %v12413_v61 = vld [vmem:[#allocation234_spill] sm:$0xff] }
 0x771   :  { %6740 = vmatpush1.bf16.msra.mxu1 %v12362_v52  ;;  %v12387_v52 = vunpack.i.h.bf16 %v10652_v28 }
 0x772   :  { %6742 = vmatprep.subr.bf16.mxu1 %v12363_v22  ;;  %v12388_v22 = vunpack.i.h.bf16 %v10632_v48 }
 0x773   :  { %v3100_v19 = vsel %vm677_vm2, %v7496_v27, %v12387_v52  ;;  %v12415_v52 = vld [vmem:[#allocation236_spill] sm:$0xff] }
 0x775   :  { %6744 = vmatpush1.bf16.msra.mxu1 %v12364_v12  ;;  %v12389_v12 = vunpack.i.l.bf16 %v10632_v48 }
 0x776   :  { %6746 = vmatprep.subr.bf16.mxu1 %v12365_v29 }
 0x777   :  { %v3135_v29 = vsel %vm713_vm1, %v12389_v12, %v12388_v22  ;;  %v12416_v22 = vld [vmem:[#allocation239_spill] sm:$0xff]  ;;  %vm12591_vm1 = vcmask 900096  }
 0x778   :  { %v6633_v28 = vpack.c.bf16 %v3135_v29, %v3100_v19  ;;  %v3314_v19 = vsel %vm893_vm7, %v12415_v52, %v10849_v15  ;;  %v12419_v29 = vld [vmem:[#allocation214_spill] sm:$0xff]  ;;  %v12421_v15 = vld [vmem:[#allocation240_spill] sm:$0xff] }
 0x779   :  { %6748 = vmatpush1.bf16.msra.mxu1 %v12366_v3  ;;  %v61_v3 = vld [vmem:[%s11791_s7 + $0x10] sm:$0xff] }
 0x77a   :  { %6750 = vmatprep.subr.bf16.mxu1 %v12367_v50  ;;  %v12390_v50 = vld [vmem:[#allocation210_spill] sm:$0xff] }
 0x77d   :  { %6752 = vmatpush1.bf16.msra.mxu1 %v12368_v21  ;;  %v6631_v21 = vpack.c.bf16 %v3064_v4, %v12390_v50  ;;  %v12412_v4 = vld [vmem:[#allocation238_spill] sm:$0xff]  ;;  %v12425_v50 = vld [vmem:[#allocation8_spill] sm:$0xff] }
 0x77e   :  { %6754 = vmatprep.subr.bf16.mxu1 %v12369_v56  ;;  %v12391_v56 = vld [vmem:[#allocation220_spill] sm:$0xff] }
 0x781   :  { %6756 = vmatpush1.bf16.msra.mxu1 %v12370_v63  ;;  %v3099_v63 = vsel %vm677_vm2, %v12391_v56, %v7496_v27  ;;  %v12427_v56 = vld [vmem:[#allocation12_spill] sm:$0xff] }
 0x782   :  { %6758 = vmatprep.subr.bf16.mxu1 %v12371_v5  ;;  %v12392_v5 = vunpack.i.h.bf16 %v10656_v45  ;;  %v12396_v45 = vunpack.i.l.bf16 %v10662_v32  ;;  %v12399_v32 = vld [vmem:[#allocation218_spill] sm:$0xff] }
 0x783   :  { %v6639_v11 = vpack.c.bf16 %v12399_v32, %v3169_v23  ;;  %v12441_v23 = vld [vmem:[#allocation41_spill] sm:$0xff] }
 0x784   :  { %v3170_v48 = vsel %vm749_vm4, %v7506_v18, %v12392_v5  ;;  %v3240_v42 = vsel %vm821_vm6, %v12396_v45, %v7517_v30  ;;  %v12430_v5 = vld [vmem:[#allocation18_spill] sm:$0xff]  ;;  %vm12592_vm4 = vmmov %vm12591_vm1  ;;  %vm12595_vm6 = vcmask 891904  }
 0x785   :  { %6760 = vmatpush1.bf16.msra.mxu1 %v12372_v14  ;;  %v12393_v14 = vunpack.i.h.bf16 %v10640_v13  ;;  %v12440_v45 = vld [vmem:[#allocation38_spill] sm:$0xff] }
 0x786   :  { %6762 = vmatprep.subr.bf16.mxu1 %v12373_v54  ;;  %v12394_v54 = vunpack.i.l.bf16 %v10640_v13  ;;  %v12397_v13 = vunpack.i.l.bf16 %v10660_v43 }
 0x788   :  { %v3275_v51 = vsel %vm857_vm5, %v12397_v13, %v7522_v41  ;;  %v12400_v41 = vld [vmem:[#allocation222_spill] sm:$0xff] }
 0x789   :  { %6764 = vmatpush1.bf16.msra.mxu1 %v12374_v58  ;;  %v3205_v58 = vsel %vm785_vm3, %v12394_v54, %v12393_v14  ;;  %v6641_v24 = vpack.c.bf16 %v3275_v51, %v3240_v42  ;;  %v3310_v9 = vsel %vm893_vm7, %v12400_v41, %v10664_v6  ;;  %v12433_v14 = vld [vmem:[#allocation24_spill] sm:$0xff] }
 0x78a   :  { %6766 = vmatprep.subr.bf16.mxu1 %v12375_v37  ;;  %v62_v37 = vld [vmem:[%s11791_s7 + $0x18] sm:$0x7]  ;;  %v6637_v31 = vpack.c.bf16 %v3205_v58, %v3170_v48  ;;  %v12431_v48 = vld [vmem:[#allocation20_spill] sm:$0xff]  ;;  %v12436_v58 = vld [vmem:[#allocation30_spill] sm:$0xff] }
 0x78b   :  { %v12435_v54 = vld [vmem:[#allocation28_spill] sm:$0xff] }
 0x78d   :  { %6768 = vmatpush1.bf16.msra.mxu1 %v12376_v33  ;;  %v12395_v33 = vld [vmem:[#allocation217_spill] sm:$0xff] }
 0x78e   :  { %6770 = vmatprep.subr.bf16.mxu1 %v12377_v35  ;;  %v6635_v35 = vpack.c.bf16 %v12395_v33, %v3099_v63  ;;  %v12428_v63 = vld [vmem:[#allocation14_spill] sm:$0xff] }
 0x78f   :  { %v12438_v33 = vld [vmem:[#allocation34_spill] sm:$0xff] }
 0x7ff   :  { %v5925_v39 = vpop.f32.mrb[6].mxu1 }
 0x800   :  { %v2755_v1 = vpop.f32.mrb[7].mxu1 }
 0x801   :  { %v6625_v49 = vpack.c.bf16 %v5925_v39, %v2755_v1  ;;  %v12405_v39 = vld [vmem:[#allocation213_spill] sm:$0xff]  ;;  %v12406_v1 = vld [vmem:[#allocation212_spill] sm:$0xff] }
 0x802   :  { %v6661_v27 = vpack.c.bf16 %v3069_v26, %v12405_v39  ;;  %v6663_v40 = vpack.c.bf16 %v12407_v38, %v12406_v1 }
 0x803   :  { %6626 = vmatprep.subr.bf16.mxu0 %v6625_v49 }
 0x804   :  { %6628 = vmatpush3.bf16.msra.mxu0 %v6625_v49  ;;  %v12408_v49 = vld [vmem:[#allocation223_spill] sm:$0xff] }
 0x805   :  { %6630 = vmatprep.subr.bf16.mxu0 %v6629_v47  ;;  %v3309_v6 = vsel %vm893_vm7, %v12408_v49, %v12400_v41  ;;  %v12414_v47 = vpack.c.bf16 %v12412_v4, %v12413_v61 }
 0x807   :  { %5931 = vmatmul.mubr.msk.f32.vlgmr.msra.gmra.mrb[32].mxu0 %vm2582_vm15, %v60_v7 }
 0x808   :  { %6632 = vmatpush1.bf16.msra.mxu0 %v6631_v21  ;;  %5933 = vmatprep.mubr.msk.f32.mxu0 %vm2582_vm15, %v61_v3  ;;  %v6694_v3 = vpack.c.bf16 %v7597_v62, %v12419_v29  ;;  %v12424_v62 = vld [vmem:[#allocation6_spill] sm:$0xff] }
 0x809   :  { %6634 = vmatprep.subr.bf16.mxu0 %v6633_v28  ;;  %v12426_v21 = vld [vmem:[#allocation10_spill] sm:$0xff]  ;;  %v12429_v28 = vld [vmem:[#allocation16_spill] sm:$0xff] }
 0x80a   :  { %v12446_v29 = vld [vmem:[#allocation46_spill] sm:$0xff] }
 0x80b   :  { %5934 = vmatmul.mubr.msk.f32.gmra.mrb[34].mxu0 %vm2582_vm15, %v62_v37  ;;  %v12437_v37 = vld [vmem:[#allocation32_spill] sm:$0xff] }
 0x80c   :  { %6636 = vmatpush1.bf16.msra.mxu0 %v6635_v35  ;;  %3390 = vmatprep.mubr.f32.mxu0 %v12228_v17  ;;  %v12439_v35 = vld [vmem:[#allocation36_spill] sm:$0xff] }
 0x80d   :  { %6638 = vmatprep.subr.bf16.mxu0 %v6637_v31 }
 0x810   :  { %6640 = vmatpush1.bf16.msra.mxu0 %v6639_v11 }
 0x811   :  { %v11155_v30 = vpop.f32.mrb[8].mxu1  ;;  %6642 = vmatprep.subr.bf16.mxu0 %v6641_v24 }
 0x812   :  { %v3465_v43 = vpop.f32.mrb[9].mxu1 }
 0x813   :  { %v3466_v31 = vadd.f32 %v3465_v43, %v12441_v23 }
 0x814   :  { %6644 = vmatpush1.bf16.msra.mxu0 %v12404_v10 }
 0x815   :  { %3342 = vmatprep.subr.mxu0 %v3310_v9  ;;  %v5344_v24 = vmul.f32 -1.442695, %v3466_v31 }
 0x817   :  { %7780 = vpow2.f32 %v5344_v24  ;;  %v12465_v24 = vld [vmem:[#allocation65_spill] sm:$0xff] }
 0x818   :  { %3343 = vmatpush1.msra.mxu0 %v3309_v6 }
 0x819   :  { %5336 = vmatmul.mubr.msk.f32.vlgmr.msra.gmra.mrb[36].mxu0 %vm916_vm8, %v10997_v60  ;;  %6662 = vmatprep.subr.bf16.mxu0 %v6661_v27 }
 0x81a   :  { %6664 = vmatpush1.bf16.msra.mxu0 %v6663_v40  ;;  %3532 = vmatprep.mubr.f32.mxu0 %v12228_v17  ;;  %v3464_v40 = vadd.f32 %v11155_v30, %v12441_v23  ;;  %v12443_v30 = vld [vmem:[#allocation43_spill] sm:$0xff] }
 0x81b   :  { %6666 = vmatprep.subr.bf16.mxu0 %v6665_v8  ;;  %v12417_v8 = vld [vmem:[#allocation237_spill] sm:$0xff] }
 0x81c   :  { %v12418_v12 = vpack.c.bf16 %v12416_v22, %v12417_v8  ;;  %v5343_v55 = vmul.f32 -1.442695, %v3464_v40  ;;  %v12444_v8 = vld [vmem:[#allocation44_spill] sm:$0xff] }
 0x81e   :  { %6668 = vmatpush1.bf16.msra.mxu0 %v12411_v59 }
 0x81f   :  { %6670 = vmatprep.subr.bf16.mxu0 %v6669_v53  ;;  %v3313_v53 = vsel %vm893_vm7, %v10725_v0, %v12415_v52  ;;  %v12422_v0 = vld [vmem:[#allocation241_spill] sm:$0xff]  ;;  %vm12596_vm7 = vmmov %vm12595_vm6 }
 0x821   :  { %v7781_v46 = vpop.eup %7780 }
 0x822   :  { %6672 = vmatpush1.bf16.msra.mxu0 %v12414_v47  ;;  %v3710_v39 = vadd.f32 1.0, %v7781_v46 }
 0x823   :  { %v11183_v18 = vpop.f32.mrb[10].mxu1  ;;  %6674 = vmatprep.subr.bf16.mxu0 %v6673_v57  ;;  %v12420_v57 = vmov 0.0|0.0  }
 0x824   :  { %v11185_v7 = vpop.f32.mrb[11].mxu1 }
 0x826   :  { %6676 = vmatpush1.bf16.msra.mxu0 %v12418_v12  ;;  %v12445_v12 = vld [vmem:[#allocation45_spill] sm:$0xff] }
 0x827   :  { %3484 = vmatprep.subr.mxu0 %v3314_v19  ;;  %v12442_v19 = vld [vmem:[#allocation42_spill] sm:$0xff] }
 0x82a   :  { %3485 = vmatpush1.msra.mxu0 %v3313_v53 }
 0x82b   :  { %5338 = vmatmul.mubr.msk.f32.vlgmr.msra.gmra.mrb[38].mxu0 %vm916_vm8, %v10997_v60  ;;  %6693 = vmatprep.subr.bf16.mxu0 %v12420_v57 }
 0x82c   :  { %6695 = vmatpush3.bf16.msra.mxu0 %v6694_v3  ;;  %5954 = vmatprep.mubr.msk.f32.mxu0 %vm7901_vm9, %v12228_v17  ;;  %v12447_v3 = vld [vmem:[#allocation47_spill] sm:$0xff] }
 0x82d   :  { %6696 = vmatprep.subr.bf16.mxu0 %v12420_v57 }
 0x830   :  { %6698 = vmatpush3.bf16.msra.mxu0 %v12421_v15  ;;  %v12448_v15 = vld [vmem:[#allocation48_spill] sm:$0xff] }
 0x831   :  { %6699 = vmatprep.subr.bf16.mxu0 %v12420_v57 }
 0x834   :  { %6701 = vmatpush3.bf16.msra.mxu0 %v12422_v0  ;;  %v12449_v0 = vld [vmem:[#allocation49_spill] sm:$0xff] }
 0x835   :  { %6702 = vmatprep.subr.bf16.mxu0 %v12420_v57 }
 0x838   :  { %6704 = vmatpush3.bf16.msra.mxu0 %v12423_v16  ;;  %v12450_v16 = vld [vmem:[#allocation50_spill] sm:$0xff] }
 0x839   :  { %5952 = vmatprep.subr.mxu0 %v12228_v17 }
 0x83c   :  { %5953 = vmatpush3.msra.mxu0 %v11022_v34  ;;  %v12432_v34 = vld [vmem:[#allocation22_spill] sm:$0xff] }
 0x83d   :  { %5955 = vmatmul.mubr.msk.f32.vlgmr.msra.gmra.mrb[40].mxu0 %vm916_vm8, %v10997_v60  ;;  %6972 = vmatprep.subr.bf16.mxu0 %v12424_v62  ;;  %v12434_v60 = vld [vmem:[#allocation26_spill] sm:$0xff]  ;;  %v12451_v62 = vld [vmem:[#allocation51_spill] sm:$0xff] }
 0x83e   :  { %6974 = vmatpush3.bf16.msra.mxu0 %v12425_v50 }
 0x83f   :  { %6976 = vmatprep.subr.bf16.mxu0 %v12426_v21  ;;  %v12452_v21 = vld [vmem:[#allocation52_spill] sm:$0xff] }
 0x842   :  { %6978 = vmatpush3.bf16.msra.mxu0 %v12427_v56  ;;  %v12453_v56 = vld [vmem:[#allocation53_spill] sm:$0xff] }
 0x843   :  { %6980 = vmatprep.subr.bf16.mxu0 %v12428_v63 }
 0x846   :  { %6982 = vmatpush3.bf16.msra.mxu0 %v12429_v28 }
 0x847   :  { %6984 = vmatprep.subr.bf16.mxu0 %v12430_v5  ;;  %v12454_v5 = vld [vmem:[#allocation54_spill] sm:$0xff] }
 0x84a   :  { %6986 = vmatpush3.bf16.msra.mxu0 %v12431_v48  ;;  %v12455_v48 = vld [vmem:[#allocation55_spill] sm:$0xff] }
 0x84b   :  { %6988 = vmatprep.subr.bf16.mxu0 %v12432_v34  ;;  %v12456_v34 = vld [vmem:[#allocation56_spill] sm:$0xff] }
 0x84e   :  { %6990 = vmatpush3.bf16.msra.mxu0 %v12433_v14  ;;  %v12457_v14 = vld [vmem:[#allocation57_spill] sm:$0xff] }
 0x84f   :  { %6992 = vmatprep.subr.bf16.mxu0 %v12434_v60 }
 0x852   :  { %6994 = vmatpush3.bf16.msra.mxu0 %v12435_v54  ;;  %v12458_v54 = vld [vmem:[#allocation58_spill] sm:$0xff] }
 0x853   :  { %6996 = vmatprep.subr.bf16.mxu0 %v12436_v58  ;;  %v12459_v58 = vld [vmem:[#allocation59_spill] sm:$0xff] }
 0x856   :  { %6998 = vmatpush3.bf16.msra.mxu0 %v12437_v37  ;;  %v12460_v37 = vld [vmem:[#allocation60_spill] sm:$0xff] }
 0x857   :  { %7000 = vmatprep.subr.bf16.mxu0 %v12438_v33  ;;  %v12461_v33 = vld [vmem:[#allocation61_spill] sm:$0xff] }
 0x85a   :  { %7002 = vmatpush3.bf16.msra.mxu0 %v12439_v35  ;;  %v12462_v35 = vld [vmem:[#allocation62_spill] sm:$0xff] }
 0x85b   :  { %7004 = vmatprep.subr.bf16.mxu0 %v12440_v45  ;;  %v12463_v45 = vld [vmem:[#allocation63_spill] sm:$0xff] }
 0x8da   :  { %v11231_v42 = vpop.f32.mrb[32].mxu0 }
 0x8db   :  { %v11233_v13 = vpop.f32.mrb[33].mxu0 }
 0x8de   :  { %v11235_v51 = vpop.f32.mrb[34].mxu0 }
 0x8df   :  { %v11237_v20 = vpop.f32.mrb[35].mxu0 }
 0x8ec   :  { %v3392_v32 = vpop.f32.mrb[36].mxu0 }
 0x8ed   :  { %v3393_v11 = vadd.f32 %v3392_v32, %v12441_v23  ;;  %v3394_v41 = vpop.f32.mrb[37].mxu0 }
 0x8ee   :  { %v3395_v9 = vadd.f32 %v3394_v41, %v12441_v23  ;;  %v12467_v41 = vld [vmem:[#allocation67_spill] sm:$0xff] }
 0x8ef   :  { %v5341_v36 = vmul.f32 -1.442695, %v3393_v11 }
 0x8f0   :  { %v5342_v26 = vmul.f32 -1.442695, %v3395_v9 }
 0x8f1   :  { %7782 = vpow2.f32 %v5341_v36  ;;  %v12468_v36 = vld [vmem:[#allocation68_spill] sm:$0xff] }
 0x8f2   :  { %7784 = vpow2.f32 %v5342_v26  ;;  %v12469_v26 = vld [vmem:[#allocation69_spill] sm:$0xff] }
 0x8fb   :  { %v7783_v2 = vpop.eup %7782 }
 0x8fc   :  { %v7785_v10 = vpop.eup %7784  ;;  %v3707_v27 = vadd.f32 1.0, %v7783_v2 }
 0x8fd   :  { %v3708_v1 = vadd.f32 1.0, %v7785_v10 }
 0x8fe   :  { %7786 = vrcp.f32 %v3707_v27  ;;  %v3534_v43 = vpop.f32.mrb[38].mxu0  ;;  %v12471_v27 = vld [vmem:[#allocation71_spill] sm:$0xff] }
 0x8ff   :  { %7788 = vrcp.f32 %v3708_v1  ;;  %v3536_v38 = vpop.f32.mrb[39].mxu0  ;;  %v3535_v32 = vadd.f32 %v3534_v43, %v12441_v23 }
 0x900   :  { %7790 = vrcp.f32 %v3710_v39  ;;  %v11245_v49 = vadd.f32 %v3536_v38, %v12441_v23  ;;  %v12470_v39 = vld [vmem:[#allocation70_spill] sm:$0xff]  ;;  %v12472_v38 = vld [vmem:[#allocation72_spill] sm:$0xff] }
 0x901   :  { %7792 = vpow2.f32 %v5343_v55  ;;  %v5345_v2 = vmul.f32 -1.442695, %v3535_v32  ;;  %v12475_v55 = vld [vmem:[#allocation75_spill] sm:$0xff] }
 0x902   :  { %v5346_v47 = vmul.f32 -1.442695, %v11245_v49 }
 0x904   :  { %7794 = vpow2.f32 %v5346_v47  ;;  %v12480_v47 = vld [vmem:[#allocation80_spill] sm:$0xff] }
 0x908   :  { %v7787_v6 = vpop.eup %7786 }
 0x909   :  { %v7789_v44 = vpop.eup %7788  ;;  %v3734_v61 = vmul.f32 %v7787_v6, %v3393_v11  ;;  %v12466_v11 = vld [vmem:[#allocation66_spill] sm:$0xff]  ;;  %v12473_v6 = vld [vmem:[#allocation73_spill] sm:$0xff] }
 0x90a   :  { %v7791_v59 = vpop.eup %7790  ;;  %v3735_v4 = vmul.f32 %v7789_v44, %v3395_v9  ;;  %v3608_v9 = vadd.f32 %v11185_v7, %v12441_v23  ;;  %v12474_v44 = vld [vmem:[#allocation74_spill] sm:$0xff] }
 0x90b   :  { %v3737_v52 = vmul.f32 %v7791_v59, %v3466_v31  ;;  %v7793_v50 = vpop.eup %7792  ;;  %v12464_v31 = vld [vmem:[#allocation64_spill] sm:$0xff] }
 0x90c   :  { %3810 = vmatprep.mubr.f32.mxu1 %v3735_v4  ;;  %4165 = vmatprep.mubr.f32.mxu0 %v3735_v4  ;;  %v3709_v28 = vadd.f32 1.0, %v7793_v50  ;;  %v5348_v43 = vmul.f32 -1.442695, %v3608_v9  ;;  %v12476_v59 = vld [vmem:[#allocation76_spill] sm:$0xff]  ;;  %v12477_v4 = vld [vmem:[#allocation77_spill] sm:$0xff]  ;;  %v12490_v50 = vld [vmem:[#allocation90_spill] sm:$0xff] }
 0x90d   :  { %3811 = vmatmul.mubr.f32.vlgmr.msra.gmra.mrb[12].mxu1 %v3734_v61  ;;  %4166 = vmatmul.mubr.f32.vlgmr.msra.gmra.mrb[42].mxu0 %v3734_v61  ;;  %v12479_v61 = vld [vmem:[#allocation79_spill] sm:$0xff] }
 0x90e   :  { %6772 = vmatpush1.bf16.msra.mxu1 %v12442_v19  ;;  %7006 = vmatpush3.bf16.msra.mxu0 %v12443_v30  ;;  %v7795_v63 = vpop.eup %7794  ;;  %7796 = vrcp.f32 %v3709_v28  ;;  %v12483_v19 = vld [vmem:[#allocation83_spill] sm:$0xff]  ;;  %v12494_v28 = vld [vmem:[#allocation94_spill] sm:$0xff] }
 0x90f   :  { %3881 = vmatprep.mubr.f32.mxu1 %v3737_v52  ;;  %4235 = vmatprep.mubr.f32.mxu0 %v3737_v52  ;;  %v3712_v60 = vadd.f32 1.0, %v7795_v63  ;;  %v12481_v52 = vld [vmem:[#allocation81_spill] sm:$0xff] }
 0x910   :  { %v11250_v22 = vpop.f32.mrb[40].mxu0  ;;  %6774 = vmatprep.subr.bf16.mxu1 %v12444_v8  ;;  %7008 = vmatprep.subr.bf16.mxu0 %v12445_v12  ;;  %v12484_v8 = vld [vmem:[#allocation84_spill] sm:$0xff]  ;;  %v12485_v12 = vld [vmem:[#allocation85_spill] sm:$0xff] }
 0x911   :  { %v5956_v53 = vpop.f32.mrb[41].mxu0  ;;  %7798 = vrcp.f32 %v3712_v60  ;;  %v12493_v63 = vld [vmem:[#allocation93_spill] sm:$0xff]  ;;  %v12498_v60 = vld [vmem:[#allocation98_spill] sm:$0xff] }
 0x912   :  { %6776 = vmatpush1.bf16.msra.mxu1 %v12446_v29  ;;  %7010 = vmatpush3.bf16.msra.mxu0 %v12447_v3  ;;  %7800 = vpow2.f32 %v5345_v2  ;;  %v12486_v3 = vld [vmem:[#allocation86_spill] sm:$0xff]  ;;  %v12507_v2 = vld [vmem:[#allocation107_spill] sm:$0xff] }
 0x913   :  { %6778 = vmatprep.subr.bf16.mxu1 %v12448_v15  ;;  %7012 = vmatprep.subr.bf16.mxu0 %v12449_v0  ;;  %7802 = vpow2.f32 %v5348_v43  ;;  %v12487_v15 = vld [vmem:[#allocation87_spill] sm:$0xff]  ;;  %v12488_v0 = vld [vmem:[#allocation88_spill] sm:$0xff]  ;;  %v12513_v43 = vld [vmem:[#allocation113_spill] sm:$0xff] }
 0x916   :  { %6780 = vmatpush1.bf16.msra.mxu1 %v12450_v16  ;;  %7014 = vmatpush3.bf16.msra.mxu0 %v12451_v62  ;;  %v12489_v16 = vld [vmem:[#allocation89_spill] sm:$0xff] }
 0x917   :  { %6782 = vmatprep.subr.bf16.mxu1 %v12452_v21  ;;  %7016 = vmatprep.subr.bf16.mxu0 %v12453_v56  ;;  %v12491_v21 = vld [vmem:[#allocation91_spill] sm:$0xff]  ;;  %v12492_v56 = vld [vmem:[#allocation92_spill] sm:$0xff] }
 0x918   :  { %v7797_v46 = vpop.eup %7796 }
 0x919   :  { %v3736_v1 = vmul.f32 %v7797_v46, %v3464_v40  ;;  %v12478_v40 = vld [vmem:[#allocation78_spill] sm:$0xff] }
 0x91a   :  { %6784 = vmatpush1.bf16.msra.mxu1 %v12454_v5  ;;  %7018 = vmatpush3.bf16.msra.mxu0 %v12455_v48  ;;  %v12495_v5 = vld [vmem:[#allocation95_spill] sm:$0xff]  ;;  %v12496_v48 = vld [vmem:[#allocation96_spill] sm:$0xff]  ;;  %v12506_v46 = vld [vmem:[#allocation106_spill] sm:$0xff] }
 0x91b   :  { %6786 = vmatprep.subr.bf16.mxu1 %v12456_v34  ;;  %7020 = vmatprep.subr.bf16.mxu0 %v12457_v14  ;;  %v7799_v10 = vpop.eup %7798  ;;  %v12497_v34 = vld [vmem:[#allocation97_spill] sm:$0xff]  ;;  %v3606_v14 = vadd.f32 %v11183_v18, %v12441_v23 }
 0x91c   :  { %v3739_v7 = vmul.f32 %v7799_v10, %v11245_v49  ;;  %v12482_v49 = vld [vmem:[#allocation82_spill] sm:$0xff]  ;;  %v7801_v30 = vpop.eup %7800  ;;  %v12505_v18 = vld [vmem:[#allocation105_spill] sm:$0xff] }
 0x91d   :  { %v7803_v53 = vpop.eup %7802  ;;  %v3711_v29 = vadd.f32 1.0, %v7801_v30  ;;  %v12509_v10 = vld [vmem:[#allocation109_spill] sm:$0xff]  ;;  %v12526_v30 = vld [vmem:[#allocation126_spill] sm:$0xff] }
 0x91e   :  { %6788 = vmatpush1.bf16.msra.mxu1 %v12458_v54  ;;  %7022 = vmatpush3.bf16.msra.mxu0 %v12459_v58  ;;  %v3714_v62 = vadd.f32 1.0, %v7803_v53  ;;  %v12499_v54 = vld [vmem:[#allocation99_spill] sm:$0xff]  ;;  %v12500_v58 = vld [vmem:[#allocation100_spill] sm:$0xff] }
 0x91f   :  { %6790 = vmatprep.subr.bf16.mxu1 %v12460_v37  ;;  %7024 = vmatprep.subr.bf16.mxu0 %v12461_v33  ;;  %7804 = vrcp.f32 %v3711_v29  ;;  %v12501_v37 = vld [vmem:[#allocation101_spill] sm:$0xff]  ;;  %v12528_v53 = vld [vmem:[#allocation128_spill] sm:$0xff] }
 0x920   :  { %7806 = vrcp.f32 %v3714_v62  ;;  %v12529_v29 = vld [vmem:[#allocation129_spill] sm:$0xff] }
 0x922   :  { %6792 = vmatpush1.bf16.msra.mxu1 %v12462_v35  ;;  %7026 = vmatpush3.bf16.msra.mxu0 %v12463_v45  ;;  %v5347_v45 = vmul.f32 -1.442695, %v3606_v14 }
 0x923   :  { %6794 = vmatprep.subr.bf16.mxu1 %v12464_v31  ;;  %7028 = vmatprep.subr.bf16.mxu0 %v12465_v24  ;;  %v12502_v31 = vld [vmem:[#allocation102_spill] sm:$0xff]  ;;  %v12503_v24 = vld [vmem:[#allocation103_spill] sm:$0xff] }
 0x924   :  { %7808 = vpow2.f32 %v5347_v45  ;;  %v12546_v45 = vld [vmem:[#allocation146_spill] sm:$0xff] }
 0x926   :  { %6796 = vmatpush1.bf16.msra.mxu1 %v12466_v11  ;;  %7030 = vmatpush3.bf16.msra.mxu0 %v12467_v41  ;;  %v12504_v41 = vld [vmem:[#allocation104_spill] sm:$0xff] }
 0x927   :  { %6798 = vmatprep.subr.bf16.mxu1 %v12468_v36  ;;  %7032 = vmatprep.subr.bf16.mxu0 %v12469_v26  ;;  %v3677_v26 = vadd.f32 %v11250_v22, %v12441_v23  ;;  %v12514_v23 = vld [vmem:[#allocation114_spill] sm:$0xff]  ;;  %v12515_v22 = vld [vmem:[#allocation115_spill] sm:$0xff] }
 0x929   :  { %v7805_v33 = vpop.eup %7804 }
 0x92a   :  { %6800 = vmatpush1.bf16.msra.mxu1 %v12470_v39  ;;  %7034 = vmatpush3.bf16.msra.mxu0 %v12471_v27  ;;  %v7807_v35 = vpop.eup %7806  ;;  %v11318_v11 = vmul.f32 %v7805_v33, %v3535_v32  ;;  %v12508_v32 = vld [vmem:[#allocation108_spill] sm:$0xff]  ;;  %v12510_v39 = vld [vmem:[#allocation110_spill] sm:$0xff]  ;;  %v12511_v27 = vld [vmem:[#allocation111_spill] sm:$0xff] }
 0x92b   :  { %6802 = vmatprep.subr.bf16.mxu1 %v12472_v38  ;;  %7036 = vmatprep.subr.bf16.mxu0 %v12473_v6  ;;  %v11322_v36 = vmul.f32 %v7807_v35, %v3608_v9  ;;  %v5349_v9 = vmul.f32 -1.442695, %v3677_v26  ;;  %v12516_v38 = vld [vmem:[#allocation116_spill] sm:$0xff]  ;;  %v12545_v35 = vld [vmem:[#allocation145_spill] sm:$0xff] }
 0x92c   :  { %v12544_v33 = vld [vmem:[#allocation144_spill] sm:$0xff] }
 0x92d   :  { %4236 = vmatmul.mubr.f32.vlgmr.msra.gmra.mrb[44].mxu0 %v3736_v1  ;;  %7810 = vpow2.f32 %v5349_v9  ;;  %v12556_v9 = vld [vmem:[#allocation156_spill] sm:$0xff] }
 0x92e   :  { %6804 = vmatpush1.bf16.msra.mxu1 %v12474_v44  ;;  %7038 = vmatpush3.bf16.msra.mxu0 %v12475_v55  ;;  %v7809_v6 = vpop.eup %7808  ;;  %v12518_v44 = vld [vmem:[#allocation118_spill] sm:$0xff] }
 0x92f   :  { %4305 = vmatprep.mubr.f32.mxu0 %v3739_v7  ;;  %6806 = vmatprep.subr.bf16.mxu1 %v12476_v59  ;;  %v3713_v55 = vadd.f32 1.0, %v7809_v6  ;;  %v12519_v59 = vld [vmem:[#allocation119_spill] sm:$0xff]  ;;  %v12564_v6 = vld [vmem:[#allocation164_spill] sm:$0xff] }
 0x930   :  { %7040 = vmatprep.subr.bf16.mxu0 %v12477_v4  ;;  %v12520_v4 = vld [vmem:[#allocation120_spill] sm:$0xff] }
 0x931   :  { %7812 = vrcp.f32 %v3713_v55  ;;  %v12569_v55 = vld [vmem:[#allocation169_spill] sm:$0xff] }
 0x932   :  { %6808 = vmatpush1.bf16.msra.mxu1 %v12478_v40  ;;  %7042 = vmatpush3.bf16.msra.mxu0 %v12479_v61  ;;  %v12521_v40 = vld [vmem:[#allocation121_spill] sm:$0xff]  ;;  %v12522_v61 = vld [vmem:[#allocation122_spill] sm:$0xff] }
 0x933   :  { %6810 = vmatprep.subr.bf16.mxu1 %v12480_v47  ;;  %7044 = vmatprep.subr.bf16.mxu0 %v12481_v52  ;;  %v12523_v47 = vld [vmem:[#allocation123_spill] sm:$0xff]  ;;  %v12524_v52 = vld [vmem:[#allocation124_spill] sm:$0xff] }
 0x936   :  { %6812 = vmatpush1.bf16.msra.mxu1 %v12482_v49  ;;  %7046 = vmatpush3.bf16.msra.mxu0 %v12483_v19  ;;  %v12525_v19 = vld [vmem:[#allocation125_spill] sm:$0xff] }
 0x937   :  { %6814 = vmatprep.subr.bf16.mxu1 %v12484_v8  ;;  %7048 = vmatprep.subr.bf16.mxu0 %v12485_v12  ;;  %v7811_v49 = vpop.eup %7810  ;;  %v12527_v12 = vld [vmem:[#allocation127_spill] sm:$0xff] }
 0x938   :  { %v3715_v8 = vadd.f32 1.0, %v7811_v49  ;;  %v12576_v49 = vld [vmem:[#allocation176_spill] sm:$0xff] }
 0x93a   :  { %6816 = vmatpush1.bf16.msra.mxu1 %v12486_v3  ;;  %7050 = vmatpush3.bf16.msra.mxu0 %v12487_v15  ;;  %v12530_v3 = vld [vmem:[#allocation130_spill] sm:$0xff]  ;;  %7814 = vrcp.f32 %v3715_v8  ;;  %v12531_v15 = vld [vmem:[#allocation131_spill] sm:$0xff] }
 0x93b   :  { %6818 = vmatprep.subr.bf16.mxu1 %v12488_v0  ;;  %7052 = vmatprep.subr.bf16.mxu0 %v12489_v16  ;;  %v12532_v0 = vld [vmem:[#allocation132_spill] sm:$0xff]  ;;  %v12533_v16 = vld [vmem:[#allocation133_spill] sm:$0xff]  ;;  %v7813_v62 = vpop.eup %7812  ;;  %v12579_v8 = vld [vmem:[#allocation179_spill] sm:$0xff] }
 0x93e   :  { %6820 = vmatpush1.bf16.msra.mxu1 %v12490_v50  ;;  %7054 = vmatpush3.bf16.msra.mxu0 %v12491_v21  ;;  %v12534_v50 = vld [vmem:[#allocation134_spill] sm:$0xff]  ;;  %v12535_v21 = vld [vmem:[#allocation135_spill] sm:$0xff] }
 0x93f   :  { %6822 = vmatprep.subr.bf16.mxu1 %v12492_v56  ;;  %7056 = vmatprep.subr.bf16.mxu0 %v12493_v63  ;;  %v12536_v56 = vld [vmem:[#allocation136_spill] sm:$0xff]  ;;  %v3740_v63 = vmul.f32 %v7813_v62, %v3606_v14  ;;  %v12543_v14 = vld [vmem:[#allocation142_spill] sm:$0xff]  ;;  %v12587_v62 = vld [vmem:[#allocation187_spill] sm:$0xff] }
 0x942   :  { %6824 = vmatpush1.bf16.msra.mxu1 %v12494_v28  ;;  %7058 = vmatpush3.bf16.msra.mxu0 %v12495_v5  ;;  %v12537_v28 = vld [vmem:[#allocation137_spill] sm:$0xff]  ;;  %v12538_v5 = vld [vmem:[#allocation138_spill] sm:$0xff] }
 0x943   :  { %6826 = vmatprep.subr.bf16.mxu1 %v12496_v48  ;;  %7060 = vmatprep.subr.bf16.mxu0 %v12497_v34  ;;  %v12539_v48 = vld [vmem:[#allocation139_spill] sm:$0xff] }
 0x944   :  { %v7815_v34 = vpop.eup %7814 }
 0x946   :  { %6828 = vmatpush1.bf16.msra.mxu1 %v12498_v60  ;;  %7062 = vmatpush3.bf16.msra.mxu0 %v12499_v54  ;;  %v12540_v60 = vld [vmem:[#allocation140_spill] sm:$0xff]  ;;  %v12541_v54 = vld [vmem:[#allocation141_spill] sm:$0xff] }
 0x947   :  { %6830 = vmatprep.subr.bf16.mxu1 %v12500_v58  ;;  %7064 = vmatprep.subr.bf16.mxu0 %v12501_v37  ;;  %v3742_v37 = vmul.f32 %v7815_v34, %v3677_v26  ;;  %v12552_v26 = vld [vmem:[#allocation152_spill] sm:$0xff]  ;;  %v7883_v58 = vld [vmem:[%s11789_s5 + $0x8] sm:$0xff] }
 0x94a   :  { %6832 = vmatpush1.bf16.msra.mxu1 %v12502_v31  ;;  %7066 = vmatpush3.bf16.msra.mxu0 %v12503_v24  ;;  %v12547_v31 = vld [vmem:[#allocation147_spill] sm:$0xff]  ;;  %v12548_v24 = vld [vmem:[#allocation148_spill] sm:$0xff] }
 0x94b   :  { %6834 = vmatprep.subr.bf16.mxu1 %v12504_v41  ;;  %7068 = vmatprep.subr.bf16.mxu0 %v12505_v18  ;;  %v12549_v41 = vld [vmem:[#allocation149_spill] sm:$0xff]  ;;  %v12550_v18 = vld [vmem:[#allocation150_spill] sm:$0xff] }
 0x94d   :  { %3882 = vmatmul.mubr.f32.vlgmr.msra.gmra.mrb[12].mxu1 %v3736_v1  ;;  %4306 = vmatmul.mubr.f32.vlgmr.msra.gmra.mrb[46].mxu0 %v11318_v11  ;;  %v12512_v1 = vld [vmem:[#allocation112_spill] sm:$0xff] }
 0x94e   :  { %6836 = vmatpush1.bf16.msra.mxu1 %v12506_v46  ;;  %3952 = vmatprep.mubr.f32.mxu1 %v3739_v7  ;;  %v12517_v7 = vld [vmem:[#allocation117_spill] sm:$0xff]  ;;  %v12551_v46 = vld [vmem:[#allocation151_spill] sm:$0xff] }
 0x94f   :  { %7070 = vmatpush3.bf16.msra.mxu0 %v12507_v2  ;;  %4375 = vmatprep.mubr.f32.mxu0 %v11322_v36  ;;  %v12553_v2 = vld [vmem:[#allocation153_spill] sm:$0xff] }
 0x950   :  { %6838 = vmatprep.subr.bf16.mxu1 %v12508_v32  ;;  %7072 = vmatprep.subr.bf16.mxu0 %v12509_v10  ;;  %v12554_v32 = vld [vmem:[#allocation154_spill] sm:$0xff]  ;;  %v12555_v10 = vld [vmem:[#allocation155_spill] sm:$0xff] }
 0x952   :  { %6840 = vmatpush1.bf16.msra.mxu1 %v12510_v39  ;;  %v12557_v39 = vld [vmem:[#allocation157_spill] sm:$0xff] }
 0x953   :  { %7074 = vmatpush3.bf16.msra.mxu0 %v12511_v27  ;;  %6842 = vmatprep.subr.bf16.mxu1 %v12512_v1  ;;  %v12558_v27 = vld [vmem:[#allocation158_spill] sm:$0xff]  ;;  %v12559_v1 = vld [vmem:[#allocation159_spill] sm:$0xff] }
 0x954   :  { %7076 = vmatprep.subr.bf16.mxu0 %v12513_v43  ;;  %v12560_v43 = vld [vmem:[#allocation160_spill] sm:$0xff] }
 0x956   :  { %6844 = vmatpush1.bf16.msra.mxu1 %v12514_v23  ;;  %v12561_v23 = vld [vmem:[#allocation161_spill] sm:$0xff] }
 0x957   :  { %7078 = vmatpush3.bf16.msra.mxu0 %v12515_v22  ;;  %6846 = vmatprep.subr.bf16.mxu1 %v12516_v38  ;;  %v12562_v22 = vld [vmem:[#allocation162_spill] sm:$0xff]  ;;  %v12563_v38 = vld [vmem:[#allocation163_spill] sm:$0xff] }
 0x958   :  { %7080 = vmatprep.subr.bf16.mxu0 %v12517_v7  ;;  %v12566_v7 = vld [vmem:[#allocation166_spill] sm:$0xff] }
 0x95a   :  { %6848 = vmatpush1.bf16.msra.mxu1 %v12518_v44  ;;  %v12568_v44 = vld [vmem:[#allocation168_spill] sm:$0xff] }
 0x95b   :  { %7082 = vmatpush3.bf16.msra.mxu0 %v12519_v59  ;;  %6850 = vmatprep.subr.bf16.mxu1 %v12520_v4  ;;  %v12570_v59 = vld [vmem:[#allocation170_spill] sm:$0xff]  ;;  %v12571_v4 = vld [vmem:[#allocation171_spill] sm:$0xff] }
 0x95c   :  { %7084 = vmatprep.subr.bf16.mxu0 %v12521_v40  ;;  %v12572_v40 = vld [vmem:[#allocation172_spill] sm:$0xff] }
 0x95e   :  { %6852 = vmatpush1.bf16.msra.mxu1 %v12522_v61  ;;  %v12573_v61 = vld [vmem:[#allocation173_spill] sm:$0xff] }
 0x95f   :  { %7086 = vmatpush3.bf16.msra.mxu0 %v12523_v47  ;;  %6854 = vmatprep.subr.bf16.mxu1 %v12524_v52  ;;  %v12574_v47 = vld [vmem:[#allocation174_spill] sm:$0xff]  ;;  %v12575_v52 = vld [vmem:[#allocation175_spill] sm:$0xff] }
 0x960   :  { %7088 = vmatprep.subr.bf16.mxu0 %v12525_v19  ;;  %v12577_v19 = vld [vmem:[#allocation177_spill] sm:$0xff] }
 0x962   :  { %6856 = vmatpush1.bf16.msra.mxu1 %v12526_v30  ;;  %v12578_v30 = vld [vmem:[#allocation178_spill] sm:$0xff] }
 0x963   :  { %7090 = vmatpush3.bf16.msra.mxu0 %v12527_v12  ;;  %6858 = vmatprep.subr.bf16.mxu1 %v12528_v53  ;;  %v12580_v12 = vld [vmem:[#allocation180_spill] sm:$0xff]  ;;  %v12581_v53 = vld [vmem:[#allocation181_spill] sm:$0xff] }
 0x964   :  { %7092 = vmatprep.subr.bf16.mxu0 %v12529_v29  ;;  %v12582_v29 = vld [vmem:[#allocation182_spill] sm:$0xff] }
 0x966   :  { %6860 = vmatpush1.bf16.msra.mxu1 %v12530_v3  ;;  %v12583_v3 = vld [vmem:[#allocation183_spill] sm:$0xff] }
 0x967   :  { %7094 = vmatpush3.bf16.msra.mxu0 %v12531_v15  ;;  %6862 = vmatprep.subr.bf16.mxu1 %v12532_v0  ;;  %v12584_v15 = vld [vmem:[#allocation184_spill] sm:$0xff]  ;;  %v12585_v0 = vld [vmem:[#allocation185_spill] sm:$0xff] }
 0x968   :  { %7096 = vmatprep.subr.bf16.mxu0 %v12533_v16  ;;  %v12586_v16 = vld [vmem:[#allocation186_spill] sm:$0xff] }
 0x96a   :  { %6864 = vmatpush1.bf16.msra.mxu1 %v12534_v50  ;;  %v12588_v50 = vld [vmem:[#allocation188_spill] sm:$0xff] }
 0x96b   :  { %7098 = vmatpush3.bf16.msra.mxu0 %v12535_v21  ;;  %6866 = vmatprep.subr.bf16.mxu1 %v12536_v56  ;;  %v12589_v21 = vld [vmem:[#allocation189_spill] sm:$0xff]  ;;  %v12590_v56 = vld [vmem:[#allocation190_spill] sm:$0xff] }
 0x96c   :  { %7099 = vmatprep.subr.bf16.mxu0 %v12420_v57 }
 0x96e   :  { %4376 = vmatmul.mubr.f32.vlgmr.msra.gmra.mrb[48].mxu0 %v3740_v63  ;;  %6868 = vmatpush1.bf16.msra.mxu1 %v12537_v28 }
 0x96f   :  { %7101 = vmatpush3.bf16.msra.mxu0 %v12538_v5  ;;  %6870 = vmatprep.subr.bf16.mxu1 %v12539_v48 }
 0x970   :  { %7102 = vmatprep.subr.bf16.mxu0 %v12420_v57  ;;  %5965 = vmatprep.mubr.msk.f32.mxu0 %vm7901_vm9, %v12228_v17 }
 0x972   :  { %6872 = vmatpush1.bf16.msra.mxu1 %v12540_v60 }
 0x973   :  { %7105 = vmatpush3.bf16.msk.msra.mxu0 %vm9789_vm12, %v12541_v54  ;;  %6874 = vmatprep.subr.bf16.mxu1 %v12543_v14 }
 0x976   :  { %5966 = vmatmul.mubr.msk.f32.vlgmr.msra.gmra.mrb[50].mxu0 %vm1337_vm13, %v3742_v37  ;;  %6876 = vmatpush1.bf16.msra.mxu1 %v12544_v33 }
 0x977   :  { %6878 = vmatprep.subr.bf16.mxu1 %v12545_v35  ;;  %4606 = vmatprep.mubr.f32.mxu0 %v12228_v17 }
 0x97a   :  { %6880 = vmatpush1.bf16.msra.mxu1 %v12546_v45 }
 0x97b   :  { %6882 = vmatprep.subr.bf16.mxu1 %v12547_v31 }
 0x97e   :  { %6884 = vmatpush1.bf16.msra.mxu1 %v12548_v24 }
 0x97f   :  { %6886 = vmatprep.subr.bf16.mxu1 %v12549_v41 }
 0x982   :  { %6888 = vmatpush1.bf16.msra.mxu1 %v12550_v18 }
 0x983   :  { %6890 = vmatprep.subr.bf16.mxu1 %v12551_v46 }
 0x986   :  { %6892 = vmatpush1.bf16.msra.mxu1 %v12552_v26 }
 0x987   :  { %6894 = vmatprep.subr.bf16.mxu1 %v12553_v2 }
 0x98a   :  { %6896 = vmatpush1.bf16.msra.mxu1 %v12554_v32 }
 0x98b   :  { %6898 = vmatprep.subr.bf16.mxu1 %v12555_v10 }
 0x98d   :  { %3953 = vmatmul.mubr.f32.vlgmr.msra.gmra.mrb[12].mxu1 %v11318_v11  ;;  %v12565_v11 = vld [vmem:[#allocation165_spill] sm:$0xff] }
 0x98e   :  { %6900 = vmatpush1.bf16.msra.mxu1 %v12556_v9  ;;  %4023 = vmatprep.mubr.f32.mxu1 %v11322_v36  ;;  %v12567_v36 = vld [vmem:[#allocation167_spill] sm:$0xff] }
 0x98f   :  { %6902 = vmatprep.subr.bf16.mxu1 %v12557_v39 }
 0x992   :  { %6904 = vmatpush1.bf16.msra.mxu1 %v12558_v27 }
 0x993   :  { %6906 = vmatprep.subr.bf16.mxu1 %v12559_v1 }
 0x996   :  { %6908 = vmatpush1.bf16.msra.mxu1 %v12560_v43 }
 0x997   :  { %6910 = vmatprep.subr.bf16.mxu1 %v12561_v23 }
 0x99a   :  { %6912 = vmatpush1.bf16.msra.mxu1 %v12562_v22 }
 0x99b   :  { %6914 = vmatprep.subr.bf16.mxu1 %v12563_v38 }
 0x99e   :  { %6916 = vmatpush1.bf16.msra.mxu1 %v12564_v6 }
 0x99f   :  { %6918 = vmatprep.subr.bf16.mxu1 %v12565_v11 }
 0x9a2   :  { %6920 = vmatpush1.bf16.msra.mxu1 %v12566_v7 }
 0x9a3   :  { %6922 = vmatprep.subr.bf16.mxu1 %v12567_v36 }
 0x9a6   :  { %6924 = vmatpush1.bf16.msra.mxu1 %v12568_v44 }
 0x9a7   :  { %6926 = vmatprep.subr.bf16.mxu1 %v12569_v55 }
 0x9aa   :  { %6928 = vmatpush1.bf16.msra.mxu1 %v12570_v59 }
 0x9ab   :  { %6930 = vmatprep.subr.bf16.mxu1 %v12571_v4 }
 0x9ae   :  { %6932 = vmatpush1.bf16.msra.mxu1 %v12572_v40 }
 0x9af   :  { %6934 = vmatprep.subr.bf16.mxu1 %v12573_v61 }
 0x9b2   :  { %6936 = vmatpush1.bf16.msra.mxu1 %v12574_v47 }
 0x9b3   :  { %6938 = vmatprep.subr.bf16.mxu1 %v12575_v52 }
 0x9b6   :  { %6940 = vmatpush1.bf16.msra.mxu1 %v12576_v49 }
 0x9b7   :  { %6942 = vmatprep.subr.bf16.mxu1 %v12577_v19 }
 0x9ba   :  { %6944 = vmatpush1.bf16.msra.mxu1 %v12578_v30 }
 0x9bb   :  { %6946 = vmatprep.subr.bf16.mxu1 %v12579_v8 }
 0x9be   :  { %6948 = vmatpush1.bf16.msra.mxu1 %v12580_v12 }
 0x9bf   :  { %6950 = vmatprep.subr.bf16.mxu1 %v12581_v53 }
 0x9c2   :  { %6952 = vmatpush1.bf16.msra.mxu1 %v12582_v29 }
 0x9c3   :  { %6954 = vmatprep.subr.bf16.mxu1 %v12583_v3 }
 0x9c6   :  { %6956 = vmatpush1.bf16.msra.mxu1 %v12584_v15 }
 0x9c7   :  { %6958 = vmatprep.subr.bf16.mxu1 %v12585_v0 }
 0x9ca   :  { %6960 = vmatpush1.bf16.msra.mxu1 %v12586_v16 }
 0x9cb   :  { %6962 = vmatprep.subr.bf16.mxu1 %v12587_v62 }
 0x9cd   :  { %4024 = vmatmul.mubr.f32.vlgmr.msra.gmra.mrb[12].mxu1 %v3740_v63 }
 0x9ce   :  { %6964 = vmatpush1.bf16.msra.mxu1 %v12588_v50  ;;  %4094 = vmatprep.mubr.f32.mxu1 %v12228_v17 }
 0x9cf   :  { %6967 = vmatprep.subr.msk.bf16.mxu1 %vm9789_vm12, %v12589_v21 }
 0x9d2   :  { %6970 = vmatpush1.bf16.msk.msra.mxu1 %vm9789_vm12, %v12590_v56 }
 0x9d5   :  { %5352 = vmatmul.mubr.msk.f32.vlgmr.msra.gmra.mrb[12].mxu1 %vm1337_vm13, %v3742_v37  ;;  %vm12599_vm13 = vcmask 736256  }
 0x9d6   :  { %6023 = vmatprep.mubr.msk.f32.mxu1 %vm2582_vm15, %v11061_v25  ;;  %vm12600_vm14 = vmmov %vm12599_vm13 }
 0x9e0   :  { %v5659_v28 = vpop.f32.mrb[42].mxu0 }
 0x9e1   :  { %v5660_v5 = vpop.f32.mrb[43].mxu0 }
 0x9e2   :  { %v5661_v63 = vadd.f32 %v5660_v5, %v5659_v28 }
 0xa00   :  { %v5694_v48 = vpop.f32.mrb[44].mxu0 }
 0xa01   :  { %v5695_v34 = vpop.f32.mrb[45].mxu0 }
 0xa02   :  { %v5696_v60 = vadd.f32 %v5695_v34, %v5694_v48 }
 0xa04   :  { %v4238_v54 = vadd.f32 %v5696_v60, %v5661_v63 }
 0xa20   :  { %v5729_v14 = vpop.f32.mrb[46].mxu0 }
 0xa21   :  { %v5730_v33 = vpop.f32.mrb[47].mxu0 }
 0xa22   :  { %v5731_v35 = vadd.f32 %v5730_v33, %v5729_v14 }
 0xa24   :  { %v4308_v45 = vadd.f32 %v5731_v35, %v4238_v54 }
 0xa41   :  { %v5764_v31 = vpop.f32.mrb[48].mxu0 }
 0xa42   :  { %v5765_v24 = vpop.f32.mrb[49].mxu0 }
 0xa43   :  { %v5766_v41 = vadd.f32 %v5765_v24, %v5764_v31 }
 0xa45   :  { %v4378_v18 = vadd.f32 %v5766_v41, %v4308_v45 }
 0xa49   :  { %v4447_v46 = vpop.f32.mrb[50].mxu0 }
 0xa4a   :  { %v11430_v37 = vadd.f32 %v4447_v46, %v4378_v18  ;;  %v5967_v26 = vpop.f32.mrb[51].mxu0 }
 0xaa8   :  { %v4096_v25 = vpop.f32.mrb[12].mxu1 }
 0xaa9   :  { %4465 = vrot.lane.b32.xlu1 %v4096_v25, %s7890_s17  ;;  %4454 = vrot.lane.b32.xlu0 %v4096_v25, %s7891_s18  ;;  %v4098_v2 = vpop.f32.mrb[13].mxu1 }
 0xaaa   :  { %v7638_v32 = vpack.i.bf16 %v11430_v37, %v4098_v2 }
 0xaad   :  { %4487 = vrot.lane.b32.xlu1 %v4096_v25, %s7903_s9  ;;  %4476 = vrot.lane.b32.xlu0 %v4096_v25, %s7904_s16 }
 0xab1   :  { %4509 = vrot.lane.b32.xlu1 %v4096_v25, %s7893_s22  ;;  %4498 = vrot.lane.b32.xlu0 %v4096_v25, %s7905_s2 }
 0xab5   :  { %7639 = vrot.lane.b32.xlu0 %v7638_v32, %s7904_s16  ;;  %7629 = vrot.lane.b32.xlu1 %v7638_v32, %s7891_s18 }
 0xab9   :  { %7649 = vrot.lane.b32.xlu0 %v7638_v32, %s7905_s2  ;;  %7634 = vrot.lane.b32.xlu1 %v7638_v32, %s7890_s17 }
 0xabd   :  { %7659 = vrot.lane.b32.xlu0 %v7638_v32, %s7907_s20  ;;  %7644 = vrot.lane.b32.xlu1 %v7638_v32, %s7903_s9 }
 0xac1   :  { %4520 = vrot.lane.b32.xlu0 %v4096_v25, %s7907_s20  ;;  %7654 = vrot.lane.b32.xlu1 %v7638_v32, %s7893_s22 }
 0xac5   :  { %4535 = vrot.lane.b32.xlu0 %v11430_v37, %s7906_s19  ;;  %4533 = vrot.lane.b32.xlu1 %v4098_v2, %s7906_s19 }
 0xac9   :  { %4531 = vrot.lane.b32.xlu1 %v4096_v25, %s7906_s19 }
 0xb1b   :  { %v4466_v10 = vpop.permute.xlu1 %4465  ;;  %v4455_v9 = vpop.permute.xlu0 %4454 }
 0xb1f   :  { %v4488_v39 = vpop.permute.xlu1 %4487  ;;  %v4477_v27 = vpop.permute.xlu0 %4476 }
 0xb23   :  { %v4510_v1 = vpop.permute.xlu1 %4509  ;;  %v4499_v43 = vpop.permute.xlu0 %4498 }
 0xb27   :  { %v7640_v23 = vpop.permute.xlu0 %7639  ;;  %v7630_v22 = vpop.permute.xlu1 %7629 }
 0xb28   :  { %v7632_v38 = vunpack.i.h.bf16 %v7630_v22  ;;  %v7631_v6 = vunpack.i.l.bf16 %v7630_v22  ;;  %v7642_v11 = vunpack.i.h.bf16 %v7640_v23  ;;  %v7641_v7 = vunpack.i.l.bf16 %v7640_v23  ;;  %v12604_v23 = vld [vmem:[#allocation194_spill] sm:$0xff]  ;;  %v12605_v22 = vld [vmem:[#allocation195_spill] sm:$0xff] }
 0xb2a   :  { %v4460_v36 = vsel %vm641_vm0, %v4455_v9, %v7631_v6  ;;  %v4461_v44 = vsel %vm641_vm0, %v7631_v6, %v7632_v38  ;;  %v4482_v19 = vsel %vm12591_vm1, %v4477_v27, %v7641_v7  ;;  %v4483_v12 = vsel %vm12592_vm4, %v7641_v7, %v7642_v11  ;;  %v7881_v9 = vld [vmem:[%s11786_s3] sm:$0xff]  ;;  %v7882_v27 = vld [vmem:[%s11786_s3 + $0x8] sm:$0xff]  ;;  %v12607_v6 = vld [vmem:[#allocation197_spill] sm:$0xff] }
 0xb2b   :  { %v7108_v55 = vpack.c.bf16 %v4460_v36, %v4096_v25  ;;  %v7650_v59 = vpop.permute.xlu0 %7649  ;;  %v7635_v4 = vpop.permute.xlu1 %7634  ;;  %v7106_v40 = vpack.c.bf16 %v4461_v44, %v4098_v2  ;;  %vm12593_vm0 = vcmask 883712   ;;  %v7122_v32 = vpack.c.bf16 %v7632_v38, %v11430_v37  ;;  %v12606_v38 = vld [vmem:[#allocation196_spill] sm:$0xff]  ;;  %v12609_v7 = vld [vmem:[#allocation199_spill] sm:$0xff]  ;;  %v12611_v44 = vld [vmem:[#allocation201_spill] sm:$0xff] }
 0xb2c   :  { %v7637_v61 = vunpack.i.h.bf16 %v7635_v4  ;;  %v7636_v47 = vunpack.i.l.bf16 %v7635_v4  ;;  %v7652_v52 = vunpack.i.h.bf16 %v7650_v59  ;;  %v7651_v49 = vunpack.i.l.bf16 %v7650_v59  ;;  %vm12594_vm5 = vmmov %vm12593_vm0  ;;  %v12610_v36 = vld [vmem:[#allocation200_spill] sm:$0xff]  ;;  %v12613_v59 = vld [vmem:[#allocation203_spill] sm:$0xff] }
 0xb2d   :  { %7107 = vmatprep.subr.bf16.mxu0 %v7106_v40  ;;  %v12614_v4 = vld [vmem:[#allocation204_spill] sm:$0xff]  ;;  %v12615_v40 = vld [vmem:[#allocation205_spill] sm:$0xff] }
 0xb2e   :  { %v4471_v30 = vsel %vm677_vm2, %v4466_v10, %v7636_v47  ;;  %7109 = vmatpush1.bf16.msra.mxu0 %v7108_v55  ;;  %v4472_v8 = vsel %vm677_vm2, %v7636_v47, %v7637_v61  ;;  %v4504_v62 = vsel %vm12593_vm0, %v4499_v43, %v7651_v49  ;;  %v4505_v50 = vsel %vm12594_vm5, %v7651_v49, %v7652_v52  ;;  %v12603_v43 = vld [vmem:[#allocation193_spill] sm:$0xff]  ;;  %v12612_v55 = vld [vmem:[#allocation202_spill] sm:$0xff]  ;;  %v12617_v47 = vld [vmem:[#allocation207_spill] sm:$0xff] }
 0xb2f   :  { %v7112_v53 = vpack.c.bf16 %v4482_v19, %v4471_v30  ;;  %v7660_v29 = vpop.permute.xlu0 %7659  ;;  %v7645_v3 = vpop.permute.xlu1 %7644  ;;  %v7110_v15 = vpack.c.bf16 %v4483_v12, %v4472_v8  ;;  %vm12597_vm2 = vcmask 744448   ;;  %v7126_v10 = vpack.c.bf16 %v7642_v11, %v7637_v61  ;;  %v12608_v11 = vld [vmem:[#allocation198_spill] sm:$0xff]  ;;  %v12618_v49 = vld [vmem:[#allocation208_spill] sm:$0xff] }
 0xb30   :  { %v7647_v0 = vunpack.i.h.bf16 %v7645_v3  ;;  %v7646_v16 = vunpack.i.l.bf16 %v7645_v3  ;;  %v7662_v21 = vunpack.i.h.bf16 %v7660_v29  ;;  %v7661_v56 = vunpack.i.l.bf16 %v7660_v29  ;;  %vm12598_vm9 = vmmov %vm12597_vm2  ;;  %v12616_v61 = vld [vmem:[#allocation206_spill] sm:$0xff]  ;;  %v12619_v3 = vld [vmem:[#allocation209_spill] sm:$0xff] }
 0xb31   :  { %7111 = vmatprep.subr.bf16.mxu0 %v7110_v15 }
 0xb32   :  { %v4493_v28 = vsel %vm12595_vm6, %v4488_v39, %v7646_v16  ;;  %7113 = vmatpush1.bf16.msra.mxu0 %v7112_v53  ;;  %v4494_v5 = vsel %vm12596_vm7, %v7646_v16, %v7647_v0  ;;  %v4527_v31 = vsel %vm12598_vm9, %v7661_v56, %v7662_v21  ;;  %v7130_v39 = vpack.c.bf16 %v7652_v52, %v7647_v0 }
 0xb33   :  { %v7116_v63 = vpack.c.bf16 %v4504_v62, %v4493_v28  ;;  %v4521_v48 = vpop.permute.xlu0 %4520  ;;  %v7655_v34 = vpop.permute.xlu1 %7654  ;;  %v7114_v60 = vpack.c.bf16 %v4505_v50, %v4494_v5 }
 0xb34   :  { %v7657_v54 = vunpack.i.h.bf16 %v7655_v34  ;;  %v7656_v14 = vunpack.i.l.bf16 %v7655_v34  ;;  %v4526_v33 = vsel %vm12597_vm2, %v4521_v48, %v7661_v56 }
 0xb35   :  { %7115 = vmatprep.subr.bf16.mxu0 %v7114_v60 }
 0xb36   :  { %v4515_v35 = vsel %vm785_vm3, %v4510_v1, %v7656_v14  ;;  %7117 = vmatpush1.bf16.msra.mxu0 %v7116_v63  ;;  %v4516_v45 = vsel %vm785_vm3, %v7656_v14, %v7657_v54  ;;  %v7134_v37 = vpack.c.bf16 %v7662_v21, %v7657_v54  ;;  %v12602_v1 = vld [vmem:[#allocation192_spill] sm:$0xff]  ;;  %vm12620_vm3 = vcmask 89088  }
 0xb37   :  { %v7120_v24 = vpack.c.bf16 %v4526_v33, %v4515_v35  ;;  %v4536_v41 = vpop.permute.xlu0 %4535  ;;  %v4534_v18 = vpop.permute.xlu1 %4533  ;;  %v7118_v46 = vpack.c.bf16 %v4527_v31, %v4516_v45 }
 0xb38   :  { %v4538_v26 = vsel %vm12599_vm13, %v4534_v18, %v4536_v41 }
 0xb39   :  { %7119 = vmatprep.subr.bf16.mxu0 %v7118_v46 }
 0xb3a   :  { %7121 = vmatpush1.bf16.msra.mxu0 %v7120_v24 }
 0xb3b   :  { %v4532_v25 = vpop.permute.xlu1 %4531  ;;  %4558 = vmatprep.subr.mxu0 %v4538_v26 }
 0xb3c   :  { %v4537_v2 = vsel %vm12600_vm14, %v4532_v25, %v4534_v18 }
 0xb3e   :  { %4559 = vmatpush1.msra.mxu0 %v4537_v2 }
 0xb3f   :  { %5355 = vmatmul.mubr.msk.f32.vlgmr.msra.gmra.mrb[52].mxu0 %vm916_vm8, %v7881_v9  ;;  %7123 = vmatprep.subr.bf16.mxu0 %v7122_v32 }
 0xb40   :  { %7125 = vmatpush3.bf16.msra.mxu0 %v7122_v32  ;;  %4612 = vmatprep.mubr.f32.mxu0 %v12228_v17  ;;  %v12601_v17 = vld [vmem:[#allocation191_spill] sm:$0xff] }
 0xb41   :  { %7127 = vmatprep.subr.bf16.mxu0 %v7126_v10 }
 0xb43   :  { %5356 = vmatmul.mubr.msk.f32.gmra.mrb[54].mxu0 %vm916_vm8, %v7882_v27 }
 0xb44   :  { %7129 = vmatpush3.bf16.msra.mxu0 %v7126_v10  ;;  %5986 = vmatprep.mubr.msk.f32.mxu0 %vm916_vm8, %v7881_v9 }
 0xb45   :  { %7131 = vmatprep.subr.bf16.mxu0 %v7130_v39 }
 0xb48   :  { %7133 = vmatpush3.bf16.msra.mxu0 %v7130_v39 }
 0xb49   :  { %7135 = vmatprep.subr.bf16.mxu0 %v7134_v37 }
 0xb4c   :  { %7137 = vmatpush3.bf16.msra.mxu0 %v7134_v37 }
 0xb4d   :  { %5984 = vmatprep.subr.mxu0 %v4536_v41 }
 0xb50   :  { %5985 = vmatpush3.msra.mxu0 %v4536_v41 }
 0xb51   :  { %5987 = vmatmul.mubr.msk.f32.vlgmr.msra.gmra.mrb[56].mxu0 %vm916_vm8, %v7882_v27  ;;  %7139 = vmatprep.subr.bf16.mxu0 %v12601_v17  ;;  %vm12621_vm8 = vmmov %vm12620_vm3 }
 0xb52   :  { %7141 = vmatpush3.bf16.msra.mxu0 %v12602_v1 }
 0xb53   :  { %7143 = vmatprep.subr.bf16.mxu0 %v12603_v43 }
 0xb56   :  { %7145 = vmatpush3.bf16.msra.mxu0 %v12604_v23 }
 0xb57   :  { %7147 = vmatprep.subr.bf16.mxu0 %v12605_v22 }
 0xb5a   :  { %7149 = vmatpush3.bf16.msra.mxu0 %v12606_v38 }
 0xb5b   :  { %7151 = vmatprep.subr.bf16.mxu0 %v12607_v6 }
 0xb5e   :  { %7153 = vmatpush3.bf16.msra.mxu0 %v12608_v11 }
 0xb5f   :  { %7155 = vmatprep.subr.bf16.mxu0 %v12609_v7 }
 0xb62   :  { %7157 = vmatpush3.bf16.msra.mxu0 %v12610_v36 }
 0xb63   :  { %7159 = vmatprep.subr.bf16.mxu0 %v12611_v44 }
 0xb66   :  { %7161 = vmatpush3.bf16.msra.mxu0 %v12612_v55 }
 0xb67   :  { %7163 = vmatprep.subr.bf16.mxu0 %v12613_v59 }
 0xb6a   :  { %7165 = vmatpush3.bf16.msra.mxu0 %v12614_v4 }
 0xb6b   :  { %7167 = vmatprep.subr.bf16.mxu0 %v12615_v40 }
 0xb6e   :  { %7169 = vmatpush3.bf16.msra.mxu0 %v12616_v61  ;;  %v11526_v61 = vld [vmem:[%s11792_s12 + $0x8] sm:$0xff] }
 0xb6f   :  { %7172 = vmatprep.subr.msk.bf16.mxu0 %vm9789_vm12, %v12617_v47 }
 0xc12   :  { %v4608_v52 = vpop.f32.mrb[52].mxu0 }
 0xc13   :  { %v4609_v19 = vadd.f32 %v4608_v52, %v12618_v49  ;;  %v4610_v30 = vpop.f32.mrb[53].mxu0  ;;  %v11540_v52 = vld [vmem:[%s11792_s12 + $0x18] sm:$0x7] }
 0xc14   :  { %v4611_v8 = vadd.f32 %v4610_v30, %v12618_v49  ;;  %v65_v30 = vld [vmem:[%s11793_s8 + $0x10] sm:$0xff] }
 0xc15   :  { %v5359_v12 = vmul.f32 -1.442695, %v4609_v19 }
 0xc16   :  { %v5360_v53 = vmul.f32 -1.442695, %v4611_v8  ;;  %v4614_v29 = vpop.f32.mrb[54].mxu0 }
 0xc17   :  { %7816 = vpow2.f32 %v5359_v12  ;;  %v4615_v15 = vadd.f32 %v4614_v29, %v12619_v3  ;;  %v4616_v0 = vpop.f32.mrb[55].mxu0  ;;  %v66_v12 = vld [vmem:[%s11793_s8 + $0x18] sm:$0x7]  ;;  %v7914_v29 = vmov 3  }
 0xc18   :  { %7818 = vpow2.f32 %v5360_v53  ;;  %v4617_v16 = vadd.f32 %v4616_v0, %v12619_v3  ;;  %v7913_v53 = vmov 1  }
 0xc19   :  { %v5362_v62 = vmul.f32 -1.442695, %v4615_v15 }
 0xc1a   :  { %v5363_v50 = vmul.f32 -1.442695, %v4617_v16 }
 0xc1b   :  { %7820 = vpow2.f32 %v5362_v62 }
 0xc1c   :  { %7822 = vpow2.f32 %v5363_v50 }
 0xc21   :  { %v7817_v21 = vpop.eup %7816 }
 0xc22   :  { %v7819_v56 = vpop.eup %7818  ;;  %v4712_v28 = vadd.f32 1.0, %v7817_v21 }
 0xc23   :  { %v4713_v5 = vadd.f32 1.0, %v7819_v56 }
 0xc24   :  { %7824 = vrcp.f32 %v4712_v28  ;;  %v5988_v63 = vpop.f32.mrb[56].mxu0 }
 0xc25   :  { %v7821_v48 = vpop.eup %7820  ;;  %7826 = vrcp.f32 %v4713_v5  ;;  %v4691_v34 = vadd.f32 %v5988_v63, %v12619_v3  ;;  %v4685_v60 = vpop.f32.mrb[57].mxu0  ;;  %v7915_v3 = vmov 2  }
 0xc26   :  { %v7823_v54 = vpop.eup %7822  ;;  %v4715_v14 = vadd.f32 1.0, %v7821_v48  ;;  %v4686_v33 = vadd.f32 %v4685_v60, %v12618_v49  ;;  %v11545_v49 = vld [vmem:[%s11792_s12 + $0x10] sm:$0xff] }
 0xc27   :  { %v4716_v35 = vadd.f32 1.0, %v7823_v54  ;;  %v5364_v45 = vmul.f32 -1.442695, %v4691_v34 }
 0xc28   :  { %7828 = vrcp.f32 %v4715_v14  ;;  %v5361_v31 = vmul.f32 -1.442695, %v4686_v33 }
 0xc29   :  { %7830 = vrcp.f32 %v4716_v35 }
 0xc2a   :  { %7832 = vpow2.f32 %v5364_v45 }
 0xc2b   :  { %7834 = vpow2.f32 %v5361_v31 }
 0xc2e   :  { %v7825_v24 = vpop.eup %7824 }
 0xc2f   :  { %v7827_v41 = vpop.eup %7826  ;;  %v4730_v46 = vmul.f32 %v7825_v24, %v4609_v19  ;;  %v63_v19 = vld [vmem:[%s11793_s8] sm:$0xff] }
 0xc30   :  { %v4731_v18 = vmul.f32 %v7827_v41, %v4611_v8  ;;  %v64_v8 = vld [vmem:[%s11793_s8 + $0x8] sm:$0xff] }
 0xc32   :  { %v7829_v26 = vpop.eup %7828  ;;  %4806 = vmatprep.mubr.f32.mxu0 %v4731_v18 }
 0xc33   :  { %v7831_v25 = vpop.eup %7830  ;;  %4807 = vmatmul.mubr.f32.vlgmr.msra.gmra.mrb[58].mxu0 %v4730_v46  ;;  %v4733_v9 = vmul.f32 %v7829_v26, %v4615_v15  ;;  %v12625_v15 = vmov 0  }
 0xc34   :  { %v7833_v2 = vpop.eup %7832  ;;  %v4734_v32 = vmul.f32 %v7831_v25, %v4617_v16  ;;  %7175 = vmatpush3.bf16.msk.msra.mxu0 %vm9789_vm12, %v12617_v47  ;;  %v11531_v47 = vld [vmem:[%s11792_s12] sm:$0xff]  ;;  %vm3021_vm12 = vcmask 523264  }
 0xc35   :  { %v7835_v10 = vpop.eup %7834  ;;  %v4717_v39 = vadd.f32 1.0, %v7833_v2  ;;  %7176 = vmatprep.subr.bf16.mxu0 %v12420_v57 }
 0xc36   :  { %v4714_v27 = vadd.f32 1.0, %v7835_v10  ;;  %4811 = vmatprep.mubr.f32.mxu0 %v4734_v32 }
 0xc37   :  { %7836 = vrcp.f32 %v4717_v39  ;;  %4812 = vmatmul.mubr.f32.gmra.mrb[60].mxu0 %v4733_v9 }
 0xc38   :  { %7838 = vrcp.f32 %v4714_v27 }
 0xc41   :  { %v7837_v37 = vpop.eup %7836 }
 0xc42   :  { %v7839_v17 = vpop.eup %7838  ;;  %v4735_v43 = vmul.f32 %v7837_v37, %v4691_v34 }
 0xc43   :  { %v4732_v1 = vmul.f32 %v7839_v17, %v4686_v33 }
 0xc45   :  { %5993 = vmatprep.mubr.msk.f32.mxu0 %vm12620_vm3, %v4732_v1 }
 0xc46   :  { %5994 = vmatmul.mubr.msk.f32.vlgmr.msra.gmra.mrb[62].mxu0 %vm12621_vm8, %v4735_v43 }
 0xc47   :  { %5368 = vmatprep.mubr.msk.f32.mxu0 %vm2582_vm15, %v7883_v58 }
 0xd06   :  { %v5815_v23 = vpop.f32.mrb[58].mxu0 }
 0xd07   :  { %v5816_v22 = vpop.f32.mrb[59].mxu0 }
 0xd08   :  { %v5817_v38 = vadd.f32 %v5816_v22, %v5815_v23 }
 0xd0a   :  { %v5818_v6 = vpop.f32.mrb[60].mxu0 }
 0xd0b   :  { %v5819_v11 = vpop.f32.mrb[61].mxu0 }
 0xd0c   :  { %v5820_v7 = vadd.f32 %v5819_v11, %v5818_v6 }
 0xd19   :  { %v5995_v36 = vpop.f32.mrb[62].mxu0 }
 0xd1a   :  { %v4889_v44 = vadd.f32 %v5995_v36, %v5820_v7  ;;  %v4883_v55 = vpop.f32.mrb[63].mxu0 }
 0xd1b   :  { %v4884_v59 = vadd.f32 %v5817_v38, %v4883_v55 }
 0xd1d   :  { %v7668_v4 = vpack.i.bf16 %v4889_v44, %v4884_v59  ;;  %v7177_v40 = vpack.c.bf16 %v4889_v44, %v4884_v59 }
 0xd1f   :  { %7669 = vrot.lane.b32.xlu1 %v7668_v4, %s7890_s17  ;;  %7664 = vrot.lane.b32.xlu0 %v7668_v4, %s7891_s18 }
 0xd20   :  { %7178 = vmatpush1.bf16.msra.mxu0 %v7177_v40 }
 0xd21   :  { %7179 = vmatprep.subr.bf16.mxu0 %v12420_v57 }
 0xd23   :  { %7679 = vrot.lane.b32.xlu1 %v7668_v4, %s7908_s10  ;;  %7674 = vrot.lane.b32.xlu0 %v7668_v4, %s12622_s6 }
 0xd27   :  { %7689 = vrot.lane.b32.xlu1 %v7668_v4, %s7905_s2  ;;  %7684 = vrot.lane.b32.xlu0 %v7668_v4, %s12623_s25 }
 0xd2b   :  { %7699 = vrot.lane.b32.xlu1 %v7668_v4, %s12624_s0  ;;  %7694 = vrot.lane.b32.xlu0 %v7668_v4, %s7912_s29 }
 0xd2f   :  { %571 = vrot.lane.b32.xlu1 %v11526_v61, %s7891_s18  ;;  %569 = vrot.lane.b32.xlu0 %v11531_v47, %s7891_s18 }
 0xd33   :  { %575 = vrot.lane.b32.xlu1 %v11540_v52, %s7891_s18  ;;  %573 = vrot.lane.b32.xlu0 %v11545_v49, %s7891_s18 }
 0xd37   :  { %591 = vrot.lane.b32.xlu1 %v11526_v61, %s7890_s17  ;;  %589 = vrot.lane.b32.xlu0 %v11531_v47, %s7890_s17 }
 0xd3b   :  { %595 = vrot.lane.b32.xlu1 %v11540_v52, %s7890_s17  ;;  %593 = vrot.lane.b32.xlu0 %v11545_v49, %s7890_s17 }
 0xd3f   :  { %2766 = vperm.xlu1 %7447, %v63_v19   ;;  %515 = vperm.xlu0 %7411, %v11531_v47   ;;  %v12626_v19 = vld [vmem:[#allocation224_spill] sm:$0xff] }
 0xd43   :  { %2776 = vperm.xlu1 %7447, %v65_v30   ;;  %2771 = vperm.xlu0 %7411, %v64_v8   ;;  %v7884_v30 = vld [vmem:[%s11789_s5] sm:$0xff] }
 0xd47   :  { %520 = vperm.xlu1 %7447, %v11526_v61   ;;  %2781 = vperm.xlu0 %7411, %v66_v12   ;;  %v12627_v12 = vld [vmem:[#allocation225_spill] sm:$0xff] }
 0xd4b   :  { %530 = vperm.xlu1 %7447, %v11540_v52   ;;  %7703 = vset.pattern.permute.xlu0 %v7913_v53 }
 0xd4c   :  { %542 = vperm.xlu0 %7703, %v11531_v47  }
 0xd4f   :  { %7704 = vset.pattern.permute.xlu1 %v7913_v53 }
 0xd50   :  { %546 = vperm.xlu1 %7704, %v11526_v61   ;;  %554 = vperm.xlu0 %7703, %v11540_v52  }
 0xd54   :  { %7706 = vset.pattern.permute.xlu0 %v7914_v29  ;;  %550 = vperm.xlu1 %7704, %v11545_v49  }
 0xd55   :  { %2930 = vperm.xlu0 %7706, %v11526_v61  }
 0xd58   :  { %7705 = vset.pattern.permute.xlu1 %v7914_v29  ;;  %v12628_v29 = vld [vmem:[#allocation226_spill] sm:$0xff] }
 0xd59   :  { %7709 = vset.pattern.permute.xlu0 %v7915_v3  ;;  %2926 = vperm.xlu1 %7705, %v11531_v47  }
 0xd5a   :  { %2974 = vperm.xlu0 %7709, %v11526_v61  }
 0xd5d   :  { %2934 = vperm.xlu1 %7705, %v11545_v49  }
 0xd5e   :  { %7710 = vset.pattern.permute.xlu0 %v12625_v15 }
 0xd5f   :  { %525 = vperm.xlu0 %7710, %v11545_v49  }
 0xd61   :  { %2938 = vperm.xlu1 %7705, %v11540_v52  }
 0xd65   :  { %7707 = vset.pattern.permute.xlu1 %v12625_v15 }
 0xd91   :  { %v7670_v0 = vpop.permute.xlu1 %7669  ;;  %v7665_v16 = vpop.permute.xlu0 %7664 }
 0xd92   :  { %v7667_v62 = vunpack.i.h.bf16 %v7665_v16  ;;  %v7666_v50 = vunpack.i.l.bf16 %v7665_v16  ;;  %v7672_v21 = vunpack.i.h.bf16 %v7670_v0  ;;  %v7671_v56 = vunpack.i.l.bf16 %v7670_v0  ;;  %v12630_v0 = vld [vmem:[#allocation230_spill] sm:$0xff] }
 0xd94   :  { %v7180_v28 = vpack.c.bf16 %v7667_v62, %v7666_v50  ;;  %v7183_v48 = vpack.c.bf16 %v7672_v21, %v7671_v56 }
 0xd95   :  { %v7680_v5 = vpop.permute.xlu1 %7679  ;;  %v7675_v63 = vpop.permute.xlu0 %7674 }
 0xd96   :  { %7181 = vmatpush1.bf16.msra.mxu0 %v7180_v28  ;;  %v7677_v34 = vunpack.i.h.bf16 %v7675_v63  ;;  %v7676_v60 = vunpack.i.l.bf16 %v7675_v63  ;;  %v7682_v33 = vunpack.i.h.bf16 %v7680_v5  ;;  %v7681_v35 = vunpack.i.l.bf16 %v7680_v5 }
 0xd97   :  { %7182 = vmatprep.subr.bf16.mxu0 %v12420_v57 }
 0xd98   :  { %v7186_v45 = vpack.c.bf16 %v7677_v34, %v7676_v60  ;;  %v7189_v41 = vpack.c.bf16 %v7682_v33, %v7681_v35 }
 0xd99   :  { %v7690_v54 = vpop.permute.xlu1 %7689  ;;  %v7685_v14 = vpop.permute.xlu0 %7684 }
 0xd9a   :  { %7184 = vmatpush1.bf16.msra.mxu0 %v7183_v48  ;;  %v7687_v18 = vunpack.i.h.bf16 %v7685_v14  ;;  %v7686_v46 = vunpack.i.l.bf16 %v7685_v14  ;;  %v7692_v10 = vunpack.i.h.bf16 %v7690_v54  ;;  %v7691_v9 = vunpack.i.l.bf16 %v7690_v54 }
 0xd9b   :  { %7185 = vmatprep.subr.bf16.mxu0 %v12420_v57 }
 0xd9c   :  { %v7192_v39 = vpack.c.bf16 %v7687_v18, %v7686_v46  ;;  %v7195_v58 = vpack.c.bf16 %v7692_v10, %v7691_v9 }
 0xd9d   :  { %v7700_v31 = vpop.permute.xlu1 %7699  ;;  %v7695_v24 = vpop.permute.xlu0 %7694 }
 0xd9e   :  { %7187 = vmatpush1.bf16.msra.mxu0 %v7186_v45  ;;  %v7697_v23 = vunpack.i.h.bf16 %v7695_v24  ;;  %v7696_v22 = vunpack.i.l.bf16 %v7695_v24  ;;  %v7702_v36 = vunpack.i.h.bf16 %v7700_v31  ;;  %v7701_v44 = vunpack.i.l.bf16 %v7700_v31 }
 0xd9f   :  { %7188 = vmatprep.subr.bf16.mxu0 %v12420_v57 }
 0xda0   :  { %v7198_v55 = vpack.c.bf16 %v7697_v23, %v7696_v22  ;;  %v7201_v40 = vpack.c.bf16 %v7702_v36, %v7701_v44 }
 0xda1   :  { %v572_v26 = vpop.permute.xlu1 %571  ;;  %v570_v25 = vpop.permute.xlu0 %569 }
 0xda2   :  { %v582_v2 = vadd.f32 %v572_v26, %v11526_v61  ;;  %v581_v32 = vadd.f32 %v570_v25, %v11531_v47  ;;  %7190 = vmatpush1.bf16.msra.mxu0 %v7189_v41 }
 0xda3   :  { %7191 = vmatprep.subr.bf16.mxu0 %v12420_v57 }
 0xda4   :  { %2952 = vperm.xlu1 %7707, %v582_v2   ;;  %2947 = vperm.xlu0 %7710, %v581_v32   ;;  %v585_v43 = vsub.f32 1.0, %v581_v32  ;;  %v586_v61 = vsub.f32 1.0, %v582_v2 }
 0xda5   :  { %v576_v27 = vpop.permute.xlu1 %575  ;;  %v574_v37 = vpop.permute.xlu0 %573 }
 0xda6   :  { %v584_v17 = vadd.f32 %v576_v27, %v11540_v52  ;;  %v583_v1 = vadd.f32 %v574_v37, %v11545_v49  ;;  %7193 = vmatpush1.bf16.msra.mxu0 %v7192_v39  ;;  %v5275_v27 = vld [vmem:[%s11794_s13 + $0x1] ss:$0 sm:$0xff] }
 0xda7   :  { %7194 = vmatprep.subr.bf16.mxu0 %v12420_v57 }
 0xda8   :  { %2962 = vperm.xlu0 %7710, %v584_v17   ;;  %2957 = vperm.xlu1 %7707, %v583_v1   ;;  %v588_v7 = vsub.f32 1.0, %v584_v17  ;;  %v587_v8 = vsub.f32 1.0, %v583_v1 }
 0xda9   :  { %v592_v38 = vpop.permute.xlu1 %591  ;;  %v590_v6 = vpop.permute.xlu0 %589 }
 0xdaa   :  { %v601_v11 = vsub.f32 %v585_v43, %v590_v6  ;;  %7196 = vmatpush1.bf16.msra.mxu0 %v7195_v58  ;;  %v5274_v43 = vld [vmem:[%s11794_s13] ss:$0 sm:$0xff] }
 0xdab   :  { %7197 = vmatprep.subr.bf16.mxu0 %v12420_v57 }
 0xdac   :  { %7708 = vset.pattern.permute.xlu1 %v7915_v3  ;;  %2995 = vperm.xlu0 %7710, %v601_v11   ;;  %v12629_v3 = vld [vmem:[#allocation227_spill] sm:$0xff] }
 0xdad   :  { %v596_v59 = vpop.permute.xlu1 %595  ;;  %2970 = vperm.xlu1 %7708, %v11531_v47   ;;  %v602_v47 = vsub.f32 %v586_v61, %v592_v38 }
 0xdae   :  { %v604_v4 = vsub.f32 %v588_v7, %v596_v59  ;;  %7199 = vmatpush1.bf16.msra.mxu0 %v7198_v55 }
 0xdaf   :  { %7200 = vmatprep.subr.bf16.mxu0 %v12420_v57  ;;  %v7885_v57 = vld [vmem:[%s11789_s5 + $0x18] sm:$0xff] }
 0xdb0   :  { %3010 = vperm.xlu0 %7710, %v604_v4  }
 0xdb1   :  { %2978 = vperm.xlu1 %7708, %v11545_v49   ;;  %v594_v49 = vpop.permute.xlu0 %593 }
 0xdb2   :  { %7202 = vmatpush1.bf16.msra.mxu0 %v7201_v40  ;;  %v603_v53 = vsub.f32 %v587_v8, %v594_v49 }
 0xdb3   :  { %7204 = vmatprep.subr.bf16.mxu0 %v12626_v19 }
 0xdb5   :  { %2982 = vperm.xlu1 %7708, %v11540_v52   ;;  %5007 = vmatmul.mubr.f32.vlgmr.msra.gmra.mrb[64].mxu0 %v7884_v30  ;;  %v7886_v52 = vld [vmem:[%s11789_s5 + $0x10] sm:$0xff] }
 0xdb6   :  { %5369 = vmatprep.mubr.msk.f32.mxu0 %vm2582_vm15, %v7885_v57  ;;  %7206 = vmatpush3.bf16.msra.mxu0 %v12626_v19 }
 0xdb7   :  { %7208 = vmatprep.subr.bf16.mxu0 %v12627_v12 }
 0xdb9   :  { %7711 = vset.pattern.permute.xlu1 %v12625_v15  ;;  %5012 = vmatmul.mubr.f32.gmra.mrb[66].mxu0 %v7886_v52 }
 0xdba   :  { %3000 = vperm.xlu1 %7711, %v602_v47   ;;  %7210 = vmatpush3.bf16.msra.mxu0 %v12627_v12 }
 0xdbb   :  { %7212 = vmatprep.subr.bf16.mxu0 %v12628_v29 }
 0xdbe   :  { %3005 = vperm.xlu1 %7711, %v603_v53   ;;  %7214 = vmatpush3.bf16.msra.mxu0 %v12628_v29  ;;  %v11627_v16 = vpop.permute.xlu1 %2766  ;;  %v516_v62 = vpop.permute.xlu0 %515 }
 0xdbf   :  { %7216 = vmatprep.subr.bf16.mxu0 %v12629_v3  ;;  %v2863_v56 = vadd.f32 %v11233_v13, %v11627_v16  ;;  %v537_v23 = vmul.f32 %v5274_v43, %v516_v62 }
 0xdc1   :  { %v5319_v28 = vmul.f32 -1.442695, %v2863_v56 }
 0xdc2   :  { %7218 = vmatpush3.bf16.msra.mxu0 %v12629_v3  ;;  %v11629_v50 = vpop.permute.xlu1 %2776  ;;  %v11631_v21 = vpop.permute.xlu0 %2771 }
 0xdc3   :  { %7221 = vmatprep.subr.msk.bf16.mxu0 %vm10751_vm10, %v12630_v0  ;;  %7840 = vpow2.f32 %v5319_v28  ;;  %v2868_v34 = vadd.f32 %v11231_v42, %v11631_v21  ;;  %v2873_v33 = vadd.f32 %v11237_v20, %v11629_v50 }
 0xdc5   :  { %v5320_v14 = vmul.f32 -1.442695, %v2868_v34  ;;  %v5321_v31 = vmul.f32 -1.442695, %v2873_v33 }
 0xdc6   :  { %7224 = vmatpush3.bf16.msk.msra.mxu0 %vm10751_vm10, %v12630_v0  ;;  %v521_v5 = vpop.permute.xlu1 %520  ;;  %v11635_v63 = vpop.permute.xlu0 %2781  ;;  %vm3025_vm10 = vcmask 518144  }
 0xdc7   :  { %v2878_v48 = vadd.f32 %v11235_v51, %v11635_v63  ;;  %v538_v52 = vmul.f32 %v5274_v43, %v521_v5 }
 0xdc9   :  { %v5322_v54 = vmul.f32 -1.442695, %v2878_v48 }
 0xdca   :  { %v531_v60 = vpop.permute.xlu1 %530 }
 0xdcb   :  { %7842 = vpow2.f32 %v5322_v54  ;;  %v543_v35 = vpop.permute.xlu0 %542  ;;  %v540_v57 = vmul.f32 %v5274_v43, %v531_v60 }
 0xdcc   :  { %7844 = vpow2.f32 %v5320_v14  ;;  %v561_v58 = vmul.f32 %v5275_v27, %v543_v35 }
 0xdcd   :  { %v7841_v45 = vpop.eup %7840  ;;  %7846 = vpow2.f32 %v5321_v31 }
 0xdce   :  { %v2893_v41 = vadd.f32 1.0, %v7841_v45  ;;  %v11663_v36 = vadd.f32 %v561_v58, %v537_v23 }
 0xdcf   :  { %v547_v13 = vpop.permute.xlu1 %546  ;;  %v555_v18 = vpop.permute.xlu0 %554 }
 0xdd0   :  { %7848 = vrcp.f32 %v2893_v41  ;;  %v564_v19 = vmul.f32 %v5275_v27, %v555_v18  ;;  %v562_v30 = vmul.f32 %v5275_v27, %v547_v13 }
 0xdd2   :  { %v11675_v0 = vadd.f32 %v564_v19, %v540_v57  ;;  %v11679_v56 = vadd.f32 %v562_v30, %v538_v52  ;;  %v12632_v52 = vld [vmem:[#allocation219_spill] sm:$0xff] }
 0xdd3   :  { %v551_v24 = vpop.permute.xlu1 %550 }
 0xdd4   :  { %v11643_v46 = vpop.permute.xlu0 %2930  ;;  %v563_v28 = vmul.f32 %v5275_v27, %v551_v24 }
 0xdd5   :  { %v7843_v51 = vpop.eup %7842 }
 0xdd6   :  { %v7845_v26 = vpop.eup %7844  ;;  %v2896_v25 = vadd.f32 1.0, %v7843_v51 }
 0xdd7   :  { %v2894_v2 = vadd.f32 1.0, %v7845_v26  ;;  %v7847_v10 = vpop.eup %7846 }
 0xdd8   :  { %v11645_v42 = vpop.permute.xlu1 %2926  ;;  %7850 = vrcp.f32 %v2896_v25  ;;  %v2895_v39 = vadd.f32 1.0, %v7847_v10 }
 0xdd9   :  { %v11647_v20 = vpop.permute.xlu0 %2974  ;;  %7852 = vrcp.f32 %v2894_v2 }
 0xdda   :  { %v7849_v9 = vpop.eup %7848  ;;  %7854 = vrcp.f32 %v2895_v39 }
 0xddb   :  { %v2905_v37 = vmul.f32 2.0, %v7849_v9 }
 0xddc   :  { %v11649_v32 = vpop.permute.xlu1 %2934 }
 0xddd   :  { %v5323_v38 = vadd.f32 -0.5, %v2905_v37  ;;  %v2921_v44 = vmul.f32 %v2905_v37, %v2905_v37 }
 0xdde   :  { %v526_v17 = vpop.permute.xlu0 %525 }
 0xddf   :  { %v2913_v59 = vadd.f32 %v5323_v38, %v11663_v36  ;;  %v2941_v8 = vmul.f32 %v11645_v42, %v2921_v44  ;;  %v539_v48 = vmul.f32 %v5274_v43, %v526_v17 }
 0xde0   :  { %v11654_v1 = vpop.permute.xlu1 %2938 }
 0xde1   :  { %v2917_v49 = vmul.f32 4.0, %v2913_v59  ;;  %v11686_v31 = vadd.f32 %v563_v28, %v539_v48  ;;  %v12633_v48 = vld [vmem:[#allocation215_spill] sm:$0xff] }
 0xde2   :  { %v7851_v11 = vpop.eup %7850 }
 0xde3   :  { %v7853_v7 = vpop.eup %7852  ;;  %v2908_v55 = vmul.f32 2.0, %v7851_v11 }
 0xde4   :  { %v2906_v61 = vmul.f32 2.0, %v7853_v7  ;;  %v7855_v47 = vpop.eup %7854 }
 0xde5   :  { %v5326_v12 = vadd.f32 -0.5, %v2908_v55  ;;  %v2907_v34 = vmul.f32 2.0, %v7855_v47  ;;  %v2924_v60 = vmul.f32 %v2908_v55, %v2908_v55 }
 0xde6   :  { %v5324_v53 = vadd.f32 -0.5, %v2906_v61  ;;  %v2922_v33 = vmul.f32 %v2906_v61, %v2906_v61 }
 0xde7   :  { %v2916_v54 = vadd.f32 %v5326_v12, %v11675_v0  ;;  %v5325_v41 = vadd.f32 -0.5, %v2907_v34  ;;  %v2944_v24 = vmul.f32 %v11654_v1, %v2924_v60  ;;  %v2923_v26 = vmul.f32 %v2907_v34, %v2907_v34 }
 0xde8   :  { %v2914_v35 = vadd.f32 %v5324_v53, %v11679_v56  ;;  %v2942_v51 = vmul.f32 %v11643_v46, %v2922_v33 }
 0xde9   :  { %v2920_v18 = vmul.f32 4.0, %v2916_v54  ;;  %v2915_v37 = vadd.f32 %v5325_v41, %v11686_v31  ;;  %v2943_v23 = vmul.f32 %v11649_v32, %v2923_v26 }
 0xdea   :  { %v2918_v25 = vmul.f32 4.0, %v2914_v35  ;;  %v2986_v58 = vmul.f32 %v11647_v20, %v2942_v51 }
 0xdeb   :  { %v2919_v59 = vmul.f32 4.0, %v2915_v37 }
 0xe23   :  { %v11659_v22 = vpop.permute.xlu1 %2952  ;;  %v11661_v6 = vpop.permute.xlu0 %2947 }
 0xe24   :  { %v2965_v15 = vmul.f32 %v11661_v6, %v2917_v49  ;;  %v2966_v27 = vmul.f32 %v11659_v22, %v2918_v25  ;;  %v7887_v25 = vld [vmem:[%s11791_s7 + $0x8] sm:$0xff] }
 0xe26   :  { %v2990_v55 = vadd.f32 %v2986_v58, %v2966_v27 }
 0xe27   :  { %v11666_v4 = vpop.permute.xlu1 %2957  ;;  %v11668_v40 = vpop.permute.xlu0 %2962 }
 0xe2b   :  { %v11671_v29 = vpop.permute.xlu0 %2995 }
 0xe2c   :  { %v11673_v3 = vpop.permute.xlu1 %2970  ;;  %v3013_v5 = vmul.f32 %v7849_v9, %v11671_v29  ;;  %v2968_v9 = vmul.f32 %v11668_v40, %v2920_v18 }
 0xe2d   :  { %v2985_v62 = vmul.f32 %v11673_v3, %v2941_v8 }
 0xe2f   :  { %v2989_v14 = vadd.f32 %v2985_v62, %v2965_v15  ;;  %v11694_v2 = vpop.permute.xlu0 %3010 }
 0xe30   :  { %v11684_v13 = vpop.permute.xlu1 %2978  ;;  %v3016_v17 = vmul.f32 %v7851_v11, %v11694_v2  ;;  %v2967_v11 = vmul.f32 %v11666_v4, %v2919_v59 }
 0xe31   :  { %v3017_v45 = vadd.f32 %v3013_v5, %v2989_v14  ;;  %v2987_v61 = vmul.f32 %v11684_v13, %v2943_v23 }
 0xe33   :  { %3022 = vst.msk [vmem:[%s11795_s14] sm:$0xff] %vm3021_vm12, %v3017_v45  ;;  %v2991_v8 = vadd.f32 %v2987_v61, %v2967_v11 }
 0xe34   :  { %v11696_v10 = vpop.permute.xlu1 %2982 }
 0xe35   :  { %v2988_v39 = vmul.f32 %v11696_v10, %v2944_v24 }
 0xe37   :  { %v2992_v43 = vadd.f32 %v2988_v39, %v2968_v9  ;;  %v7888_v9 = vld [vmem:[%s11791_s7 + $0x10] sm:$0xff]  ;;  %v7889_v39 = vld [vmem:[%s11791_s7 + $0x18] sm:$0x7] }
 0xe39   :  { %v3020_v38 = vadd.f32 %v3016_v17, %v2992_v43  ;;  %v11705_v44 = vpop.permute.xlu1 %3000 }
 0xe3a   :  { %v3014_v19 = vmul.f32 %v7853_v7, %v11705_v44 }
 0xe3b   :  { %3026 = vst.msk [vmem:[%s11795_s14 + $0x18] sm:$0x7] %vm3025_vm10, %v3020_v38 }
 0xe3c   :  { %v3018_v30 = vadd.f32 %v3014_v19, %v2990_v55 }
 0xe3d   :  { %v11714_v57 = vpop.permute.xlu1 %3005 }
 0xe3e   :  { %3023 = vst.msk [vmem:[%s11795_s14 + $0x8] sm:$0xff] %vm3021_vm12, %v3018_v30  ;;  %v3015_v49 = vmul.f32 %v7855_v47, %v11714_v57 }
 0xe40   :  { %v3019_v12 = vadd.f32 %v3015_v49, %v2991_v8 }
 0xe42   :  { %3024 = vst.msk [vmem:[%s11795_s14 + $0x10] sm:$0xff] %vm3021_vm12, %v3019_v12 }
 0xe88   :  { %v5008_v7 = vpop.f32.mrb[64].mxu0 }
 0xe89   :  { %v5009_v53 = vadd.f32 %v5008_v7, %v12632_v52  ;;  %v5010_v15 = vpop.f32.mrb[65].mxu0 }
 0xe8b   :  { %v5370_v62 = vmul.f32 -1.442695, %v5009_v53 }
 0xe8c   :  { %v5013_v28 = vpop.f32.mrb[66].mxu0 }
 0xe8d   :  { %7856 = vpow2.f32 %v5370_v62  ;;  %v5014_v34 = vadd.f32 %v5013_v28, %v12633_v48  ;;  %v5015_v60 = vpop.f32.mrb[67].mxu0 }
 0xe8f   :  { %v5371_v54 = vmul.f32 -1.442695, %v5014_v34 }
 0xe91   :  { %7858 = vpow2.f32 %v5371_v54 }
 0xe97   :  { %v7857_v5 = vpop.eup %7856 }
 0xe98   :  { %v5023_v47 = vadd.f32 1.0, %v7857_v5 }
 0xe9a   :  { %7860 = vrcp.f32 %v5023_v47 }
 0xe9b   :  { %v7859_v14 = vpop.eup %7858 }
 0xe9c   :  { %v5024_v33 = vadd.f32 1.0, %v7859_v14 }
 0xe9e   :  { %7862 = vrcp.f32 %v5024_v33 }
 0xea4   :  { %v7861_v35 = vpop.eup %7860 }
 0xea5   :  { %v5029_v45 = vmul.f32 %v7861_v35, %v5009_v53 }
 0xea7   :  { %6016 = vmatprep.mubr.msk.f32.mxu0 %vm2678_vm11, %v5029_v45 }
 0xea8   :  { %v7863_v41 = vpop.eup %7862 }
 0xea9   :  { %v5030_v24 = vmul.f32 %v7863_v41, %v5014_v34 }
 0xeab   :  { %6017 = vmatmul.mubr.msk.f32.vlgmr.msra.gmra.mrb[68].mxu0 %vm2678_vm11, %v5030_v24 }
 0xf7e   :  { %v6018_v18 = vpop.f32.mrb[68].mxu0 }
 0xf7f   :  { %v5103_v51 = vpop.f32.mrb[69].mxu0 }
 0xf80   :  { %v7225_v26 = vpack.c.bf16 %v6018_v18, %v5103_v51 }
 0xf82   :  { %7226 = vmatprep.subr.bf16.mxu1 %v7225_v26 }
 0xf83   :  { %7228 = vmatpush3.bf16.msra.mxu1 %v7225_v26 }
 0xf86   :  { %6024 = vmatmul.mubr.msk.f32.vlgmr.msra.gmra.mrb[14].mxu1 %vm2582_vm15, %v7887_v25 }
 0xf87   :  { %6026 = vmatprep.mubr.msk.f32.mxu1 %vm2582_vm15, %v7888_v9 }
 0xf8a   :  { %6027 = vmatmul.mubr.msk.f32.gmra.mrb[16].mxu1 %vm2582_vm15, %v7889_v39 }
0x1059   :  { %v6025_v27 = vpop.f32.mrb[14].mxu1 }
0x105a   :  { %v5184_v37 = vadd.f32 %v6025_v27, %v11631_v21  ;;  %v5178_v17 = vpop.f32.mrb[15].mxu1 }
0x105b   :  { %v5179_v43 = vadd.f32 %v5178_v17, %v11627_v16 }
0x105c   :  { %v5380_v58 = vmul.f32 -1.442695, %v5184_v37 }
0x105d   :  { %v5379_v23 = vmul.f32 -1.442695, %v5179_v43  ;;  %v6028_v38 = vpop.f32.mrb[16].mxu1 }
0x105e   :  { %7864 = vpow2.f32 %v5380_v58  ;;  %v5194_v55 = vadd.f32 %v6028_v38, %v11635_v63  ;;  %v5188_v59 = vpop.f32.mrb[17].mxu1 }
0x105f   :  { %7866 = vpow2.f32 %v5379_v23  ;;  %v5189_v61 = vadd.f32 %v5188_v59, %v11629_v50 }
0x1060   :  { %v5382_v19 = vmul.f32 -1.442695, %v5194_v55 }
0x1061   :  { %v5381_v11 = vmul.f32 -1.442695, %v5189_v61 }
0x1062   :  { %7868 = vpow2.f32 %v5382_v19 }
0x1063   :  { %7870 = vpow2.f32 %v5381_v11 }
0x1068   :  { %v7865_v30 = vpop.eup %7864 }
0x1069   :  { %v7867_v8 = vpop.eup %7866  ;;  %v5210_v21 = vadd.f32 1.0, %v7865_v30 }
0x106a   :  { %v5209_v49 = vadd.f32 1.0, %v7867_v8 }
0x106b   :  { %7872 = vrcp.f32 %v5210_v21 }
0x106c   :  { %v7869_v16 = vpop.eup %7868  ;;  %7874 = vrcp.f32 %v5209_v49 }
0x106d   :  { %v7871_v12 = vpop.eup %7870  ;;  %v5212_v7 = vadd.f32 1.0, %v7869_v16 }
0x106e   :  { %v5211_v52 = vadd.f32 1.0, %v7871_v12 }
0x106f   :  { %7876 = vrcp.f32 %v5212_v7 }
0x1070   :  { %7878 = vrcp.f32 %v5211_v52 }
0x1075   :  { %v7873_v63 = vpop.eup %7872 }
0x1076   :  { %v7875_v53 = vpop.eup %7874  ;;  %v5222_v15 = vmul.f32 2.0, %v7873_v63  ;;  %v5258_v43 = vmul.f32 %v7873_v63, %v11705_v44 }
0x1077   :  { %v5221_v50 = vmul.f32 2.0, %v7875_v53 }
0x1078   :  { %v5384_v62 = vadd.f32 -0.5, %v5222_v15  ;;  %v5238_v28 = vmul.f32 %v5222_v15, %v5222_v15 }
0x1079   :  { %v7877_v48 = vpop.eup %7876  ;;  %v5383_v34 = vadd.f32 -0.5, %v5221_v50  ;;  %v5237_v60 = vmul.f32 %v5221_v50, %v5221_v50 }
0x107a   :  { %v7879_v54 = vpop.eup %7878  ;;  %v5230_v5 = vadd.f32 %v5384_v62, %v11679_v56  ;;  %v5242_v47 = vmul.f32 %v5238_v28, %v11643_v46  ;;  %v5224_v14 = vmul.f32 2.0, %v7877_v48  ;;  %v5260_v44 = vmul.f32 %v7877_v48, %v11694_v2 }
0x107b   :  { %v5229_v33 = vadd.f32 %v5383_v34, %v11663_v36  ;;  %v5241_v35 = vmul.f32 %v5237_v60, %v11645_v42  ;;  %v5223_v45 = vmul.f32 2.0, %v7879_v54 }
0x107c   :  { %v5234_v41 = vmul.f32 4.0, %v5230_v5  ;;  %v5386_v24 = vadd.f32 -0.5, %v5224_v14  ;;  %v5240_v18 = vmul.f32 %v5224_v14, %v5224_v14  ;;  %v5250_v39 = vmul.f32 %v5242_v47, %v11647_v20 }
0x107d   :  { %v5233_v51 = vmul.f32 4.0, %v5229_v33  ;;  %v5385_v26 = vadd.f32 -0.5, %v5223_v45  ;;  %v5239_v25 = vmul.f32 %v5223_v45, %v5223_v45  ;;  %v5249_v36 = vmul.f32 %v5241_v35, %v11673_v3 }
0x107e   :  { %v5246_v9 = vmul.f32 %v5234_v41, %v11659_v22  ;;  %v5232_v56 = vadd.f32 %v5386_v24, %v11675_v0  ;;  %v5244_v46 = vmul.f32 %v5240_v18, %v11654_v1  ;;  %v5257_v22 = vmul.f32 %v7875_v53, %v11671_v29 }
0x107f   :  { %v5245_v27 = vmul.f32 %v5233_v51, %v11661_v6  ;;  %v5231_v42 = vadd.f32 %v5385_v26, %v11686_v31  ;;  %v5243_v37 = vmul.f32 %v5239_v25, %v11649_v32  ;;  %v5259_v29 = vmul.f32 %v7879_v54, %v11714_v57 }
0x1080   :  { %v5254_v17 = vadd.f32 %v5250_v39, %v5246_v9  ;;  %v5236_v58 = vmul.f32 4.0, %v5232_v56  ;;  %v5252_v1 = vmul.f32 %v5244_v46, %v11696_v10 }
0x1081   :  { %v5253_v23 = vadd.f32 %v5249_v36, %v5245_v27  ;;  %v5235_v20 = vmul.f32 4.0, %v5231_v42  ;;  %v5251_v31 = vmul.f32 %v5243_v37, %v11684_v13 }
0x1082   :  { %v5262_v38 = vadd.f32 %v5258_v43, %v5254_v17  ;;  %v5248_v0 = vmul.f32 %v5236_v58, %v11668_v40 }
0x1083   :  { %v5261_v6 = vadd.f32 %v5257_v22, %v5253_v23  ;;  %v5247_v3 = vmul.f32 %v5235_v20, %v11666_v4 }
0x1084   :  { %5388 = vst.msk [vmem:[%s11795_s14 + $0x28] sm:$0xff] %vm3021_vm12, %v5262_v38  ;;  %v5256_v32 = vadd.f32 %v5252_v1, %v5248_v0 }
0x1085   :  { %5387 = vst.msk [vmem:[%s11795_s14 + $0x20] sm:$0xff] %vm3021_vm12, %v5261_v6  ;;  %v5255_v40 = vadd.f32 %v5251_v31, %v5247_v3 }
0x1086   :  { %v5264_v10 = vadd.f32 %v5260_v44, %v5256_v32 }
0x1087   :  { %v5263_v4 = vadd.f32 %v5259_v29, %v5255_v40 }
0x1088   :  { %5390 = vst.msk [vmem:[%s11795_s14 + $0x38] sm:$0x7] %vm3025_vm10, %v5264_v10 }
0x1089   :  { %5389 = vst.msk [vmem:[%s11795_s14 + $0x30] sm:$0xff] %vm3021_vm12, %v5263_v4 }

</bundles_post_ra>
